<compile_context>
chip_gen: v7x
topology: tpu7x:2x2x1
jax: 0.10.0
libtpu: 0.0.40
codegen_flags: <defaults>
</compile_context>

<pallas_src>
import functools

import jax
import jax.numpy as jnp
from jax.experimental import pallas as pl
from jax.experimental.pallas import tpu as pltpu

# ----------------------- small, shape-consistent config -----------------------
IMG = 16            # img_size
CH = 3              # channels
PATCH = 4           # patch_size
EMBED = 32          # embed_dim
HIDDEN = 64         # hidden_dim
LAYERS = 2          # num_layers
NUM_Q_HEADS = 4     # num_query_heads
Q_PER_GROUP = 2     # num_queries_per_group
NUM_KV_HEADS = NUM_Q_HEADS // Q_PER_GROUP
HEAD_DIM = EMBED // NUM_Q_HEADS
NUM_CLASSES = 8
NUM_PATCHES = (IMG // PATCH) ** 2
SEQ = NUM_PATCHES + 1            # 17 real rows per image
SEQ_PAD = ((SEQ + 7) // 8) * 8   # 24, sublane-aligned rows per image
CPP = CH * PATCH * PATCH
EPS = 1e-6

DQ = NUM_Q_HEADS * HEAD_DIM      # q projection width (== EMBED)
DKV = NUM_KV_HEADS * HEAD_DIM    # native k/v projection width


# --------------------------------- kernel -------------------------------------
def _ln(x, w, b):
    mu = jnp.mean(x, axis=-1, keepdims=True)
    var = jnp.mean((x - mu) ** 2, axis=-1, keepdims=True)
    return (x - mu) * jax.lax.rsqrt(var + EPS) * w + b


def _vit_kernel(nbatch,
                pat_ref, pw_ref, tok_ref,
                wqkv_ref, wo_ref, w1_ref, w2_ref, vec_ref,
                hw_ref, fvec_ref, out_ref):
    """Whole ViT forward for `nbatch` images; everything VMEM-resident."""
    scale = 1.0 / (HEAD_DIM ** 0.5)
    rows = nbatch * SEQ_PAD

    # Additive key-padding mask (columns >= SEQ are padding) — built once.
    col = jax.lax.broadcasted_iota(jnp.int32, (1, SEQ_PAD, SEQ_PAD), 2)
    kmask = jnp.where(col < SEQ, 0.0, -1e30).astype(jnp.float32)

    # ---- patch embedding (Conv2d-as-matmul) + cls token + pos embedding ------
    # pat_ref rows include a zero "cls" row and zero tail-padding rows per
    # image; tok_ref already contains cls_token + pos_embedding (+ conv bias
    # folded into the real patch rows, zeros on padding rows).
    x = jnp.dot(pat_ref[...], pw_ref[...], preferred_element_type=jnp.float32)
    x = x + tok_ref[...]                                   # (rows, EMBED) f32
    # dropout -> identity (eval mode)

    for l in range(LAYERS):                                # static unroll
        vecs = vec_ref[l]                                  # (10, HIDDEN) f32
        ln1w = vecs[0:1, 0:EMBED]
        ln1b = vecs[1:2, 0:EMBED]
        bq = vecs[2:3, 0:DQ]
        bk = vecs[3:4, 0:DQ]
        bv = vecs[4:5, 0:DQ]
        bo = vecs[5:6, 0:EMBED]
        ln2w = vecs[6:7, 0:EMBED]
        ln2b = vecs[7:8, 0:EMBED]
        b1 = vecs[8:9, 0:HIDDEN]
        b2 = vecs[9:10, 0:EMBED]

        # ---------------- attention sub-block (pre-norm) ----------------------
        xn = _ln(x, ln1w, ln1b).astype(jnp.bfloat16)       # (rows, EMBED)
        # Fused QKV projection on the batch-folded slab, bf16 -> f32 acc.
        qkv = jnp.dot(xn, wqkv_ref[l], preferred_element_type=jnp.float32)
        q = (qkv[:, 0:DQ] + bq) * scale
        k = qkv[:, DQ:2 * DQ] + bk
        v = qkv[:, 2 * DQ:3 * DQ] + bv

        q3 = q.reshape(nbatch, SEQ_PAD, DQ)                # sublane-aligned split
        k3 = k.reshape(nbatch, SEQ_PAD, DQ)
        v3 = v.reshape(nbatch, SEQ_PAD, DQ)

        wo_l = wo_ref[l]                                   # (H, HEAD_DIM, E) bf16
        acc = jnp.zeros((rows, EMBED), jnp.float32)
        for h in range(NUM_Q_HEADS):
            lo = h * HEAD_DIM
            qh = q3[:, :, lo:lo + HEAD_DIM].astype(jnp.bfloat16)   # (B,Sp,Hd)
            kh = k3[:, :, lo:lo + HEAD_DIM].astype(jnp.bfloat16)
            vh = v3[:, :, lo:lo + HEAD_DIM].astype(jnp.bfloat16)
            s = jnp.einsum('bqd,bkd->bqk', qh, kh,
                           preferred_element_type=jnp.float32)     # (B,Sp,Sp)
            s = s + kmask                                  # mask padded keys
            s = s - jnp.max(s, axis=-1, keepdims=True)
            p = jnp.exp(s)
            p = p * pl.reciprocal(jnp.sum(p, axis=-1, keepdims=True), approx=True)
            o = jnp.einsum('bqk,bkd->bqd', p.astype(jnp.bfloat16), vh,
                           preferred_element_type=jnp.float32)     # (B,Sp,Hd)
            # Fold the head-concat into the output projection (per-head slab).
            acc = acc + jnp.dot(o.reshape(rows, HEAD_DIM).astype(jnp.bfloat16),
                                wo_l[h], preferred_element_type=jnp.float32)
        x = x + acc + bo                                   # residual (dropout = id)

        # ---------------- MLP sub-block (pre-norm) ----------------------------
        xn2 = _ln(x, ln2w, ln2b).astype(jnp.bfloat16)
        h1 = jnp.dot(xn2, w1_ref[l], preferred_element_type=jnp.float32) + b1
        h1 = jax.nn.gelu(h1, approximate=True)             # TODO(synk): torch exact-erf GELU
        h2 = jnp.dot(h1.astype(jnp.bfloat16), w2_ref[l],
                     preferred_element_type=jnp.float32) + b2
        x = x + h2                                         # residual

    # ---- final LayerNorm + classifier head on the cls rows only --------------
    cls = jnp.concatenate(
        [x[b * SEQ_PAD:b * SEQ_PAD + 1, :] for b in range(nbatch)], axis=0)
    fvec = fvec_ref[...]                                   # (3, EMBED) f32
    norm_w = fvec[0:1, :]
    norm_b = fvec[1:2, :]
    head_b = fvec[2:3, 0:NUM_CLASSES]
    cls_n = _ln(cls, norm_w, norm_b).astype(jnp.bfloat16)
    out_ref[...] = (jnp.dot(cls_n, hw_ref[...], preferred_element_type=jnp.float32)
                    + head_b)                              # (B, NUM_CLASSES)


# --------------------------- parameters (synthetic) ----------------------------
def init_params(seed=0):
    """Torch-like parameter set (GQA block with DKV-wide K/V projections)."""
    keys = iter(jax.random.split(jax.random.PRNGKey(seed), 32))

    def trunc(shape, std=0.02):
        return (std * jax.random.truncated_normal(next(keys), -2.0, 2.0, shape)
                ).astype(jnp.float32)

    def randn(shape, s=1.0):
        return s * jax.random.normal(next(keys), shape, jnp.float32)

    conv_w = randn((EMBED, CH, PATCH, PATCH), 0.05)        # Conv2d weight
    conv_b = randn((EMBED,), 0.02)                         # Conv2d bias
    pos_embedding = randn((1, SEQ, EMBED))
    cls_token = randn((1, 1, EMBED))

    layers = []
    for _ in range(LAYERS):
        layers.append((
            jnp.ones((EMBED,), jnp.float32), jnp.zeros((EMBED,), jnp.float32),   # ln1
            trunc((EMBED, DQ)), jnp.zeros((DQ,), jnp.float32),                    # q
            trunc((EMBED, DKV)), jnp.zeros((DKV,), jnp.float32),                  # k
            trunc((EMBED, DKV)), jnp.zeros((DKV,), jnp.float32),                  # v
            trunc((DQ, EMBED)), jnp.zeros((EMBED,), jnp.float32),                 # out proj
            jnp.ones((EMBED,), jnp.float32), jnp.zeros((EMBED,), jnp.float32),   # ln2
            trunc((EMBED, HIDDEN)), jnp.zeros((HIDDEN,), jnp.float32),            # mlp fc1
            trunc((HIDDEN, EMBED)), jnp.zeros((EMBED,), jnp.float32),             # mlp fc2
        ))

    norm_w = jnp.ones((EMBED,), jnp.float32)
    norm_b = jnp.zeros((EMBED,), jnp.float32)
    head_w = trunc((EMBED, NUM_CLASSES))
    head_b = jnp.zeros((NUM_CLASSES,), jnp.float32)

    return dict(conv_w=conv_w, conv_b=conv_b, pos_embedding=pos_embedding,
                cls_token=cls_token, layers=layers,
                norm_w=norm_w, norm_b=norm_b, head_w=head_w, head_b=head_b)


def pack_params(p):
    """Host-side repack for the fused kernel: stack per-layer weights, expand
    K/V to one copy per query head (GQA -> MHA, exact), fuse QKV, pack small
    vectors, and pad the per-image sequence to SEQ_PAD rows."""
    patch_w = p["conv_w"].reshape(EMBED, CPP).T.astype(jnp.bfloat16)   # (CPP, E)

    # tok_bias: row 0 = cls_token + pos[0]; rows 1..SEQ-1 = pos[1..] + conv
    # bias; rows SEQ..SEQ_PAD-1 = 0 (padding rows stay zero pre-LN).
    pos = p["pos_embedding"][0]                            # (SEQ, E)
    tok_bias = jnp.zeros((SEQ_PAD, EMBED), jnp.float32)
    tok_bias = tok_bias.at[0, :].set(pos[0] + p["cls_token"][0, 0])
    tok_bias = tok_bias.at[1:SEQ, :].set(pos[1:] + p["conv_b"][None, :])

    def expand_w(w):   # (E, DKV) -> (E, DQ): kv head g serves query heads g*QPG..
        w3 = w.reshape(EMBED, NUM_KV_HEADS, HEAD_DIM)
        return jnp.repeat(w3, Q_PER_GROUP, axis=1).reshape(EMBED, DQ)

    def expand_b(b):
        return jnp.repeat(b.reshape(NUM_KV_HEADS, HEAD_DIM), Q_PER_GROUP,
                          axis=0).reshape(DQ)

    def padrow(v):
        v = v.reshape(-1)
        return jnp.pad(v, (0, HIDDEN - v.shape[0]))

    wqkv, wo, w1, w2, vecs = [], [], [], [], []
    for lyr in p["layers"]:
        (ln1w, ln1b, Wq, bq, Wk, bk, Wv, bv, Wo, bo,
         ln2w, ln2b, W1, b1, W2, b2) = lyr
        wqkv.append(jnp.concatenate([Wq, expand_w(Wk), expand_w(Wv)], axis=1))
        wo.append(Wo.reshape(NUM_Q_HEADS, HEAD_DIM, EMBED))   # per-head slabs
        w1.append(W1)
        w2.append(W2)
        vecs.append(jnp.stack([
            padrow(ln1w), padrow(ln1b), padrow(bq),
            padrow(expand_b(bk)), padrow(expand_b(bv)), padrow(bo),
            padrow(ln2w), padrow(ln2b), padrow(b1), padrow(b2)]))

    head_b_pad = jnp.pad(p["head_b"].reshape(-1), (0, EMBED - NUM_CLASSES))
    final_vec = jnp.stack([p["norm_w"].reshape(-1), p["norm_b"].reshape(-1),
                           head_b_pad]).astype(jnp.float32)

    return dict(
        patch_w=patch_w, tok_bias=tok_bias,
        wqkv=jnp.stack(wqkv).astype(jnp.bfloat16),   # (L, E, 3*DQ) fused q/k/v
        wo=jnp.stack(wo).astype(jnp.bfloat16),       # (L, H, HEAD_DIM, E)
        w1=jnp.stack(w1).astype(jnp.bfloat16),       # (L, E, HIDDEN)
        w2=jnp.stack(w2).astype(jnp.bfloat16),       # (L, HIDDEN, E)
        vec=jnp.stack(vecs).astype(jnp.float32),     # (L, 10, HIDDEN)
        head_w=p["head_w"].astype(jnp.bfloat16),     # (E, NUM_CLASSES)
        final_vec=final_vec,                         # (3, E)
    )


# --------------------------------- forward -------------------------------------
@jax.jit
def vit_forward(x, pk):
    b = x.shape[0]
    # Patch extraction glue: NCHW -> (B, NP, C*P*P), feature order (c, ph, pw)
    # to match Conv2d weight flattening; prepend a zero row per image for cls
    # and append zero rows to pad each image to SEQ_PAD rows.
    pat = x.reshape(b, CH, IMG // PATCH, PATCH, IMG // PATCH, PATCH)
    pat = pat.transpose(0, 2, 4, 1, 3, 5).reshape(b, NUM_PATCHES, CPP)
    pat = jnp.pad(pat, ((0, 0), (1, SEQ_PAD - SEQ), (0, 0)))
    pat = pat.reshape(b * SEQ_PAD, CPP).astype(jnp.bfloat16)
    tok = jnp.tile(pk["tok_bias"], (b, 1))                 # (B*SEQ_PAD, E) f32

    vmem = pl.BlockSpec(memory_space=pltpu.MemorySpace.VMEM)
    return pl.pallas_call(
        functools.partial(_vit_kernel, b),
        out_shape=jax.ShapeDtypeStruct((b, NUM_CLASSES), jnp.float32),
        in_specs=[vmem] * 10,
        out_specs=vmem,
        compiler_params=pltpu.CompilerParams(vmem_limit_bytes=64 << 20),
    )(pat, pk["patch_w"], tok,
      pk["wqkv"], pk["wo"], pk["w1"], pk["w2"], pk["vec"],
      pk["head_w"], pk["final_vec"])


# ----------------------------------- main --------------------------------------
if __name__ == "__main__":
    x = jax.random.normal(jax.random.PRNGKey(0), (2, CH, IMG, IMG), jnp.float32)
    params = init_params(seed=0)
    packed = pack_params(params)

    out = vit_forward(x, packed)
    out = jax.block_until_ready(out)

    assert out.shape == (2, NUM_CLASSES), out.shape
    assert bool(jnp.all(jnp.isfinite(out)))
    print("KERNEL_OK")
</pallas_src>

<mosaic_0001>
module attributes {stable_mosaic.version = 11 : i64} {
  func.func @_vit_kernel(%arg0: memref<48x48xbf16, #tpu.memory_space<vmem>>, %arg1: memref<48x32xbf16, #tpu.memory_space<vmem>>, %arg2: memref<48x32xf32, #tpu.memory_space<vmem>>, %arg3: memref<2x32x96xbf16, #tpu.memory_space<vmem>>, %arg4: memref<2x4x8x32xbf16, #tpu.memory_space<vmem>>, %arg5: memref<2x32x64xbf16, #tpu.memory_space<vmem>>, %arg6: memref<2x64x32xbf16, #tpu.memory_space<vmem>>, %arg7: memref<2x10x64xf32, #tpu.memory_space<vmem>>, %arg8: memref<32x8xbf16, #tpu.memory_space<vmem>>, %arg9: memref<3x32xf32, #tpu.memory_space<vmem>>, %arg10: memref<2x8xf32, #tpu.memory_space<vmem>>) attributes {dimension_semantics = [], scalar_prefetch = 0 : i64, scratch_operands = 0 : i64, tpu.core_type = #tpu.core_type<tc>} {
    %0 = tpu.iota {dimensions = array<i32: 2>} : vector<1x24x24xi32>
    %c17_i32 = arith.constant 17 : i32
    %1 = vector.broadcast %c17_i32 : i32 to vector<1x24x24xi32>
    %2 = arith.cmpi slt, %0, %1 : vector<1x24x24xi32>
    %cst = arith.constant 0.000000e+00 : f32
    %cst_0 = arith.constant -1.000000e+30 : f32
    %3 = vector.broadcast %cst : f32 to vector<1x24x24xf32>
    %4 = vector.broadcast %cst_0 : f32 to vector<1x24x24xf32>
    %5 = arith.select %2, %3, %4 : vector<1x24x24xi1>, vector<1x24x24xf32>
    %c0 = arith.constant 0 : index
    %c0_1 = arith.constant 0 : index
    %6 = vector.load %arg0[%c0, %c0_1] : memref<48x48xbf16, #tpu.memory_space<vmem>>, vector<48x48xbf16>
    %c0_2 = arith.constant 0 : index
    %c0_3 = arith.constant 0 : index
    %7 = vector.load %arg1[%c0_2, %c0_3] : memref<48x32xbf16, #tpu.memory_space<vmem>>, vector<48x32xbf16>
    %cst_4 = arith.constant dense<0.000000e+00> : vector<48x32xf32>
    %8 = tpu.matmul %6, %7, %cst_4 {dimension_numbers = #tpu.dot_dimension_numbers<[1], [0], [0], [1], [0, 0, 1, 1], [], []>} : vector<48x48xbf16>, vector<48x32xbf16>, vector<48x32xf32> -> vector<48x32xf32>
    %c0_5 = arith.constant 0 : index
    %c0_6 = arith.constant 0 : index
    %9 = vector.load %arg2[%c0_5, %c0_6] : memref<48x32xf32, #tpu.memory_space<vmem>>, vector<48x32xf32>
    %10 = arith.addf %8, %9 : vector<48x32xf32>
    %c0_7 = arith.constant 0 : index
    %c0_8 = arith.constant 0 : index
    %c0_9 = arith.constant 0 : index
    %11 = vector.load %arg7[%c0_7, %c0_8, %c0_9] : memref<2x10x64xf32, #tpu.memory_space<vmem>>, vector<1x10x64xf32>
    %12 = vector.shape_cast %11 : vector<1x10x64xf32> to vector<10x64xf32>
    %13 = vector.extract_strided_slice %12 {offsets = [0, 0], sizes = [1, 32], strides = [1, 1]} : vector<10x64xf32> to vector<1x32xf32>
    %14 = vector.extract_strided_slice %12 {offsets = [1, 0], sizes = [1, 32], strides = [1, 1]} : vector<10x64xf32> to vector<1x32xf32>
    %15 = vector.extract_strided_slice %12 {offsets = [2, 0], sizes = [1, 32], strides = [1, 1]} : vector<10x64xf32> to vector<1x32xf32>
    %16 = vector.extract_strided_slice %12 {offsets = [3, 0], sizes = [1, 32], strides = [1, 1]} : vector<10x64xf32> to vector<1x32xf32>
    %17 = vector.extract_strided_slice %12 {offsets = [4, 0], sizes = [1, 32], strides = [1, 1]} : vector<10x64xf32> to vector<1x32xf32>
    %18 = vector.extract_strided_slice %12 {offsets = [5, 0], sizes = [1, 32], strides = [1, 1]} : vector<10x64xf32> to vector<1x32xf32>
    %19 = vector.extract_strided_slice %12 {offsets = [6, 0], sizes = [1, 32], strides = [1, 1]} : vector<10x64xf32> to vector<1x32xf32>
    %20 = vector.extract_strided_slice %12 {offsets = [7, 0], sizes = [1, 32], strides = [1, 1]} : vector<10x64xf32> to vector<1x32xf32>
    %21 = vector.extract_strided_slice %12 {offsets = [8, 0], sizes = [1, 64], strides = [1, 1]} : vector<10x64xf32> to vector<1x64xf32>
    %22 = vector.extract_strided_slice %12 {offsets = [9, 0], sizes = [1, 32], strides = [1, 1]} : vector<10x64xf32> to vector<1x32xf32>
    %cst_10 = arith.constant dense<0.000000e+00> : vector<48xf32>
    %23 = vector.multi_reduction <add>, %10, %cst_10 [1] : vector<48x32xf32> to vector<48xf32>
    %24 = vector.shape_cast %23 : vector<48xf32> to vector<48x1xf32>
    %cst_11 = arith.constant 3.200000e+01 : f32
    %25 = vector.broadcast %cst_11 : f32 to vector<48x1xf32>
    %26 = arith.divf %24, %25 : vector<48x1xf32>
    %27 = vector.broadcast %26 : vector<48x1xf32> to vector<48x32xf32>
    %28 = arith.subf %10, %27 : vector<48x32xf32>
    %29 = arith.mulf %28, %28 : vector<48x32xf32>
    %cst_12 = arith.constant dense<0.000000e+00> : vector<48xf32>
    %30 = vector.multi_reduction <add>, %29, %cst_12 [1] : vector<48x32xf32> to vector<48xf32>
    %31 = vector.shape_cast %30 : vector<48xf32> to vector<48x1xf32>
    %cst_13 = arith.constant 3.200000e+01 : f32
    %32 = vector.broadcast %cst_13 : f32 to vector<48x1xf32>
    %33 = arith.divf %31, %32 : vector<48x1xf32>
    %34 = vector.broadcast %26 : vector<48x1xf32> to vector<48x32xf32>
    %35 = arith.subf %10, %34 : vector<48x32xf32>
    %cst_14 = arith.constant 9.99999997E-7 : f32
    %36 = vector.broadcast %cst_14 : f32 to vector<48x1xf32>
    %37 = arith.addf %33, %36 : vector<48x1xf32>
    %38 = math.rsqrt %37 : vector<48x1xf32>
    %39 = vector.broadcast %38 : vector<48x1xf32> to vector<48x32xf32>
    %40 = arith.mulf %35, %39 : vector<48x32xf32>
    %41 = vector.broadcast %13 : vector<1x32xf32> to vector<48x32xf32>
    %42 = arith.mulf %40, %41 : vector<48x32xf32>
    %43 = vector.broadcast %14 : vector<1x32xf32> to vector<48x32xf32>
    %44 = arith.addf %42, %43 : vector<48x32xf32>
    %45 = arith.truncf %44 : vector<48x32xf32> to vector<48x32xbf16>
    %c0_15 = arith.constant 0 : index
    %c0_16 = arith.constant 0 : index
    %c0_17 = arith.constant 0 : index
    %46 = vector.load %arg3[%c0_15, %c0_16, %c0_17] : memref<2x32x96xbf16, #tpu.memory_space<vmem>>, vector<1x32x96xbf16>
    %47 = vector.shape_cast %46 : vector<1x32x96xbf16> to vector<32x96xbf16>
    %cst_18 = arith.constant dense<0.000000e+00> : vector<48x96xf32>
    %48 = tpu.matmul %45, %47, %cst_18 {dimension_numbers = #tpu.dot_dimension_numbers<[1], [0], [0], [1], [0, 0, 1, 1], [], []>} : vector<48x32xbf16>, vector<32x96xbf16>, vector<48x96xf32> -> vector<48x96xf32>
    %49 = vector.extract_strided_slice %48 {offsets = [0, 0], sizes = [48, 32], strides = [1, 1]} : vector<48x96xf32> to vector<48x32xf32>
    %50 = vector.broadcast %15 : vector<1x32xf32> to vector<48x32xf32>
    %51 = arith.addf %49, %50 : vector<48x32xf32>
    %cst_19 = arith.constant 0.353553385 : f32
    %52 = vector.broadcast %cst_19 : f32 to vector<48x32xf32>
    %53 = arith.mulf %51, %52 : vector<48x32xf32>
    %54 = vector.extract_strided_slice %48 {offsets = [0, 32], sizes = [48, 32], strides = [1, 1]} : vector<48x96xf32> to vector<48x32xf32>
    %55 = vector.broadcast %16 : vector<1x32xf32> to vector<48x32xf32>
    %56 = arith.addf %54, %55 : vector<48x32xf32>
    %57 = vector.extract_strided_slice %48 {offsets = [0, 64], sizes = [48, 32], strides = [1, 1]} : vector<48x96xf32> to vector<48x32xf32>
    %58 = vector.broadcast %17 : vector<1x32xf32> to vector<48x32xf32>
    %59 = arith.addf %57, %58 : vector<48x32xf32>
    %60 = vector.shape_cast %53 : vector<48x32xf32> to vector<2x24x32xf32>
    %61 = vector.shape_cast %56 : vector<48x32xf32> to vector<2x24x32xf32>
    %62 = vector.shape_cast %59 : vector<48x32xf32> to vector<2x24x32xf32>
    %c0_20 = arith.constant 0 : index
    %c0_21 = arith.constant 0 : index
    %c0_22 = arith.constant 0 : index
    %c0_23 = arith.constant 0 : index
    %63 = vector.load %arg4[%c0_20, %c0_21, %c0_22, %c0_23] : memref<2x4x8x32xbf16, #tpu.memory_space<vmem>>, vector<1x4x8x32xbf16>
    %64 = vector.shape_cast %63 : vector<1x4x8x32xbf16> to vector<4x8x32xbf16>
    %cst_24 = arith.constant 0.000000e+00 : f32
    %65 = vector.broadcast %cst_24 : f32 to vector<48x32xf32>
    %66 = vector.extract_strided_slice %60 {offsets = [0, 0, 0], sizes = [2, 24, 8], strides = [1, 1, 1]} : vector<2x24x32xf32> to vector<2x24x8xf32>
    %67 = arith.truncf %66 : vector<2x24x8xf32> to vector<2x24x8xbf16>
    %68 = vector.extract_strided_slice %61 {offsets = [0, 0, 0], sizes = [2, 24, 8], strides = [1, 1, 1]} : vector<2x24x32xf32> to vector<2x24x8xf32>
    %69 = arith.truncf %68 : vector<2x24x8xf32> to vector<2x24x8xbf16>
    %70 = vector.extract_strided_slice %62 {offsets = [0, 0, 0], sizes = [2, 24, 8], strides = [1, 1, 1]} : vector<2x24x32xf32> to vector<2x24x8xf32>
    %71 = arith.truncf %70 : vector<2x24x8xf32> to vector<2x24x8xbf16>
    "tpu.trace_start"() <{level = 10 : i32, message = "bqd,bkd->bqk"}> : () -> ()
    %cst_25 = arith.constant dense<0.000000e+00> : vector<2x24x24xf32>
    %72 = tpu.matmul %67, %69, %cst_25 {dimension_numbers = #tpu.dot_dimension_numbers<[2], [2], [1], [1], [0, 0, 0, 1, 1, 1], [0], [0]>} : vector<2x24x8xbf16>, vector<2x24x8xbf16>, vector<2x24x24xf32> -> vector<2x24x24xf32>
    "tpu.trace_stop"() : () -> ()
    %73 = vector.broadcast %5 : vector<1x24x24xf32> to vector<2x24x24xf32>
    %74 = arith.addf %72, %73 : vector<2x24x24xf32>
    %cst_26 = arith.constant dense<0xFF800000> : vector<2x24xf32>
    %75 = vector.multi_reduction <maximumf>, %74, %cst_26 [2] : vector<2x24x24xf32> to vector<2x24xf32>
    %76 = vector.shape_cast %75 : vector<2x24xf32> to vector<2x24x1xf32>
    %77 = vector.broadcast %76 : vector<2x24x1xf32> to vector<2x24x24xf32>
    %78 = arith.subf %74, %77 : vector<2x24x24xf32>
    %79 = math.exp %78 : vector<2x24x24xf32>
    %cst_27 = arith.constant dense<0.000000e+00> : vector<2x24xf32>
    %80 = vector.multi_reduction <add>, %79, %cst_27 [2] : vector<2x24x24xf32> to vector<2x24xf32>
    %81 = vector.shape_cast %80 : vector<2x24xf32> to vector<2x24x1xf32>
    %82 = tpu.reciprocal %81 {approx = true} : vector<2x24x1xf32> -> vector<2x24x1xf32>
    %83 = vector.broadcast %82 : vector<2x24x1xf32> to vector<2x24x24xf32>
    %84 = arith.mulf %79, %83 : vector<2x24x24xf32>
    %85 = arith.truncf %84 : vector<2x24x24xf32> to vector<2x24x24xbf16>
    "tpu.trace_start"() <{level = 10 : i32, message = "bqk,bkd->bqd"}> : () -> ()
    %cst_28 = arith.constant dense<0.000000e+00> : vector<2x24x8xf32>
    %86 = tpu.matmul %85, %71, %cst_28 {dimension_numbers = #tpu.dot_dimension_numbers<[2], [1], [1], [2], [0, 0, 0, 1, 1, 2], [0], [0]>} : vector<2x24x24xbf16>, vector<2x24x8xbf16>, vector<2x24x8xf32> -> vector<2x24x8xf32>
    "tpu.trace_stop"() : () -> ()
    %87 = vector.shape_cast %86 : vector<2x24x8xf32> to vector<48x8xf32>
    %88 = arith.truncf %87 : vector<48x8xf32> to vector<48x8xbf16>
    %89 = vector.extract_strided_slice %64 {offsets = [0, 0, 0], sizes = [1, 8, 32], strides = [1, 1, 1]} : vector<4x8x32xbf16> to vector<1x8x32xbf16>
    %90 = vector.shape_cast %89 : vector<1x8x32xbf16> to vector<8x32xbf16>
    %cst_29 = arith.constant dense<0.000000e+00> : vector<48x32xf32>
    %91 = tpu.matmul %88, %90, %cst_29 {dimension_numbers = #tpu.dot_dimension_numbers<[1], [0], [0], [1], [0, 0, 1, 1], [], []>} : vector<48x8xbf16>, vector<8x32xbf16>, vector<48x32xf32> -> vector<48x32xf32>
    %92 = arith.addf %65, %91 : vector<48x32xf32>
    %93 = vector.extract_strided_slice %60 {offsets = [0, 0, 8], sizes = [2, 24, 8], strides = [1, 1, 1]} : vector<2x24x32xf32> to vector<2x24x8xf32>
    %94 = arith.truncf %93 : vector<2x24x8xf32> to vector<2x24x8xbf16>
    %95 = vector.extract_strided_slice %61 {offsets = [0, 0, 8], sizes = [2, 24, 8], strides = [1, 1, 1]} : vector<2x24x32xf32> to vector<2x24x8xf32>
    %96 = arith.truncf %95 : vector<2x24x8xf32> to vector<2x24x8xbf16>
    %97 = vector.extract_strided_slice %62 {offsets = [0, 0, 8], sizes = [2, 24, 8], strides = [1, 1, 1]} : vector<2x24x32xf32> to vector<2x24x8xf32>
    %98 = arith.truncf %97 : vector<2x24x8xf32> to vector<2x24x8xbf16>
    "tpu.trace_start"() <{level = 10 : i32, message = "bqd,bkd->bqk"}> : () -> ()
    %cst_30 = arith.constant dense<0.000000e+00> : vector<2x24x24xf32>
    %99 = tpu.matmul %94, %96, %cst_30 {dimension_numbers = #tpu.dot_dimension_numbers<[2], [2], [1], [1], [0, 0, 0, 1, 1, 1], [0], [0]>} : vector<2x24x8xbf16>, vector<2x24x8xbf16>, vector<2x24x24xf32> -> vector<2x24x24xf32>
    "tpu.trace_stop"() : () -> ()
    %100 = vector.broadcast %5 : vector<1x24x24xf32> to vector<2x24x24xf32>
    %101 = arith.addf %99, %100 : vector<2x24x24xf32>
    %cst_31 = arith.constant dense<0xFF800000> : vector<2x24xf32>
    %102 = vector.multi_reduction <maximumf>, %101, %cst_31 [2] : vector<2x24x24xf32> to vector<2x24xf32>
    %103 = vector.shape_cast %102 : vector<2x24xf32> to vector<2x24x1xf32>
    %104 = vector.broadcast %103 : vector<2x24x1xf32> to vector<2x24x24xf32>
    %105 = arith.subf %101, %104 : vector<2x24x24xf32>
    %106 = math.exp %105 : vector<2x24x24xf32>
    %cst_32 = arith.constant dense<0.000000e+00> : vector<2x24xf32>
    %107 = vector.multi_reduction <add>, %106, %cst_32 [2] : vector<2x24x24xf32> to vector<2x24xf32>
    %108 = vector.shape_cast %107 : vector<2x24xf32> to vector<2x24x1xf32>
    %109 = tpu.reciprocal %108 {approx = true} : vector<2x24x1xf32> -> vector<2x24x1xf32>
    %110 = vector.broadcast %109 : vector<2x24x1xf32> to vector<2x24x24xf32>
    %111 = arith.mulf %106, %110 : vector<2x24x24xf32>
    %112 = arith.truncf %111 : vector<2x24x24xf32> to vector<2x24x24xbf16>
    "tpu.trace_start"() <{level = 10 : i32, message = "bqk,bkd->bqd"}> : () -> ()
    %cst_33 = arith.constant dense<0.000000e+00> : vector<2x24x8xf32>
    %113 = tpu.matmul %112, %98, %cst_33 {dimension_numbers = #tpu.dot_dimension_numbers<[2], [1], [1], [2], [0, 0, 0, 1, 1, 2], [0], [0]>} : vector<2x24x24xbf16>, vector<2x24x8xbf16>, vector<2x24x8xf32> -> vector<2x24x8xf32>
    "tpu.trace_stop"() : () -> ()
    %114 = vector.shape_cast %113 : vector<2x24x8xf32> to vector<48x8xf32>
    %115 = arith.truncf %114 : vector<48x8xf32> to vector<48x8xbf16>
    %116 = vector.extract_strided_slice %64 {offsets = [1, 0, 0], sizes = [1, 8, 32], strides = [1, 1, 1]} : vector<4x8x32xbf16> to vector<1x8x32xbf16>
    %117 = vector.shape_cast %116 : vector<1x8x32xbf16> to vector<8x32xbf16>
    %cst_34 = arith.constant dense<0.000000e+00> : vector<48x32xf32>
    %118 = tpu.matmul %115, %117, %cst_34 {dimension_numbers = #tpu.dot_dimension_numbers<[1], [0], [0], [1], [0, 0, 1, 1], [], []>} : vector<48x8xbf16>, vector<8x32xbf16>, vector<48x32xf32> -> vector<48x32xf32>
    %119 = arith.addf %92, %118 : vector<48x32xf32>
    %120 = vector.extract_strided_slice %60 {offsets = [0, 0, 16], sizes = [2, 24, 8], strides = [1, 1, 1]} : vector<2x24x32xf32> to vector<2x24x8xf32>
    %121 = arith.truncf %120 : vector<2x24x8xf32> to vector<2x24x8xbf16>
    %122 = vector.extract_strided_slice %61 {offsets = [0, 0, 16], sizes = [2, 24, 8], strides = [1, 1, 1]} : vector<2x24x32xf32> to vector<2x24x8xf32>
    %123 = arith.truncf %122 : vector<2x24x8xf32> to vector<2x24x8xbf16>
    %124 = vector.extract_strided_slice %62 {offsets = [0, 0, 16], sizes = [2, 24, 8], strides = [1, 1, 1]} : vector<2x24x32xf32> to vector<2x24x8xf32>
    %125 = arith.truncf %124 : vector<2x24x8xf32> to vector<2x24x8xbf16>
    "tpu.trace_start"() <{level = 10 : i32, message = "bqd,bkd->bqk"}> : () -> ()
    %cst_35 = arith.constant dense<0.000000e+00> : vector<2x24x24xf32>
    %126 = tpu.matmul %121, %123, %cst_35 {dimension_numbers = #tpu.dot_dimension_numbers<[2], [2], [1], [1], [0, 0, 0, 1, 1, 1], [0], [0]>} : vector<2x24x8xbf16>, vector<2x24x8xbf16>, vector<2x24x24xf32> -> vector<2x24x24xf32>
    "tpu.trace_stop"() : () -> ()
    %127 = vector.broadcast %5 : vector<1x24x24xf32> to vector<2x24x24xf32>
    %128 = arith.addf %126, %127 : vector<2x24x24xf32>
    %cst_36 = arith.constant dense<0xFF800000> : vector<2x24xf32>
    %129 = vector.multi_reduction <maximumf>, %128, %cst_36 [2] : vector<2x24x24xf32> to vector<2x24xf32>
    %130 = vector.shape_cast %129 : vector<2x24xf32> to vector<2x24x1xf32>
    %131 = vector.broadcast %130 : vector<2x24x1xf32> to vector<2x24x24xf32>
    %132 = arith.subf %128, %131 : vector<2x24x24xf32>
    %133 = math.exp %132 : vector<2x24x24xf32>
    %cst_37 = arith.constant dense<0.000000e+00> : vector<2x24xf32>
    %134 = vector.multi_reduction <add>, %133, %cst_37 [2] : vector<2x24x24xf32> to vector<2x24xf32>
    %135 = vector.shape_cast %134 : vector<2x24xf32> to vector<2x24x1xf32>
    %136 = tpu.reciprocal %135 {approx = true} : vector<2x24x1xf32> -> vector<2x24x1xf32>
    %137 = vector.broadcast %136 : vector<2x24x1xf32> to vector<2x24x24xf32>
    %138 = arith.mulf %133, %137 : vector<2x24x24xf32>
    %139 = arith.truncf %138 : vector<2x24x24xf32> to vector<2x24x24xbf16>
    "tpu.trace_start"() <{level = 10 : i32, message = "bqk,bkd->bqd"}> : () -> ()
    %cst_38 = arith.constant dense<0.000000e+00> : vector<2x24x8xf32>
    %140 = tpu.matmul %139, %125, %cst_38 {dimension_numbers = #tpu.dot_dimension_numbers<[2], [1], [1], [2], [0, 0, 0, 1, 1, 2], [0], [0]>} : vector<2x24x24xbf16>, vector<2x24x8xbf16>, vector<2x24x8xf32> -> vector<2x24x8xf32>
    "tpu.trace_stop"() : () -> ()
    %141 = vector.shape_cast %140 : vector<2x24x8xf32> to vector<48x8xf32>
    %142 = arith.truncf %141 : vector<48x8xf32> to vector<48x8xbf16>
    %143 = vector.extract_strided_slice %64 {offsets = [2, 0, 0], sizes = [1, 8, 32], strides = [1, 1, 1]} : vector<4x8x32xbf16> to vector<1x8x32xbf16>
    %144 = vector.shape_cast %143 : vector<1x8x32xbf16> to vector<8x32xbf16>
    %cst_39 = arith.constant dense<0.000000e+00> : vector<48x32xf32>
    %145 = tpu.matmul %142, %144, %cst_39 {dimension_numbers = #tpu.dot_dimension_numbers<[1], [0], [0], [1], [0, 0, 1, 1], [], []>} : vector<48x8xbf16>, vector<8x32xbf16>, vector<48x32xf32> -> vector<48x32xf32>
    %146 = arith.addf %119, %145 : vector<48x32xf32>
    %147 = vector.extract_strided_slice %60 {offsets = [0, 0, 24], sizes = [2, 24, 8], strides = [1, 1, 1]} : vector<2x24x32xf32> to vector<2x24x8xf32>
    %148 = arith.truncf %147 : vector<2x24x8xf32> to vector<2x24x8xbf16>
    %149 = vector.extract_strided_slice %61 {offsets = [0, 0, 24], sizes = [2, 24, 8], strides = [1, 1, 1]} : vector<2x24x32xf32> to vector<2x24x8xf32>
    %150 = arith.truncf %149 : vector<2x24x8xf32> to vector<2x24x8xbf16>
    %151 = vector.extract_strided_slice %62 {offsets = [0, 0, 24], sizes = [2, 24, 8], strides = [1, 1, 1]} : vector<2x24x32xf32> to vector<2x24x8xf32>
    %152 = arith.truncf %151 : vector<2x24x8xf32> to vector<2x24x8xbf16>
    "tpu.trace_start"() <{level = 10 : i32, message = "bqd,bkd->bqk"}> : () -> ()
    %cst_40 = arith.constant dense<0.000000e+00> : vector<2x24x24xf32>
    %153 = tpu.matmul %148, %150, %cst_40 {dimension_numbers = #tpu.dot_dimension_numbers<[2], [2], [1], [1], [0, 0, 0, 1, 1, 1], [0], [0]>} : vector<2x24x8xbf16>, vector<2x24x8xbf16>, vector<2x24x24xf32> -> vector<2x24x24xf32>
    "tpu.trace_stop"() : () -> ()
    %154 = vector.broadcast %5 : vector<1x24x24xf32> to vector<2x24x24xf32>
    %155 = arith.addf %153, %154 : vector<2x24x24xf32>
    %cst_41 = arith.constant dense<0xFF800000> : vector<2x24xf32>
    %156 = vector.multi_reduction <maximumf>, %155, %cst_41 [2] : vector<2x24x24xf32> to vector<2x24xf32>
    %157 = vector.shape_cast %156 : vector<2x24xf32> to vector<2x24x1xf32>
    %158 = vector.broadcast %157 : vector<2x24x1xf32> to vector<2x24x24xf32>
    %159 = arith.subf %155, %158 : vector<2x24x24xf32>
    %160 = math.exp %159 : vector<2x24x24xf32>
    %cst_42 = arith.constant dense<0.000000e+00> : vector<2x24xf32>
    %161 = vector.multi_reduction <add>, %160, %cst_42 [2] : vector<2x24x24xf32> to vector<2x24xf32>
    %162 = vector.shape_cast %161 : vector<2x24xf32> to vector<2x24x1xf32>
    %163 = tpu.reciprocal %162 {approx = true} : vector<2x24x1xf32> -> vector<2x24x1xf32>
    %164 = vector.broadcast %163 : vector<2x24x1xf32> to vector<2x24x24xf32>
    %165 = arith.mulf %160, %164 : vector<2x24x24xf32>
    %166 = arith.truncf %165 : vector<2x24x24xf32> to vector<2x24x24xbf16>
    "tpu.trace_start"() <{level = 10 : i32, message = "bqk,bkd->bqd"}> : () -> ()
    %cst_43 = arith.constant dense<0.000000e+00> : vector<2x24x8xf32>
    %167 = tpu.matmul %166, %152, %cst_43 {dimension_numbers = #tpu.dot_dimension_numbers<[2], [1], [1], [2], [0, 0, 0, 1, 1, 2], [0], [0]>} : vector<2x24x24xbf16>, vector<2x24x8xbf16>, vector<2x24x8xf32> -> vector<2x24x8xf32>
    "tpu.trace_stop"() : () -> ()
    %168 = vector.shape_cast %167 : vector<2x24x8xf32> to vector<48x8xf32>
    %169 = arith.truncf %168 : vector<48x8xf32> to vector<48x8xbf16>
    %170 = vector.extract_strided_slice %64 {offsets = [3, 0, 0], sizes = [1, 8, 32], strides = [1, 1, 1]} : vector<4x8x32xbf16> to vector<1x8x32xbf16>
    %171 = vector.shape_cast %170 : vector<1x8x32xbf16> to vector<8x32xbf16>
    %cst_44 = arith.constant dense<0.000000e+00> : vector<48x32xf32>
    %172 = tpu.matmul %169, %171, %cst_44 {dimension_numbers = #tpu.dot_dimension_numbers<[1], [0], [0], [1], [0, 0, 1, 1], [], []>} : vector<48x8xbf16>, vector<8x32xbf16>, vector<48x32xf32> -> vector<48x32xf32>
    %173 = arith.addf %146, %172 : vector<48x32xf32>
    %174 = arith.addf %10, %173 : vector<48x32xf32>
    %175 = vector.broadcast %18 : vector<1x32xf32> to vector<48x32xf32>
    %176 = arith.addf %174, %175 : vector<48x32xf32>
    %cst_45 = arith.constant dense<0.000000e+00> : vector<48xf32>
    %177 = vector.multi_reduction <add>, %176, %cst_45 [1] : vector<48x32xf32> to vector<48xf32>
    %178 = vector.shape_cast %177 : vector<48xf32> to vector<48x1xf32>
    %cst_46 = arith.constant 3.200000e+01 : f32
    %179 = vector.broadcast %cst_46 : f32 to vector<48x1xf32>
    %180 = arith.divf %178, %179 : vector<48x1xf32>
    %181 = vector.broadcast %180 : vector<48x1xf32> to vector<48x32xf32>
    %182 = arith.subf %176, %181 : vector<48x32xf32>
    %183 = arith.mulf %182, %182 : vector<48x32xf32>
    %cst_47 = arith.constant dense<0.000000e+00> : vector<48xf32>
    %184 = vector.multi_reduction <add>, %183, %cst_47 [1] : vector<48x32xf32> to vector<48xf32>
    %185 = vector.shape_cast %184 : vector<48xf32> to vector<48x1xf32>
    %cst_48 = arith.constant 3.200000e+01 : f32
    %186 = vector.broadcast %cst_48 : f32 to vector<48x1xf32>
    %187 = arith.divf %185, %186 : vector<48x1xf32>
    %188 = vector.broadcast %180 : vector<48x1xf32> to vector<48x32xf32>
    %189 = arith.subf %176, %188 : vector<48x32xf32>
    %cst_49 = arith.constant 9.99999997E-7 : f32
    %190 = vector.broadcast %cst_49 : f32 to vector<48x1xf32>
    %191 = arith.addf %187, %190 : vector<48x1xf32>
    %192 = math.rsqrt %191 : vector<48x1xf32>
    %193 = vector.broadcast %192 : vector<48x1xf32> to vector<48x32xf32>
    %194 = arith.mulf %189, %193 : vector<48x32xf32>
    %195 = vector.broadcast %19 : vector<1x32xf32> to vector<48x32xf32>
    %196 = arith.mulf %194, %195 : vector<48x32xf32>
    %197 = vector.broadcast %20 : vector<1x32xf32> to vector<48x32xf32>
    %198 = arith.addf %196, %197 : vector<48x32xf32>
    %199 = arith.truncf %198 : vector<48x32xf32> to vector<48x32xbf16>
    %c0_50 = arith.constant 0 : index
    %c0_51 = arith.constant 0 : index
    %c0_52 = arith.constant 0 : index
    %200 = vector.load %arg5[%c0_50, %c0_51, %c0_52] : memref<2x32x64xbf16, #tpu.memory_space<vmem>>, vector<1x32x64xbf16>
    %201 = vector.shape_cast %200 : vector<1x32x64xbf16> to vector<32x64xbf16>
    %cst_53 = arith.constant dense<0.000000e+00> : vector<48x64xf32>
    %202 = tpu.matmul %199, %201, %cst_53 {dimension_numbers = #tpu.dot_dimension_numbers<[1], [0], [0], [1], [0, 0, 1, 1], [], []>} : vector<48x32xbf16>, vector<32x64xbf16>, vector<48x64xf32> -> vector<48x64xf32>
    %203 = vector.broadcast %21 : vector<1x64xf32> to vector<48x64xf32>
    %204 = arith.addf %202, %203 : vector<48x64xf32>
    %205 = arith.mulf %204, %204 : vector<48x64xf32>
    %206 = arith.mulf %204, %205 : vector<48x64xf32>
    %cst_54 = arith.constant 4.471500e-02 : f32
    %207 = vector.broadcast %cst_54 : f32 to vector<48x64xf32>
    %208 = arith.mulf %207, %206 : vector<48x64xf32>
    %209 = arith.addf %204, %208 : vector<48x64xf32>
    %cst_55 = arith.constant 0.797884583 : f32
    %210 = vector.broadcast %cst_55 : f32 to vector<48x64xf32>
    %211 = arith.mulf %210, %209 : vector<48x64xf32>
    %212 = math.tanh %211 : vector<48x64xf32>
    %cst_56 = arith.constant 1.000000e+00 : f32
    %213 = vector.broadcast %cst_56 : f32 to vector<48x64xf32>
    %214 = arith.addf %213, %212 : vector<48x64xf32>
    %cst_57 = arith.constant 5.000000e-01 : f32
    %215 = vector.broadcast %cst_57 : f32 to vector<48x64xf32>
    %216 = arith.mulf %215, %214 : vector<48x64xf32>
    %217 = arith.mulf %204, %216 : vector<48x64xf32>
    %218 = arith.truncf %217 : vector<48x64xf32> to vector<48x64xbf16>
    %c0_58 = arith.constant 0 : index
    %c0_59 = arith.constant 0 : index
    %c0_60 = arith.constant 0 : index
    %219 = vector.load %arg6[%c0_58, %c0_59, %c0_60] : memref<2x64x32xbf16, #tpu.memory_space<vmem>>, vector<1x64x32xbf16>
    %220 = vector.shape_cast %219 : vector<1x64x32xbf16> to vector<64x32xbf16>
    %cst_61 = arith.constant dense<0.000000e+00> : vector<48x32xf32>
    %221 = tpu.matmul %218, %220, %cst_61 {dimension_numbers = #tpu.dot_dimension_numbers<[1], [0], [0], [1], [0, 0, 1, 1], [], []>} : vector<48x64xbf16>, vector<64x32xbf16>, vector<48x32xf32> -> vector<48x32xf32>
    %222 = vector.broadcast %22 : vector<1x32xf32> to vector<48x32xf32>
    %223 = arith.addf %221, %222 : vector<48x32xf32>
    %224 = arith.addf %176, %223 : vector<48x32xf32>
    %c1 = arith.constant 1 : index
    %c0_62 = arith.constant 0 : index
    %c0_63 = arith.constant 0 : index
    %225 = vector.load %arg7[%c1, %c0_62, %c0_63] : memref<2x10x64xf32, #tpu.memory_space<vmem>>, vector<1x10x64xf32>
    %226 = vector.shape_cast %225 : vector<1x10x64xf32> to vector<10x64xf32>
    %227 = vector.extract_strided_slice %226 {offsets = [0, 0], sizes = [1, 32], strides = [1, 1]} : vector<10x64xf32> to vector<1x32xf32>
    %228 = vector.extract_strided_slice %226 {offsets = [1, 0], sizes = [1, 32], strides = [1, 1]} : vector<10x64xf32> to vector<1x32xf32>
    %229 = vector.extract_strided_slice %226 {offsets = [2, 0], sizes = [1, 32], strides = [1, 1]} : vector<10x64xf32> to vector<1x32xf32>
    %230 = vector.extract_strided_slice %226 {offsets = [3, 0], sizes = [1, 32], strides = [1, 1]} : vector<10x64xf32> to vector<1x32xf32>
    %231 = vector.extract_strided_slice %226 {offsets = [4, 0], sizes = [1, 32], strides = [1, 1]} : vector<10x64xf32> to vector<1x32xf32>
    %232 = vector.extract_strided_slice %226 {offsets = [5, 0], sizes = [1, 32], strides = [1, 1]} : vector<10x64xf32> to vector<1x32xf32>
    %233 = vector.extract_strided_slice %226 {offsets = [6, 0], sizes = [1, 32], strides = [1, 1]} : vector<10x64xf32> to vector<1x32xf32>
    %234 = vector.extract_strided_slice %226 {offsets = [7, 0], sizes = [1, 32], strides = [1, 1]} : vector<10x64xf32> to vector<1x32xf32>
    %235 = vector.extract_strided_slice %226 {offsets = [8, 0], sizes = [1, 64], strides = [1, 1]} : vector<10x64xf32> to vector<1x64xf32>
    %236 = vector.extract_strided_slice %226 {offsets = [9, 0], sizes = [1, 32], strides = [1, 1]} : vector<10x64xf32> to vector<1x32xf32>
    %cst_64 = arith.constant dense<0.000000e+00> : vector<48xf32>
    %237 = vector.multi_reduction <add>, %224, %cst_64 [1] : vector<48x32xf32> to vector<48xf32>
    %238 = vector.shape_cast %237 : vector<48xf32> to vector<48x1xf32>
    %cst_65 = arith.constant 3.200000e+01 : f32
    %239 = vector.broadcast %cst_65 : f32 to vector<48x1xf32>
    %240 = arith.divf %238, %239 : vector<48x1xf32>
    %241 = vector.broadcast %240 : vector<48x1xf32> to vector<48x32xf32>
    %242 = arith.subf %224, %241 : vector<48x32xf32>
    %243 = arith.mulf %242, %242 : vector<48x32xf32>
    %cst_66 = arith.constant dense<0.000000e+00> : vector<48xf32>
    %244 = vector.multi_reduction <add>, %243, %cst_66 [1] : vector<48x32xf32> to vector<48xf32>
    %245 = vector.shape_cast %244 : vector<48xf32> to vector<48x1xf32>
    %cst_67 = arith.constant 3.200000e+01 : f32
    %246 = vector.broadcast %cst_67 : f32 to vector<48x1xf32>
    %247 = arith.divf %245, %246 : vector<48x1xf32>
    %248 = vector.broadcast %240 : vector<48x1xf32> to vector<48x32xf32>
    %249 = arith.subf %224, %248 : vector<48x32xf32>
    %cst_68 = arith.constant 9.99999997E-7 : f32
    %250 = vector.broadcast %cst_68 : f32 to vector<48x1xf32>
    %251 = arith.addf %247, %250 : vector<48x1xf32>
    %252 = math.rsqrt %251 : vector<48x1xf32>
    %253 = vector.broadcast %252 : vector<48x1xf32> to vector<48x32xf32>
    %254 = arith.mulf %249, %253 : vector<48x32xf32>
    %255 = vector.broadcast %227 : vector<1x32xf32> to vector<48x32xf32>
    %256 = arith.mulf %254, %255 : vector<48x32xf32>
    %257 = vector.broadcast %228 : vector<1x32xf32> to vector<48x32xf32>
    %258 = arith.addf %256, %257 : vector<48x32xf32>
    %259 = arith.truncf %258 : vector<48x32xf32> to vector<48x32xbf16>
    %c1_69 = arith.constant 1 : index
    %c0_70 = arith.constant 0 : index
    %c0_71 = arith.constant 0 : index
    %260 = vector.load %arg3[%c1_69, %c0_70, %c0_71] : memref<2x32x96xbf16, #tpu.memory_space<vmem>>, vector<1x32x96xbf16>
    %261 = vector.shape_cast %260 : vector<1x32x96xbf16> to vector<32x96xbf16>
    %cst_72 = arith.constant dense<0.000000e+00> : vector<48x96xf32>
    %262 = tpu.matmul %259, %261, %cst_72 {dimension_numbers = #tpu.dot_dimension_numbers<[1], [0], [0], [1], [0, 0, 1, 1], [], []>} : vector<48x32xbf16>, vector<32x96xbf16>, vector<48x96xf32> -> vector<48x96xf32>
    %263 = vector.extract_strided_slice %262 {offsets = [0, 0], sizes = [48, 32], strides = [1, 1]} : vector<48x96xf32> to vector<48x32xf32>
    %264 = vector.broadcast %229 : vector<1x32xf32> to vector<48x32xf32>
    %265 = arith.addf %263, %264 : vector<48x32xf32>
    %cst_73 = arith.constant 0.353553385 : f32
    %266 = vector.broadcast %cst_73 : f32 to vector<48x32xf32>
    %267 = arith.mulf %265, %266 : vector<48x32xf32>
    %268 = vector.extract_strided_slice %262 {offsets = [0, 32], sizes = [48, 32], strides = [1, 1]} : vector<48x96xf32> to vector<48x32xf32>
    %269 = vector.broadcast %230 : vector<1x32xf32> to vector<48x32xf32>
    %270 = arith.addf %268, %269 : vector<48x32xf32>
    %271 = vector.extract_strided_slice %262 {offsets = [0, 64], sizes = [48, 32], strides = [1, 1]} : vector<48x96xf32> to vector<48x32xf32>
    %272 = vector.broadcast %231 : vector<1x32xf32> to vector<48x32xf32>
    %273 = arith.addf %271, %272 : vector<48x32xf32>
    %274 = vector.shape_cast %267 : vector<48x32xf32> to vector<2x24x32xf32>
    %275 = vector.shape_cast %270 : vector<48x32xf32> to vector<2x24x32xf32>
    %276 = vector.shape_cast %273 : vector<48x32xf32> to vector<2x24x32xf32>
    %c1_74 = arith.constant 1 : index
    %c0_75 = arith.constant 0 : index
    %c0_76 = arith.constant 0 : index
    %c0_77 = arith.constant 0 : index
    %277 = vector.load %arg4[%c1_74, %c0_75, %c0_76, %c0_77] : memref<2x4x8x32xbf16, #tpu.memory_space<vmem>>, vector<1x4x8x32xbf16>
    %278 = vector.shape_cast %277 : vector<1x4x8x32xbf16> to vector<4x8x32xbf16>
    %cst_78 = arith.constant 0.000000e+00 : f32
    %279 = vector.broadcast %cst_78 : f32 to vector<48x32xf32>
    %280 = vector.extract_strided_slice %274 {offsets = [0, 0, 0], sizes = [2, 24, 8], strides = [1, 1, 1]} : vector<2x24x32xf32> to vector<2x24x8xf32>
    %281 = arith.truncf %280 : vector<2x24x8xf32> to vector<2x24x8xbf16>
    %282 = vector.extract_strided_slice %275 {offsets = [0, 0, 0], sizes = [2, 24, 8], strides = [1, 1, 1]} : vector<2x24x32xf32> to vector<2x24x8xf32>
    %283 = arith.truncf %282 : vector<2x24x8xf32> to vector<2x24x8xbf16>
    %284 = vector.extract_strided_slice %276 {offsets = [0, 0, 0], sizes = [2, 24, 8], strides = [1, 1, 1]} : vector<2x24x32xf32> to vector<2x24x8xf32>
    %285 = arith.truncf %284 : vector<2x24x8xf32> to vector<2x24x8xbf16>
    "tpu.trace_start"() <{level = 10 : i32, message = "bqd,bkd->bqk"}> : () -> ()
    %cst_79 = arith.constant dense<0.000000e+00> : vector<2x24x24xf32>
    %286 = tpu.matmul %281, %283, %cst_79 {dimension_numbers = #tpu.dot_dimension_numbers<[2], [2], [1], [1], [0, 0, 0, 1, 1, 1], [0], [0]>} : vector<2x24x8xbf16>, vector<2x24x8xbf16>, vector<2x24x24xf32> -> vector<2x24x24xf32>
    "tpu.trace_stop"() : () -> ()
    %287 = vector.broadcast %5 : vector<1x24x24xf32> to vector<2x24x24xf32>
    %288 = arith.addf %286, %287 : vector<2x24x24xf32>
    %cst_80 = arith.constant dense<0xFF800000> : vector<2x24xf32>
    %289 = vector.multi_reduction <maximumf>, %288, %cst_80 [2] : vector<2x24x24xf32> to vector<2x24xf32>
    %290 = vector.shape_cast %289 : vector<2x24xf32> to vector<2x24x1xf32>
    %291 = vector.broadcast %290 : vector<2x24x1xf32> to vector<2x24x24xf32>
    %292 = arith.subf %288, %291 : vector<2x24x24xf32>
    %293 = math.exp %292 : vector<2x24x24xf32>
    %cst_81 = arith.constant dense<0.000000e+00> : vector<2x24xf32>
    %294 = vector.multi_reduction <add>, %293, %cst_81 [2] : vector<2x24x24xf32> to vector<2x24xf32>
    %295 = vector.shape_cast %294 : vector<2x24xf32> to vector<2x24x1xf32>
    %296 = tpu.reciprocal %295 {approx = true} : vector<2x24x1xf32> -> vector<2x24x1xf32>
    %297 = vector.broadcast %296 : vector<2x24x1xf32> to vector<2x24x24xf32>
    %298 = arith.mulf %293, %297 : vector<2x24x24xf32>
    %299 = arith.truncf %298 : vector<2x24x24xf32> to vector<2x24x24xbf16>
    "tpu.trace_start"() <{level = 10 : i32, message = "bqk,bkd->bqd"}> : () -> ()
    %cst_82 = arith.constant dense<0.000000e+00> : vector<2x24x8xf32>
    %300 = tpu.matmul %299, %285, %cst_82 {dimension_numbers = #tpu.dot_dimension_numbers<[2], [1], [1], [2], [0, 0, 0, 1, 1, 2], [0], [0]>} : vector<2x24x24xbf16>, vector<2x24x8xbf16>, vector<2x24x8xf32> -> vector<2x24x8xf32>
    "tpu.trace_stop"() : () -> ()
    %301 = vector.shape_cast %300 : vector<2x24x8xf32> to vector<48x8xf32>
    %302 = arith.truncf %301 : vector<48x8xf32> to vector<48x8xbf16>
    %303 = vector.extract_strided_slice %278 {offsets = [0, 0, 0], sizes = [1, 8, 32], strides = [1, 1, 1]} : vector<4x8x32xbf16> to vector<1x8x32xbf16>
    %304 = vector.shape_cast %303 : vector<1x8x32xbf16> to vector<8x32xbf16>
    %cst_83 = arith.constant dense<0.000000e+00> : vector<48x32xf32>
    %305 = tpu.matmul %302, %304, %cst_83 {dimension_numbers = #tpu.dot_dimension_numbers<[1], [0], [0], [1], [0, 0, 1, 1], [], []>} : vector<48x8xbf16>, vector<8x32xbf16>, vector<48x32xf32> -> vector<48x32xf32>
    %306 = arith.addf %279, %305 : vector<48x32xf32>
    %307 = vector.extract_strided_slice %274 {offsets = [0, 0, 8], sizes = [2, 24, 8], strides = [1, 1, 1]} : vector<2x24x32xf32> to vector<2x24x8xf32>
    %308 = arith.truncf %307 : vector<2x24x8xf32> to vector<2x24x8xbf16>
    %309 = vector.extract_strided_slice %275 {offsets = [0, 0, 8], sizes = [2, 24, 8], strides = [1, 1, 1]} : vector<2x24x32xf32> to vector<2x24x8xf32>
    %310 = arith.truncf %309 : vector<2x24x8xf32> to vector<2x24x8xbf16>
    %311 = vector.extract_strided_slice %276 {offsets = [0, 0, 8], sizes = [2, 24, 8], strides = [1, 1, 1]} : vector<2x24x32xf32> to vector<2x24x8xf32>
    %312 = arith.truncf %311 : vector<2x24x8xf32> to vector<2x24x8xbf16>
    "tpu.trace_start"() <{level = 10 : i32, message = "bqd,bkd->bqk"}> : () -> ()
    %cst_84 = arith.constant dense<0.000000e+00> : vector<2x24x24xf32>
    %313 = tpu.matmul %308, %310, %cst_84 {dimension_numbers = #tpu.dot_dimension_numbers<[2], [2], [1], [1], [0, 0, 0, 1, 1, 1], [0], [0]>} : vector<2x24x8xbf16>, vector<2x24x8xbf16>, vector<2x24x24xf32> -> vector<2x24x24xf32>
    "tpu.trace_stop"() : () -> ()
    %314 = vector.broadcast %5 : vector<1x24x24xf32> to vector<2x24x24xf32>
    %315 = arith.addf %313, %314 : vector<2x24x24xf32>
    %cst_85 = arith.constant dense<0xFF800000> : vector<2x24xf32>
    %316 = vector.multi_reduction <maximumf>, %315, %cst_85 [2] : vector<2x24x24xf32> to vector<2x24xf32>
    %317 = vector.shape_cast %316 : vector<2x24xf32> to vector<2x24x1xf32>
    %318 = vector.broadcast %317 : vector<2x24x1xf32> to vector<2x24x24xf32>
    %319 = arith.subf %315, %318 : vector<2x24x24xf32>
    %320 = math.exp %319 : vector<2x24x24xf32>
    %cst_86 = arith.constant dense<0.000000e+00> : vector<2x24xf32>
    %321 = vector.multi_reduction <add>, %320, %cst_86 [2] : vector<2x24x24xf32> to vector<2x24xf32>
    %322 = vector.shape_cast %321 : vector<2x24xf32> to vector<2x24x1xf32>
    %323 = tpu.reciprocal %322 {approx = true} : vector<2x24x1xf32> -> vector<2x24x1xf32>
    %324 = vector.broadcast %323 : vector<2x24x1xf32> to vector<2x24x24xf32>
    %325 = arith.mulf %320, %324 : vector<2x24x24xf32>
    %326 = arith.truncf %325 : vector<2x24x24xf32> to vector<2x24x24xbf16>
    "tpu.trace_start"() <{level = 10 : i32, message = "bqk,bkd->bqd"}> : () -> ()
    %cst_87 = arith.constant dense<0.000000e+00> : vector<2x24x8xf32>
    %327 = tpu.matmul %326, %312, %cst_87 {dimension_numbers = #tpu.dot_dimension_numbers<[2], [1], [1], [2], [0, 0, 0, 1, 1, 2], [0], [0]>} : vector<2x24x24xbf16>, vector<2x24x8xbf16>, vector<2x24x8xf32> -> vector<2x24x8xf32>
    "tpu.trace_stop"() : () -> ()
    %328 = vector.shape_cast %327 : vector<2x24x8xf32> to vector<48x8xf32>
    %329 = arith.truncf %328 : vector<48x8xf32> to vector<48x8xbf16>
    %330 = vector.extract_strided_slice %278 {offsets = [1, 0, 0], sizes = [1, 8, 32], strides = [1, 1, 1]} : vector<4x8x32xbf16> to vector<1x8x32xbf16>
    %331 = vector.shape_cast %330 : vector<1x8x32xbf16> to vector<8x32xbf16>
    %cst_88 = arith.constant dense<0.000000e+00> : vector<48x32xf32>
    %332 = tpu.matmul %329, %331, %cst_88 {dimension_numbers = #tpu.dot_dimension_numbers<[1], [0], [0], [1], [0, 0, 1, 1], [], []>} : vector<48x8xbf16>, vector<8x32xbf16>, vector<48x32xf32> -> vector<48x32xf32>
    %333 = arith.addf %306, %332 : vector<48x32xf32>
    %334 = vector.extract_strided_slice %274 {offsets = [0, 0, 16], sizes = [2, 24, 8], strides = [1, 1, 1]} : vector<2x24x32xf32> to vector<2x24x8xf32>
    %335 = arith.truncf %334 : vector<2x24x8xf32> to vector<2x24x8xbf16>
    %336 = vector.extract_strided_slice %275 {offsets = [0, 0, 16], sizes = [2, 24, 8], strides = [1, 1, 1]} : vector<2x24x32xf32> to vector<2x24x8xf32>
    %337 = arith.truncf %336 : vector<2x24x8xf32> to vector<2x24x8xbf16>
    %338 = vector.extract_strided_slice %276 {offsets = [0, 0, 16], sizes = [2, 24, 8], strides = [1, 1, 1]} : vector<2x24x32xf32> to vector<2x24x8xf32>
    %339 = arith.truncf %338 : vector<2x24x8xf32> to vector<2x24x8xbf16>
    "tpu.trace_start"() <{level = 10 : i32, message = "bqd,bkd->bqk"}> : () -> ()
    %cst_89 = arith.constant dense<0.000000e+00> : vector<2x24x24xf32>
    %340 = tpu.matmul %335, %337, %cst_89 {dimension_numbers = #tpu.dot_dimension_numbers<[2], [2], [1], [1], [0, 0, 0, 1, 1, 1], [0], [0]>} : vector<2x24x8xbf16>, vector<2x24x8xbf16>, vector<2x24x24xf32> -> vector<2x24x24xf32>
    "tpu.trace_stop"() : () -> ()
    %341 = vector.broadcast %5 : vector<1x24x24xf32> to vector<2x24x24xf32>
    %342 = arith.addf %340, %341 : vector<2x24x24xf32>
    %cst_90 = arith.constant dense<0xFF800000> : vector<2x24xf32>
    %343 = vector.multi_reduction <maximumf>, %342, %cst_90 [2] : vector<2x24x24xf32> to vector<2x24xf32>
    %344 = vector.shape_cast %343 : vector<2x24xf32> to vector<2x24x1xf32>
    %345 = vector.broadcast %344 : vector<2x24x1xf32> to vector<2x24x24xf32>
    %346 = arith.subf %342, %345 : vector<2x24x24xf32>
    %347 = math.exp %346 : vector<2x24x24xf32>
    %cst_91 = arith.constant dense<0.000000e+00> : vector<2x24xf32>
    %348 = vector.multi_reduction <add>, %347, %cst_91 [2] : vector<2x24x24xf32> to vector<2x24xf32>
    %349 = vector.shape_cast %348 : vector<2x24xf32> to vector<2x24x1xf32>
    %350 = tpu.reciprocal %349 {approx = true} : vector<2x24x1xf32> -> vector<2x24x1xf32>
    %351 = vector.broadcast %350 : vector<2x24x1xf32> to vector<2x24x24xf32>
    %352 = arith.mulf %347, %351 : vector<2x24x24xf32>
    %353 = arith.truncf %352 : vector<2x24x24xf32> to vector<2x24x24xbf16>
    "tpu.trace_start"() <{level = 10 : i32, message = "bqk,bkd->bqd"}> : () -> ()
    %cst_92 = arith.constant dense<0.000000e+00> : vector<2x24x8xf32>
    %354 = tpu.matmul %353, %339, %cst_92 {dimension_numbers = #tpu.dot_dimension_numbers<[2], [1], [1], [2], [0, 0, 0, 1, 1, 2], [0], [0]>} : vector<2x24x24xbf16>, vector<2x24x8xbf16>, vector<2x24x8xf32> -> vector<2x24x8xf32>
    "tpu.trace_stop"() : () -> ()
    %355 = vector.shape_cast %354 : vector<2x24x8xf32> to vector<48x8xf32>
    %356 = arith.truncf %355 : vector<48x8xf32> to vector<48x8xbf16>
    %357 = vector.extract_strided_slice %278 {offsets = [2, 0, 0], sizes = [1, 8, 32], strides = [1, 1, 1]} : vector<4x8x32xbf16> to vector<1x8x32xbf16>
    %358 = vector.shape_cast %357 : vector<1x8x32xbf16> to vector<8x32xbf16>
    %cst_93 = arith.constant dense<0.000000e+00> : vector<48x32xf32>
    %359 = tpu.matmul %356, %358, %cst_93 {dimension_numbers = #tpu.dot_dimension_numbers<[1], [0], [0], [1], [0, 0, 1, 1], [], []>} : vector<48x8xbf16>, vector<8x32xbf16>, vector<48x32xf32> -> vector<48x32xf32>
    %360 = arith.addf %333, %359 : vector<48x32xf32>
    %361 = vector.extract_strided_slice %274 {offsets = [0, 0, 24], sizes = [2, 24, 8], strides = [1, 1, 1]} : vector<2x24x32xf32> to vector<2x24x8xf32>
    %362 = arith.truncf %361 : vector<2x24x8xf32> to vector<2x24x8xbf16>
    %363 = vector.extract_strided_slice %275 {offsets = [0, 0, 24], sizes = [2, 24, 8], strides = [1, 1, 1]} : vector<2x24x32xf32> to vector<2x24x8xf32>
    %364 = arith.truncf %363 : vector<2x24x8xf32> to vector<2x24x8xbf16>
    %365 = vector.extract_strided_slice %276 {offsets = [0, 0, 24], sizes = [2, 24, 8], strides = [1, 1, 1]} : vector<2x24x32xf32> to vector<2x24x8xf32>
    %366 = arith.truncf %365 : vector<2x24x8xf32> to vector<2x24x8xbf16>
    "tpu.trace_start"() <{level = 10 : i32, message = "bqd,bkd->bqk"}> : () -> ()
    %cst_94 = arith.constant dense<0.000000e+00> : vector<2x24x24xf32>
    %367 = tpu.matmul %362, %364, %cst_94 {dimension_numbers = #tpu.dot_dimension_numbers<[2], [2], [1], [1], [0, 0, 0, 1, 1, 1], [0], [0]>} : vector<2x24x8xbf16>, vector<2x24x8xbf16>, vector<2x24x24xf32> -> vector<2x24x24xf32>
    "tpu.trace_stop"() : () -> ()
    %368 = vector.broadcast %5 : vector<1x24x24xf32> to vector<2x24x24xf32>
    %369 = arith.addf %367, %368 : vector<2x24x24xf32>
    %cst_95 = arith.constant dense<0xFF800000> : vector<2x24xf32>
    %370 = vector.multi_reduction <maximumf>, %369, %cst_95 [2] : vector<2x24x24xf32> to vector<2x24xf32>
    %371 = vector.shape_cast %370 : vector<2x24xf32> to vector<2x24x1xf32>
    %372 = vector.broadcast %371 : vector<2x24x1xf32> to vector<2x24x24xf32>
    %373 = arith.subf %369, %372 : vector<2x24x24xf32>
    %374 = math.exp %373 : vector<2x24x24xf32>
    %cst_96 = arith.constant dense<0.000000e+00> : vector<2x24xf32>
    %375 = vector.multi_reduction <add>, %374, %cst_96 [2] : vector<2x24x24xf32> to vector<2x24xf32>
    %376 = vector.shape_cast %375 : vector<2x24xf32> to vector<2x24x1xf32>
    %377 = tpu.reciprocal %376 {approx = true} : vector<2x24x1xf32> -> vector<2x24x1xf32>
    %378 = vector.broadcast %377 : vector<2x24x1xf32> to vector<2x24x24xf32>
    %379 = arith.mulf %374, %378 : vector<2x24x24xf32>
    %380 = arith.truncf %379 : vector<2x24x24xf32> to vector<2x24x24xbf16>
    "tpu.trace_start"() <{level = 10 : i32, message = "bqk,bkd->bqd"}> : () -> ()
    %cst_97 = arith.constant dense<0.000000e+00> : vector<2x24x8xf32>
    %381 = tpu.matmul %380, %366, %cst_97 {dimension_numbers = #tpu.dot_dimension_numbers<[2], [1], [1], [2], [0, 0, 0, 1, 1, 2], [0], [0]>} : vector<2x24x24xbf16>, vector<2x24x8xbf16>, vector<2x24x8xf32> -> vector<2x24x8xf32>
    "tpu.trace_stop"() : () -> ()
    %382 = vector.shape_cast %381 : vector<2x24x8xf32> to vector<48x8xf32>
    %383 = arith.truncf %382 : vector<48x8xf32> to vector<48x8xbf16>
    %384 = vector.extract_strided_slice %278 {offsets = [3, 0, 0], sizes = [1, 8, 32], strides = [1, 1, 1]} : vector<4x8x32xbf16> to vector<1x8x32xbf16>
    %385 = vector.shape_cast %384 : vector<1x8x32xbf16> to vector<8x32xbf16>
    %cst_98 = arith.constant dense<0.000000e+00> : vector<48x32xf32>
    %386 = tpu.matmul %383, %385, %cst_98 {dimension_numbers = #tpu.dot_dimension_numbers<[1], [0], [0], [1], [0, 0, 1, 1], [], []>} : vector<48x8xbf16>, vector<8x32xbf16>, vector<48x32xf32> -> vector<48x32xf32>
    %387 = arith.addf %360, %386 : vector<48x32xf32>
    %388 = arith.addf %224, %387 : vector<48x32xf32>
    %389 = vector.broadcast %232 : vector<1x32xf32> to vector<48x32xf32>
    %390 = arith.addf %388, %389 : vector<48x32xf32>
    %cst_99 = arith.constant dense<0.000000e+00> : vector<48xf32>
    %391 = vector.multi_reduction <add>, %390, %cst_99 [1] : vector<48x32xf32> to vector<48xf32>
    %392 = vector.shape_cast %391 : vector<48xf32> to vector<48x1xf32>
    %cst_100 = arith.constant 3.200000e+01 : f32
    %393 = vector.broadcast %cst_100 : f32 to vector<48x1xf32>
    %394 = arith.divf %392, %393 : vector<48x1xf32>
    %395 = vector.broadcast %394 : vector<48x1xf32> to vector<48x32xf32>
    %396 = arith.subf %390, %395 : vector<48x32xf32>
    %397 = arith.mulf %396, %396 : vector<48x32xf32>
    %cst_101 = arith.constant dense<0.000000e+00> : vector<48xf32>
    %398 = vector.multi_reduction <add>, %397, %cst_101 [1] : vector<48x32xf32> to vector<48xf32>
    %399 = vector.shape_cast %398 : vector<48xf32> to vector<48x1xf32>
    %cst_102 = arith.constant 3.200000e+01 : f32
    %400 = vector.broadcast %cst_102 : f32 to vector<48x1xf32>
    %401 = arith.divf %399, %400 : vector<48x1xf32>
    %402 = vector.broadcast %394 : vector<48x1xf32> to vector<48x32xf32>
    %403 = arith.subf %390, %402 : vector<48x32xf32>
    %cst_103 = arith.constant 9.99999997E-7 : f32
    %404 = vector.broadcast %cst_103 : f32 to vector<48x1xf32>
    %405 = arith.addf %401, %404 : vector<48x1xf32>
    %406 = math.rsqrt %405 : vector<48x1xf32>
    %407 = vector.broadcast %406 : vector<48x1xf32> to vector<48x32xf32>
    %408 = arith.mulf %403, %407 : vector<48x32xf32>
    %409 = vector.broadcast %233 : vector<1x32xf32> to vector<48x32xf32>
    %410 = arith.mulf %408, %409 : vector<48x32xf32>
    %411 = vector.broadcast %234 : vector<1x32xf32> to vector<48x32xf32>
    %412 = arith.addf %410, %411 : vector<48x32xf32>
    %413 = arith.truncf %412 : vector<48x32xf32> to vector<48x32xbf16>
    %c1_104 = arith.constant 1 : index
    %c0_105 = arith.constant 0 : index
    %c0_106 = arith.constant 0 : index
    %414 = vector.load %arg5[%c1_104, %c0_105, %c0_106] : memref<2x32x64xbf16, #tpu.memory_space<vmem>>, vector<1x32x64xbf16>
    %415 = vector.shape_cast %414 : vector<1x32x64xbf16> to vector<32x64xbf16>
    %cst_107 = arith.constant dense<0.000000e+00> : vector<48x64xf32>
    %416 = tpu.matmul %413, %415, %cst_107 {dimension_numbers = #tpu.dot_dimension_numbers<[1], [0], [0], [1], [0, 0, 1, 1], [], []>} : vector<48x32xbf16>, vector<32x64xbf16>, vector<48x64xf32> -> vector<48x64xf32>
    %417 = vector.broadcast %235 : vector<1x64xf32> to vector<48x64xf32>
    %418 = arith.addf %416, %417 : vector<48x64xf32>
    %419 = arith.mulf %418, %418 : vector<48x64xf32>
    %420 = arith.mulf %418, %419 : vector<48x64xf32>
    %cst_108 = arith.constant 4.471500e-02 : f32
    %421 = vector.broadcast %cst_108 : f32 to vector<48x64xf32>
    %422 = arith.mulf %421, %420 : vector<48x64xf32>
    %423 = arith.addf %418, %422 : vector<48x64xf32>
    %cst_109 = arith.constant 0.797884583 : f32
    %424 = vector.broadcast %cst_109 : f32 to vector<48x64xf32>
    %425 = arith.mulf %424, %423 : vector<48x64xf32>
    %426 = math.tanh %425 : vector<48x64xf32>
    %cst_110 = arith.constant 1.000000e+00 : f32
    %427 = vector.broadcast %cst_110 : f32 to vector<48x64xf32>
    %428 = arith.addf %427, %426 : vector<48x64xf32>
    %cst_111 = arith.constant 5.000000e-01 : f32
    %429 = vector.broadcast %cst_111 : f32 to vector<48x64xf32>
    %430 = arith.mulf %429, %428 : vector<48x64xf32>
    %431 = arith.mulf %418, %430 : vector<48x64xf32>
    %432 = arith.truncf %431 : vector<48x64xf32> to vector<48x64xbf16>
    %c1_112 = arith.constant 1 : index
    %c0_113 = arith.constant 0 : index
    %c0_114 = arith.constant 0 : index
    %433 = vector.load %arg6[%c1_112, %c0_113, %c0_114] : memref<2x64x32xbf16, #tpu.memory_space<vmem>>, vector<1x64x32xbf16>
    %434 = vector.shape_cast %433 : vector<1x64x32xbf16> to vector<64x32xbf16>
    %cst_115 = arith.constant dense<0.000000e+00> : vector<48x32xf32>
    %435 = tpu.matmul %432, %434, %cst_115 {dimension_numbers = #tpu.dot_dimension_numbers<[1], [0], [0], [1], [0, 0, 1, 1], [], []>} : vector<48x64xbf16>, vector<64x32xbf16>, vector<48x32xf32> -> vector<48x32xf32>
    %436 = vector.broadcast %236 : vector<1x32xf32> to vector<48x32xf32>
    %437 = arith.addf %435, %436 : vector<48x32xf32>
    %438 = arith.addf %390, %437 : vector<48x32xf32>
    %439 = vector.extract_strided_slice %438 {offsets = [0, 0], sizes = [1, 32], strides = [1, 1]} : vector<48x32xf32> to vector<1x32xf32>
    %440 = vector.extract_strided_slice %438 {offsets = [24, 0], sizes = [1, 32], strides = [1, 1]} : vector<48x32xf32> to vector<1x32xf32>
    %441 = tpu.concatenate %439, %440 in 0 : vector<1x32xf32>, vector<1x32xf32> -> vector<2x32xf32>
    %c0_116 = arith.constant 0 : index
    %c0_117 = arith.constant 0 : index
    %442 = vector.load %arg9[%c0_116, %c0_117] : memref<3x32xf32, #tpu.memory_space<vmem>>, vector<3x32xf32>
    %443 = vector.extract_strided_slice %442 {offsets = [0, 0], sizes = [1, 32], strides = [1, 1]} : vector<3x32xf32> to vector<1x32xf32>
    %444 = vector.extract_strided_slice %442 {offsets = [1, 0], sizes = [1, 32], strides = [1, 1]} : vector<3x32xf32> to vector<1x32xf32>
    %445 = vector.extract_strided_slice %442 {offsets = [2, 0], sizes = [1, 8], strides = [1, 1]} : vector<3x32xf32> to vector<1x8xf32>
    %cst_118 = arith.constant dense<0.000000e+00> : vector<2xf32>
    %446 = vector.multi_reduction <add>, %441, %cst_118 [1] : vector<2x32xf32> to vector<2xf32>
    %447 = vector.shape_cast %446 : vector<2xf32> to vector<2x1xf32>
    %cst_119 = arith.constant 3.200000e+01 : f32
    %448 = vector.broadcast %cst_119 : f32 to vector<2x1xf32>
    %449 = arith.divf %447, %448 : vector<2x1xf32>
    %450 = vector.broadcast %449 : vector<2x1xf32> to vector<2x32xf32>
    %451 = arith.subf %441, %450 : vector<2x32xf32>
    %452 = arith.mulf %451, %451 : vector<2x32xf32>
    %cst_120 = arith.constant dense<0.000000e+00> : vector<2xf32>
    %453 = vector.multi_reduction <add>, %452, %cst_120 [1] : vector<2x32xf32> to vector<2xf32>
    %454 = vector.shape_cast %453 : vector<2xf32> to vector<2x1xf32>
    %cst_121 = arith.constant 3.200000e+01 : f32
    %455 = vector.broadcast %cst_121 : f32 to vector<2x1xf32>
    %456 = arith.divf %454, %455 : vector<2x1xf32>
    %457 = vector.broadcast %449 : vector<2x1xf32> to vector<2x32xf32>
    %458 = arith.subf %441, %457 : vector<2x32xf32>
    %cst_122 = arith.constant 9.99999997E-7 : f32
    %459 = vector.broadcast %cst_122 : f32 to vector<2x1xf32>
    %460 = arith.addf %456, %459 : vector<2x1xf32>
    %461 = math.rsqrt %460 : vector<2x1xf32>
    %462 = vector.broadcast %461 : vector<2x1xf32> to vector<2x32xf32>
    %463 = arith.mulf %458, %462 : vector<2x32xf32>
    %464 = vector.broadcast %443 : vector<1x32xf32> to vector<2x32xf32>
    %465 = arith.mulf %463, %464 : vector<2x32xf32>
    %466 = vector.broadcast %444 : vector<1x32xf32> to vector<2x32xf32>
    %467 = arith.addf %465, %466 : vector<2x32xf32>
    %468 = arith.truncf %467 : vector<2x32xf32> to vector<2x32xbf16>
    %c0_123 = arith.constant 0 : index
    %c0_124 = arith.constant 0 : index
    %469 = vector.load %arg8[%c0_123, %c0_124] : memref<32x8xbf16, #tpu.memory_space<vmem>>, vector<32x8xbf16>
    %cst_125 = arith.constant dense<0.000000e+00> : vector<2x8xf32>
    %470 = tpu.matmul %468, %469, %cst_125 {dimension_numbers = #tpu.dot_dimension_numbers<[1], [0], [0], [1], [0, 0, 1, 1], [], []>} : vector<2x32xbf16>, vector<32x8xbf16>, vector<2x8xf32> -> vector<2x8xf32>
    %471 = vector.broadcast %445 : vector<1x8xf32> to vector<2x8xf32>
    %472 = arith.addf %470, %471 : vector<2x8xf32>
    %c0_126 = arith.constant 0 : index
    %c0_127 = arith.constant 0 : index
    %473 = vector.load %arg10[%c0_126, %c0_127] : memref<2x8xf32, #tpu.memory_space<vmem>>, vector<2x8xf32>
    tpu.vector_store %arg10[%c0_126, %c0_127], %472 {strides = array<i32>} : memref<2x8xf32, #tpu.memory_space<vmem>>, vector<2x8xf32>,
    return
  }
}

</mosaic_0001>

<bundles_post_ra>
// kernel: vit_forward.1
= control target key start
LH: loop header
LB: loop body
LE: loop exit
PB: predicated region body
PF: predicated region fallthrough
CT: control target
= control target key end

     0   :  { %15 = vsyncpa [#allocation3], 0  ;;  %s7845_s0 = inlined_call_operand.hbm [shape: bf16[48,48], index: 0, kind: input, shape index: {}]   ;;  %s7846_s1 = inlined_call_operand.hbm [shape: bf16[48,32], index: 1, kind: input, shape index: {}]   ;;  %s7847_s2 = inlined_call_operand.hbm [shape: f32[48,32], index: 2, kind: input, shape index: {}]   ;;  %s7848_s3 = inlined_call_operand.hbm [shape: bf16[2,32,96], index: 3, kind: input, shape index: {}]   ;;  %s7849_s4 = inlined_call_operand.hbm [shape: bf16[2,4,8,32], index: 4, kind: input, shape index: {}]   ;;  %s7850_s5 = inlined_call_operand.hbm [shape: bf16[2,32,64], index: 5, kind: input, shape index: {}]   ;;  %s7851_s6 = inlined_call_operand.hbm [shape: bf16[2,64,32], index: 6, kind: input, shape index: {}]   ;;  %s7852_s7 = inlined_call_operand.hbm [shape: f32[2,10,64], index: 7, kind: input, shape index: {}]   ;;  %s7853_s8 = inlined_call_operand.hbm [shape: bf16[32,8], index: 8, kind: input, shape index: {}]   ;;  %s7854_s9 = inlined_call_operand.hbm [shape: f32[3,32], index: 9, kind: input, shape index: {}]   ;;  %s7855_s10 = inlined_call_operand.hbm [shape: f32[2,8], index: 10, kind: output, shape index: {}]  }
   0x1   :  { %16 = vsyncpa [#allocation6], 0 }
   0x2   :  { %17 = vsyncpa [#allocation9], 0 }
   0x3   :  { %18 = vsyncpa [#allocation12], 0 }
   0x4   :  { %19 = vsyncpa [#allocation15], 0 }
   0x5   :  { %20 = vsyncpa [#allocation18], 0 }
   0x6   :  { %21 = vsyncpa [#allocation4], 0  ;;  %s6346_s13 = smov [#allocation5]   ;;  %s6347_s15 = smov [#allocation8]  }
   0x7   :  { %s39_s14 = sshll.u32 %s6346_s13, 4  ;;  %s63_s16 = sshll.u32 %s6347_s15, 4  ;;  %s40_s14 = int_to_ptr.vmem [resolvable:$true] %s39_s14  ;;  %s6430_s16 = int_to_ptr.vmem [resolvable:$true] %s63_s16 }
   0x8   :  { %s6090_s19 = scalar_lea.hbm %s7846_s1, 384 }
   0x9   :  { %p6091_p0 = scmp.ne.s32.totalorder %s7846_s1, %s6090_s19  ;;  %p6094_p1 = scmp.lt.u32.totalorder %s6090_s19, %s7846_s1 }
   0xb   :  { %p6096_p2 = pnand %p6094_p1, %p6091_p0 }
   0xd   :  { %6099 = shalt.err (!%p6096_p2)
}
   0xe   :  { %s6100_s24 = scalar_lea.vmem %s40_s14, 384  ;;  %p6105_p4 = scmp.lt.s32.totalorder %s40_s14, %s40_s14 }
   0xf   :  { %p6101_p3 = scmp.ne.s32.totalorder %s40_s14, %s6100_s24  ;;  %p6106_p5 = scmp.lt.s32.totalorder %s6100_s24, %s6100_s24 }
  0x11   :  { %p6107_p6 = por %p6106_p5, %p6105_p4 }
  0x13   :  { %p6108_p7 = pnand %p6107_p6, %p6101_p3 }
  0x15   :  { %6111 = shalt.err (!%p6108_p7)
}
  0x16   :  { %s6348_s25 = smov 64   ;;  %s6349_s26 = smov 4  }
  0x17   :  { %45 = dma.hbm_to_vmem [thread:$0]  %s7846_s1, 384, %s40_s14, [#allocation6], %s6348_s25, %s6348_s25, %s6349_s26  }
  0x18   :  { %s6112_s11 = scalar_lea.hbm %s7848_s3, 512 }
  0x19   :  { %p6113_p8 = scmp.ne.s32.totalorder %s7848_s3, %s6112_s11  ;;  %p6116_p9 = scmp.lt.u32.totalorder %s6112_s11, %s7848_s3 }
  0x1b   :  { %p6118_p10 = pnand %p6116_p9, %p6113_p8 }
  0x1d   :  { %6121 = shalt.err (!%p6118_p10)
}
  0x1e   :  { %s6122_s18 = scalar_lea.vmem %s6430_s16, 512  ;;  %p6127_p12 = scmp.lt.s32.totalorder %s6430_s16, %s6430_s16 }
  0x1f   :  { %p6123_p11 = scmp.ne.s32.totalorder %s6430_s16, %s6122_s18  ;;  %p6128_p13 = scmp.lt.s32.totalorder %s6122_s18, %s6122_s18 }
  0x21   :  { %p6129_p0 = por %p6128_p13, %p6127_p12 }
  0x23   :  { %p6130_p1 = pnand %p6129_p0, %p6123_p11 }
  0x25   :  { %6133 = shalt.err (!%p6130_p1)
}
  0x26   :  { %69 = dma.hbm_to_vmem [thread:$0]  %s7848_s3, 512, %s6430_s16, [#allocation9], %s6348_s25, %s6348_s25, %s6349_s26  }
  0x27   :  { %s6350_s19 = smov [#allocation11]   ;;  %s6134_s23 = scalar_lea.hbm %s7850_s5, 512 }
  0x28   :  { %s87_s20 = sshll.u32 %s6350_s19, 4  ;;  %p6135_p2 = scmp.ne.s32.totalorder %s7850_s5, %s6134_s23  ;;  %s88_s20 = int_to_ptr.vmem [resolvable:$true] %s87_s20 }
  0x29   :  { %p6138_p3 = scmp.lt.u32.totalorder %s6134_s23, %s7850_s5 }
  0x2b   :  { %p6140_p4 = pnand %p6138_p3, %p6135_p2 }
  0x2d   :  { %6143 = shalt.err (!%p6140_p4)
}
  0x2e   :  { %s6144_s30 = scalar_lea.vmem %s88_s20, 512  ;;  %p6149_p6 = scmp.lt.s32.totalorder %s88_s20, %s88_s20 }
  0x2f   :  { %p6145_p5 = scmp.ne.s32.totalorder %s88_s20, %s6144_s30  ;;  %p6150_p7 = scmp.lt.s32.totalorder %s6144_s30, %s6144_s30 }
  0x31   :  { %p6151_p8 = por %p6150_p7, %p6149_p6 }
  0x33   :  { %p6152_p9 = pnand %p6151_p8, %p6145_p5 }
  0x35   :  { %6155 = shalt.err (!%p6152_p9)
}
  0x36   :  { %93 = dma.hbm_to_vmem [thread:$0]  %s7850_s5, 512, %s88_s20, [#allocation12], %s6348_s25, %s6348_s25, %s6349_s26  }
  0x37   :  { %s6351_s11 = smov [#allocation14]   ;;  %s6352_s13 = smov [#allocation2]  }
  0x38   :  { %s111_s12 = sshll.u32 %s6351_s11, 4  ;;  %s27_s15 = sshll.u32 %s6352_s13, 4  ;;  %s112_s12 = int_to_ptr.vmem [resolvable:$true] %s111_s12  ;;  %s28_s15 = int_to_ptr.vmem [resolvable:$true] %s27_s15 }
  0x39   :  { %s6156_s1 = scalar_lea.hbm %s7852_s7, 512 }
  0x3a   :  { %p6157_p10 = scmp.ne.s32.totalorder %s7852_s7, %s6156_s1  ;;  %p6160_p11 = scmp.lt.u32.totalorder %s6156_s1, %s7852_s7 }
  0x3c   :  { %p6162_p12 = pnand %p6160_p11, %p6157_p10 }
  0x3e   :  { %6165 = shalt.err (!%p6162_p12)
}
  0x3f   :  { %s6166_s5 = scalar_lea.vmem %s112_s12, 512  ;;  %p6171_p0 = scmp.lt.s32.totalorder %s112_s12, %s112_s12 }
  0x40   :  { %p6167_p13 = scmp.ne.s32.totalorder %s112_s12, %s6166_s5  ;;  %p6172_p1 = scmp.lt.s32.totalorder %s6166_s5, %s6166_s5 }
  0x42   :  { %p6173_p2 = por %p6172_p1, %p6171_p0 }
  0x44   :  { %p6174_p3 = pnand %p6173_p2, %p6167_p13 }
  0x46   :  { %6177 = shalt.err (!%p6174_p3)
}
  0x47   :  { %s6353_s20 = smov 128   ;;  %s6354_s23 = smov 8  }
  0x48   :  { %117 = dma.hbm_to_vmem [thread:$0]  %s7852_s7, 512, %s112_s12, [#allocation15], %s6353_s20, %s6353_s20, %s6354_s23  }
  0x49   :  { %s6178_s30 = scalar_lea.hbm %s7845_s0, 384 }
  0x4a   :  { %p6179_p4 = scmp.ne.s32.totalorder %s7845_s0, %s6178_s30  ;;  %p6182_p5 = scmp.lt.u32.totalorder %s6178_s30, %s7845_s0 }
  0x4c   :  { %p6184_p6 = pnand %p6182_p5, %p6179_p4 }
  0x4e   :  { %6187 = shalt.err (!%p6184_p6)
}
  0x4f   :  { %s6188_s17 = scalar_lea.vmem %s28_s15, 384  ;;  %p6193_p8 = scmp.lt.s32.totalorder %s28_s15, %s28_s15 }
  0x50   :  { %p6189_p7 = scmp.ne.s32.totalorder %s28_s15, %s6188_s17  ;;  %p6194_p9 = scmp.lt.s32.totalorder %s6188_s17, %s6188_s17 }
  0x52   :  { %p6195_p10 = por %p6194_p9, %p6193_p8 }
  0x54   :  { %p6196_p11 = pnand %p6195_p10, %p6189_p7 }
  0x56   :  { %6199 = shalt.err (!%p6196_p11)
}
  0x57   :  { %33 = dma.hbm_to_vmem [thread:$0]  %s7845_s0, 384, %s28_s15, [#allocation3], %s6348_s25, %s6348_s25, %s6349_s26  }
  0x58   :  { %s6355_s18 = smov [#allocation7]   ;;  %s6356_s14 = smov [#allocation10]  }
  0x59   :  { %s51_s1 = sshll.u32 %s6355_s18, 4  ;;  %s75_s19 = sshll.u32 %s6356_s14, 4  ;;  %s52_s1 = int_to_ptr.vmem [resolvable:$true] %s51_s1  ;;  %s76_s19 = int_to_ptr.vmem [resolvable:$true] %s75_s19 }
  0x5a   :  { %s6200_s5 = scalar_lea.hbm %s7847_s2, 768 }
  0x5b   :  { %p6201_p12 = scmp.ne.s32.totalorder %s7847_s2, %s6200_s5  ;;  %p6204_p13 = scmp.lt.u32.totalorder %s6200_s5, %s7847_s2 }
  0x5d   :  { %p6206_p0 = pnand %p6204_p13, %p6201_p12 }
  0x5f   :  { %6209 = shalt.err (!%p6206_p0)
}
  0x60   :  { %s6210_s0 = scalar_lea.vmem %s52_s1, 768  ;;  %p6215_p2 = scmp.lt.s32.totalorder %s52_s1, %s52_s1 }
  0x61   :  { %p6211_p1 = scmp.ne.s32.totalorder %s52_s1, %s6210_s0  ;;  %p6216_p3 = scmp.lt.s32.totalorder %s6210_s0, %s6210_s0 }
  0x63   :  { %p6217_p4 = por %p6216_p3, %p6215_p2 }
  0x65   :  { %p6218_p5 = pnand %p6217_p4, %p6211_p1 }
  0x67   :  { %6221 = shalt.err (!%p6218_p5)
}
  0x68   :  { %57 = dma.hbm_to_vmem [thread:$0]  %s7847_s2, 768, %s52_s1, [#allocation6], %s6353_s20, %s6353_s20, %s6354_s23  }
  0x69   :  { %s6222_s11 = scalar_lea.hbm %s7849_s4, 512 }
  0x6a   :  { %p6223_p6 = scmp.ne.s32.totalorder %s7849_s4, %s6222_s11  ;;  %p6226_p7 = scmp.lt.u32.totalorder %s6222_s11, %s7849_s4 }
  0x6c   :  { %p6228_p8 = pnand %p6226_p7, %p6223_p6 }
  0x6e   :  { %6231 = shalt.err (!%p6228_p8)
}
  0x6f   :  { %s6232_s18 = scalar_lea.vmem %s76_s19, 512  ;;  %p6237_p10 = scmp.lt.s32.totalorder %s76_s19, %s76_s19 }
  0x70   :  { %p6233_p9 = scmp.ne.s32.totalorder %s76_s19, %s6232_s18  ;;  %p6238_p11 = scmp.lt.s32.totalorder %s6232_s18, %s6232_s18 }
  0x72   :  { %p6239_p12 = por %p6238_p11, %p6237_p10 }
  0x74   :  { %p6240_p13 = pnand %p6239_p12, %p6233_p9 }
  0x76   :  { %6243 = shalt.err (!%p6240_p13)
}
  0x77   :  { %81 = dma.hbm_to_vmem [thread:$0]  %s7849_s4, 512, %s76_s19, [#allocation9], %s6348_s25, %s6348_s25, %s6349_s26  }
  0x78   :  { %s6357_s23 = smov [#allocation13]   ;;  %s6358_s14 = smov [#allocation16]  }
  0x79   :  { %s99_s1 = sshll.u32 %s6357_s23, 4  ;;  %s123_s21 = sshll.u32 %s6358_s14, 4  ;;  %s100_s1 = int_to_ptr.vmem [resolvable:$true] %s99_s1  ;;  %s124_s21 = int_to_ptr.vmem [resolvable:$true] %s123_s21 }
  0x7a   :  { %s6244_s24 = scalar_lea.hbm %s7851_s6, 1024 }
  0x7b   :  { %p6245_p0 = scmp.ne.s32.totalorder %s7851_s6, %s6244_s24  ;;  %p6248_p1 = scmp.lt.u32.totalorder %s6244_s24, %s7851_s6 }
  0x7d   :  { %p6250_p2 = pnand %p6248_p1, %p6245_p0 }
  0x7f   :  { %6253 = shalt.err (!%p6250_p2)
}
  0x80   :  { %s6254_s4 = scalar_lea.vmem %s100_s1, 1024  ;;  %p6259_p4 = scmp.lt.s32.totalorder %s100_s1, %s100_s1 }
  0x81   :  { %p6255_p3 = scmp.ne.s32.totalorder %s100_s1, %s6254_s4  ;;  %p6260_p5 = scmp.lt.s32.totalorder %s6254_s4, %s6254_s4 }
  0x83   :  { %p6261_p6 = por %p6260_p5, %p6259_p4 }
  0x85   :  { %p6262_p7 = pnand %p6261_p6, %p6255_p3 }
  0x87   :  { %6265 = shalt.err (!%p6262_p7)
}
  0x88   :  { %105 = dma.hbm_to_vmem [thread:$0]  %s7851_s6, 1024, %s100_s1, [#allocation12], %s6348_s25, %s6348_s25, %s6349_s26  }
  0x89   :  { %s6266_s16 = scalar_lea.hbm %s7853_s8, 256 }
  0x8a   :  { %p6267_p8 = scmp.ne.s32.totalorder %s7853_s8, %s6266_s16  ;;  %p6270_p9 = scmp.lt.u32.totalorder %s6266_s16, %s7853_s8 }
  0x8c   :  { %p6272_p10 = pnand %p6270_p9, %p6267_p8 }
  0x8e   :  { %6275 = shalt.err (!%p6272_p10)
}
  0x8f   :  { %s6276_s12 = scalar_lea.vmem %s124_s21, 256  ;;  %p6281_p12 = scmp.lt.s32.totalorder %s124_s21, %s124_s21 }
  0x90   :  { %p6277_p11 = scmp.ne.s32.totalorder %s124_s21, %s6276_s12  ;;  %p6282_p13 = scmp.lt.s32.totalorder %s6276_s12, %s6276_s12 }
  0x92   :  { %p6283_p0 = por %p6282_p13, %p6281_p12 }
  0x94   :  { %p6284_p1 = pnand %p6283_p0, %p6277_p11 }
  0x96   :  { %6287 = shalt.err (!%p6284_p1)
}
  0x97   :  { %129 = dma.hbm_to_vmem [thread:$0]  %s7853_s8, 256, %s124_s21, [#allocation15], %s6348_s25, %s6348_s25, %s6349_s26  }
  0x98   :  { %s6359_s2 = smov [#allocation17]   ;;  %s6288_s14 = scalar_lea.hbm %s7854_s9, 64 }
  0x99   :  { %s136_s20 = sshll.u32 %s6359_s2, 4  ;;  %p6289_p2 = scmp.ne.s32.totalorder %s7854_s9, %s6288_s14  ;;  %s137_s20 = int_to_ptr.vmem [resolvable:$true] %s136_s20 }
  0x9a   :  { %p6292_p3 = scmp.lt.u32.totalorder %s6288_s14, %s7854_s9 }
  0x9c   :  { %p6294_p4 = pnand %p6292_p3, %p6289_p2 }
  0x9e   :  { %6297 = shalt.err (!%p6294_p4)
}
  0x9f   :  { %s6298_s28 = scalar_lea.vmem %s137_s20, 64  ;;  %p6303_p6 = scmp.lt.s32.totalorder %s137_s20, %s137_s20 }
  0xa0   :  { %p6299_p5 = scmp.ne.s32.totalorder %s137_s20, %s6298_s28  ;;  %p6304_p7 = scmp.lt.s32.totalorder %s6298_s28, %s6298_s28 }
  0xa2   :  { %p6305_p8 = por %p6304_p7, %p6303_p6 }
  0xa4   :  { %p6306_p9 = pnand %p6305_p8, %p6299_p5 }
  0xa6   :  { %6309 = shalt.err (!%p6306_p9)
}
  0xa7   :  { %139 = dma.hbm_to_vmem [thread:$0]  %s7854_s9, 64, %s137_s20, [#allocation18]  }
  0xa8   :  { %6332 = dma.done.wait [#allocation3], 384  }
  0xa9   :  { %6333 = vsyncadd [#allocation3], 4294966912 }
  0xaa   :  { %6334 = dma.done.wait [#allocation6], 1152  }
  0xab   :  { %6335 = vsyncadd [#allocation6], 4294966144 }
  0xac   :  { %6336 = dma.done.wait [#allocation9], 1024  }
  0xad   :  { %6337 = vsyncadd [#allocation9], 4294966272 }
  0xae   :  { %6338 = dma.done.wait [#allocation12], 1536  }
  0xaf   :  { %6339 = vsyncadd [#allocation12], 4294965760 }
  0xb0   :  { %6340 = dma.done.wait [#allocation15], 768  }
  0xb1   :  { %6341 = vsyncadd [#allocation15], 4294966528 }
  0xb2   :  { %6342 = dma.done.wait [#allocation18], 64  }
  0xb3   :  { %6343 = vsyncadd [#allocation18], 4294967232  ;;  %v6360_v0 = vmov 0.0   ;;  %vm6361_vm0 = vmmov 0   ;;  %v5798_v1 = vld [vmem:[#allocation5] sm:$0xff]   ;;  %v5799_v2 = vld [vmem:[#allocation5 + $0x8] sm:$0xff]  }
  0xb4   :  { %5223 = vmatprep.subr.bf16.mxu0 %v6360_v0  ;;  %5229 = vmatprep.mubr.msk.bf16.mxu0 %vm6361_vm0, %v6360_v0  ;;  %v5800_v3 = vld [vmem:[#allocation5 + $0x10] sm:$0xff]   ;;  %vm226_vm1 = vcmask 392192   ;;  %v5801_v4 = vld [vmem:[#allocation2] sm:$0xff]   ;;  %v5803_v6 = vld [vmem:[#allocation2 + $0x10] sm:$0xff]   ;;  %vm295_vm2 = vcmask 261120   ;;  %s6362_s9 = smov 32  }
  0xb5   :  { %5241 = vmatprep.subr.bf16.mxu1 %v6360_v0  ;;  %5245 = vmatprep.mubr.msk.bf16.mxu1 %vm6361_vm0, %v6360_v0  ;;  %v5802_v5 = vld [vmem:[#allocation2 + $0x8] sm:$0xff]   ;;  %v187_v7 = vld [vmem:[#allocation7] sm:$0xff]  ;;  %v188_v9 = vld [vmem:[#allocation7 + $0x8] sm:$0xff]  ;;  %vm546_vm3 = vcmask 64512   ;;  %s6363_s21 = smov 96   ;;  %vm673_vm5 = vcmask 195584  }
  0xb6   :  { %5224 = vmatpush3.bf16.msra.mxu0 %v5798_v1  ;;  %v189_v16 = vld [vmem:[#allocation7 + $0x10] sm:$0xff]  ;;  %v190_v19 = vld [vmem:[#allocation7 + $0x18] sm:$0xff]  ;;  %v191_v26 = vld [vmem:[#allocation7 + $0x20] sm:$0xff]  ;;  %s6365_s29 = smov 88   ;;  %s6366_s0 = smov 120   ;;  %vm757_vm6 = vcmask 1043456  }
  0xb7   :  { %5225 = vmatprep.subr.bf16.mxu0 %v6360_v0  ;;  %v192_v29 = vld [vmem:[#allocation7 + $0x28] sm:$0xff]  ;;  %s6367_s4 = smov 56   ;;  %s6368_s19 = smov 80   ;;  %vm2463_vm7 = vcmask 523264   ;;  %vm4773_vm8 = vcmask 1040384   ;;  %vm4776_vm9 = vcmask 254976  }
  0xb8   :  { %s6369_s15 = smov 112   ;;  %s6370_s30 = smov 48   ;;  %vm4864_vm10 = vcmask 58368  }
  0xb9   :  { %s6371_s3 = smov 72   ;;  %s6372_s16 = smov 104  }
  0xba   :  { %5226 = vmatpush3.bf16.msra.mxu0 %v5799_v2  ;;  %s6373_s11 = smov 40  }
  0xbb   :  { %5227 = vmatprep.subr.bf16.mxu0 %v6360_v0 }
  0xbe   :  { %5228 = vmatpush3.bf16.msra.mxu0 %v5800_v3 }
  0xc1   :  { %5230 = vmatmul.mubr.msk.bf16.vlgmr.msra.gmra.mrb[0].mxu0 %vm226_vm1, %v5801_v4  ;;  %v5804_v4 = vld [vmem:[#allocation8] sm:$0xff]  }
  0xc2   :  { %5233 = vmatprep.mubr.msk.bf16.mxu0 %vm6361_vm0, %v6360_v0  ;;  %5242 = vmatpush3.bf16.msra.mxu1 %v5804_v4 }
  0xc3   :  { %5243 = vmatprep.subr.bf16.mxu1 %v6360_v0 }
  0xc9   :  { %5234 = vmatmul.mubr.msk.bf16.gmra.mrb[4].mxu0 %vm226_vm1, %v5802_v5  ;;  %v5805_v5 = vld [vmem:[#allocation8 + $0x8] sm:$0xff]  }
  0xca   :  { %5237 = vmatprep.mubr.msk.bf16.mxu0 %vm6361_vm0, %v6360_v0  ;;  %5244 = vmatpush3.bf16.msra.mxu1 %v5805_v5 }
  0xd1   :  { %5238 = vmatmul.mubr.msk.bf16.gmra.mrb[8].mxu0 %vm226_vm1, %v5803_v6  ;;  %v171_v6 = vlaneseq }
 0x194   :  { %v270_v8 = vpop.f32.mrb[0].mxu0 }
 0x195   :  { %v6596_v10 = vadd.f32 %v270_v8, %v187_v7  ;;  %v5231_v11 = vpop.f32.mrb[1].mxu0  ;;  %v6658_v7 = vshrl.u32 %v171_v6, 7 }
 0x196   :  { %v273_v12 = vpop.f32.mrb[2].mxu0 }
 0x197   :  { %v6598_v13 = vadd.f32 %v273_v12, %v188_v9  ;;  %v5232_v14 = vpop.f32.mrb[3].mxu0  ;;  %v296_v15 = vsel %vm295_vm2, %v6596_v10, 0.0  ;;  %v498_v8 = vsub.s32 3, %v6658_v7  ;;  %v6661_v9 = vld [vmem:[#allocation14] sm:$0xff]  ;;  %v6691_v5 = vsub.s32 2, %v6658_v7 }
 0x198   :  { %297 = vadd.xlane.f32.xlu0 %v296_v15 }
 0x199   :  { %v299_v17 = vsel %vm295_vm2, %v6598_v13, 0.0  ;;  %v499_v11 = vrot.slane %v6661_v9, %v498_v8 }
 0x19c   :  { %300 = vadd.xlane.f32.xlu0 %v299_v17  ;;  %v278_v18 = vpop.f32.mrb[4].mxu0 }
 0x19d   :  { %v6604_v20 = vadd.f32 %v278_v18, %v189_v16  ;;  %v5235_v21 = vpop.f32.mrb[5].mxu0 }
 0x19e   :  { %v281_v22 = vpop.f32.mrb[6].mxu0 }
 0x19f   :  { %v6606_v23 = vadd.f32 %v281_v22, %v190_v19  ;;  %v5236_v24 = vpop.f32.mrb[7].mxu0  ;;  %v302_v25 = vsel %vm295_vm2, %v6604_v20, 0.0 }
 0x1a0   :  { %303 = vadd.xlane.f32.xlu1 %v302_v25  ;;  %v6668_v25 = vsub.s32 0, %v6658_v7 }
 0x1a1   :  { %v305_v27 = vsel %vm295_vm2, %v6606_v23, 0.0 }
 0x1a4   :  { %306 = vadd.xlane.f32.xlu1 %v305_v27  ;;  %v286_v28 = vpop.f32.mrb[8].mxu0 }
 0x1a5   :  { %v6612_v30 = vadd.f32 %v286_v28, %v191_v26  ;;  %v5239_v31 = vpop.f32.mrb[9].mxu0 }
 0x1a6   :  { %v289_v32 = vpop.f32.mrb[10].mxu0 }
 0x1a7   :  { %v6614_v33 = vadd.f32 %v289_v32, %v192_v29  ;;  %v5240_v34 = vpop.f32.mrb[11].mxu0  ;;  %v308_v35 = vsel %vm295_vm2, %v6612_v30, 0.0  ;;  %v378_v32 = vrot.slane %v6661_v9, %v6668_v25 }
 0x1a8   :  { %309 = vadd.xlane.f32.xlu0 %v308_v35  ;;  %v6674_v34 = vsub.s32 1, %v6658_v7 }
 0x1a9   :  { %v311_v36 = vsel %vm295_vm2, %v6614_v33, 0.0 }
 0x1aa   :  { %312 = vadd.xlane.f32.xlu1 %v311_v36 }
 0x225   :  { %v298_v37 = vpop.xlane.xlu0 %297 }
 0x226   :  { %v315_v38 = vmul.f32 0.03125, %v298_v37 }
 0x228   :  { %v6621_v39 = vsub.f32 %v6596_v10, %v315_v38 }
 0x229   :  { %v301_v40 = vpop.xlane.xlu0 %300 }
 0x22a   :  { %v316_v41 = vmul.f32 0.03125, %v301_v40  ;;  %v327_v42 = vmul.f32 %v6621_v39, %v6621_v39 }
 0x22c   :  { %v6626_v43 = vsub.f32 %v6598_v13, %v316_v41  ;;  %v333_v44 = vsel %vm295_vm2, %v327_v42, 0.0 }
 0x22d   :  { %v304_v45 = vpop.xlane.xlu1 %303  ;;  %334 = vadd.xlane.f32.xlu0 %v333_v44  ;;  %v388_v44 = vrot.slane %v6661_v9, %v6674_v34 }
 0x22e   :  { %v317_v46 = vmul.f32 0.03125, %v304_v45  ;;  %v328_v47 = vmul.f32 %v6626_v43, %v6626_v43 }
 0x230   :  { %v6632_v48 = vsub.f32 %v6604_v20, %v317_v46  ;;  %v336_v49 = vsel %vm295_vm2, %v328_v47, 0.0 }
 0x231   :  { %v307_v50 = vpop.xlane.xlu1 %306  ;;  %337 = vadd.xlane.f32.xlu1 %v336_v49 }
 0x232   :  { %v318_v51 = vmul.f32 0.03125, %v307_v50  ;;  %v329_v52 = vmul.f32 %v6632_v48, %v6632_v48 }
 0x234   :  { %v6638_v53 = vsub.f32 %v6606_v23, %v318_v51  ;;  %v339_v54 = vsel %vm295_vm2, %v329_v52, 0.0 }
 0x235   :  { %340 = vadd.xlane.f32.xlu0 %v339_v54  ;;  %v310_v55 = vpop.xlane.xlu0 %309 }
 0x236   :  { %v319_v56 = vmul.f32 0.03125, %v310_v55  ;;  %v330_v57 = vmul.f32 %v6638_v53, %v6638_v53 }
 0x237   :  { %v313_v58 = vpop.xlane.xlu1 %312 }
 0x238   :  { %v6644_v59 = vsub.f32 %v6612_v30, %v319_v56  ;;  %v320_v60 = vmul.f32 0.03125, %v313_v58  ;;  %v342_v61 = vsel %vm295_vm2, %v330_v57, 0.0 }
 0x239   :  { %343 = vadd.xlane.f32.xlu1 %v342_v61 }
 0x23a   :  { %v6648_v62 = vsub.f32 %v6614_v33, %v320_v60  ;;  %v331_v63 = vmul.f32 %v6644_v59, %v6644_v59 }
 0x23c   :  { %v345_v1 = vsel %vm295_vm2, %v331_v63, 0.0  ;;  %v332_v2 = vmul.f32 %v6648_v62, %v6648_v62 }
 0x23d   :  { %346 = vadd.xlane.f32.xlu0 %v345_v1 }
 0x23e   :  { %v348_v3 = vsel %vm295_vm2, %v332_v2, 0.0 }
 0x23f   :  { %349 = vadd.xlane.f32.xlu1 %v348_v3 }
 0x253   :  { %501 = vrot.lane.b32.xlu0 %v499_v11, %s6362_s9 }
 0x2ba   :  { %v335_v12 = vpop.xlane.xlu0 %334 }
 0x2bb   :  { %v351_v14 = vmul.f32 0.03125, %v335_v12 }
 0x2bd   :  { %v357_v15 = vadd.f32 1e-06, %v351_v14 }
 0x2be   :  { %v338_v16 = vpop.xlane.xlu1 %337 }
 0x2bf   :  { %5822 = vrsqrt.f32 %v357_v15  ;;  %v352_v17 = vmul.f32 0.03125, %v338_v16 }
 0x2c1   :  { %v358_v18 = vadd.f32 1e-06, %v352_v17 }
 0x2c2   :  { %v341_v19 = vpop.xlane.xlu0 %340 }
 0x2c3   :  { %5824 = vrsqrt.f32 %v358_v18  ;;  %v353_v21 = vmul.f32 0.03125, %v341_v19 }
 0x2c5   :  { %v359_v22 = vadd.f32 1e-06, %v353_v21 }
 0x2c6   :  { %v344_v24 = vpop.xlane.xlu1 %343 }
 0x2c7   :  { %5826 = vrsqrt.f32 %v359_v22  ;;  %v354_v26 = vmul.f32 0.03125, %v344_v24 }
 0x2c9   :  { %v5823_v27 = vpop.eup %5822  ;;  %v360_v28 = vadd.f32 1e-06, %v354_v26 }
 0x2ca   :  { %v347_v29 = vpop.xlane.xlu0 %346  ;;  %v369_v31 = vmul.f32 %v5823_v27, %v6621_v39 }
 0x2cb   :  { %5828 = vrsqrt.f32 %v360_v28  ;;  %v355_v35 = vmul.f32 0.03125, %v347_v29 }
 0x2cc   :  { %v350_v36 = vpop.xlane.xlu1 %349  ;;  %v379_v42 = vmul.f32 %v378_v32, %v369_v31 }
 0x2cd   :  { %v5825_v37 = vpop.eup %5824  ;;  %v361_v38 = vadd.f32 1e-06, %v355_v35  ;;  %v356_v40 = vmul.f32 0.03125, %v350_v36 }
 0x2ce   :  { %v370_v41 = vmul.f32 %v5825_v37, %v6626_v43  ;;  %v389_v47 = vadd.f32 %v388_v44, %v379_v42  ;;  %v502_v11 = vpop.permute.xlu0 %501 }
 0x2cf   :  { %5830 = vrsqrt.f32 %v361_v38  ;;  %v362_v39 = vadd.f32 1e-06, %v356_v40 }
 0x2d0   :  { %v380_v45 = vmul.f32 %v378_v32, %v370_v41 }
 0x2d1   :  { %v5827_v46 = vpop.eup %5826  ;;  %5832 = vrsqrt.f32 %v362_v39 }
 0x2d2   :  { %v390_v49 = vadd.f32 %v388_v44, %v380_v45  ;;  %v371_v50 = vmul.f32 %v5827_v46, %v6632_v48 }
 0x2d4   :  { %v395_v51 = vpack.c.bf16 %v390_v49, %v389_v47  ;;  %v381_v43 = vmul.f32 %v378_v32, %v371_v50 }
 0x2d5   :  { %v5829_v52 = vpop.eup %5828 }
 0x2d6   :  { %5246 = vmatmul.mubr.msk.bf16.vlgmr.msra.gmra.mrb[0].mxu1 %vm295_vm2, %v395_v51  ;;  %v372_v54 = vmul.f32 %v5829_v52, %v6638_v53  ;;  %v391_v57 = vadd.f32 %v388_v44, %v381_v43 }
 0x2d7   :  { %5249 = vmatprep.mubr.msk.bf16.mxu1 %vm6361_vm0, %v6360_v0 }
 0x2d8   :  { %v382_v55 = vmul.f32 %v378_v32, %v372_v54 }
 0x2d9   :  { %v5831_v56 = vpop.eup %5830 }
 0x2da   :  { %v392_v58 = vadd.f32 %v388_v44, %v382_v55  ;;  %v373_v60 = vmul.f32 %v5831_v56, %v6644_v59  ;;  %v483_v59 = vrot.slane %v6661_v9, %v6691_v5 }
 0x2db   :  { %v5833_v61 = vpop.eup %5832 }
 0x2dc   :  { %v396_v63 = vpack.c.bf16 %v392_v58, %v391_v57  ;;  %v374_v48 = vmul.f32 %v5833_v61, %v6648_v62  ;;  %v383_v1 = vmul.f32 %v378_v32, %v373_v60 }
 0x2de   :  { %5250 = vmatmul.mubr.msk.bf16.gmra.mrb[4].mxu1 %vm295_vm2, %v396_v63  ;;  %v384_v2 = vmul.f32 %v378_v32, %v374_v48  ;;  %v393_v3 = vadd.f32 %v388_v44, %v383_v1 }
 0x2df   :  { %5253 = vmatprep.mubr.msk.bf16.mxu1 %vm6361_vm0, %v6360_v0 }
 0x2e0   :  { %v394_v53 = vadd.f32 %v388_v44, %v384_v2 }
 0x2e2   :  { %v397_v4 = vpack.c.bf16 %v394_v53, %v393_v3  ;;  %v172_v3 = vand.u32 127, %v171_v6 }
 0x2e4   :  { %vm173_vm4 = vcmp.lt.s32.totalorder %v172_v3, 17 }
 0x2e6   :  { %5254 = vmatmul.mubr.msk.bf16.gmra.mrb[8].mxu1 %vm295_vm2, %v397_v4  ;;  %v6364_v4 = vmov -1e+30  }
 0x3a9   :  { %v6695_v62 = vpop.f32.mrb[0].mxu1 }
 0x3aa   :  { %v484_v12 = vadd.f32 %v483_v59, %v6695_v62  ;;  %v5247_v14 = vpop.f32.mrb[1].mxu1  ;;  %v504_v16 = vadd.f32 %v502_v11, %v6695_v62 }
 0x3ab   :  { %v6698_v15 = vpop.f32.mrb[2].mxu1 }
 0x3ac   :  { %v485_v17 = vadd.f32 %v483_v59, %v6698_v15  ;;  %v505_v18 = vadd.f32 %v502_v11, %v6698_v15  ;;  %v5248_v19 = vpop.f32.mrb[3].mxu1  ;;  %v490_v21 = vmul.f32 0.35355338, %v484_v12 }
 0x3ae   :  { %v491_v22 = vmul.f32 0.35355338, %v485_v17  ;;  %v6703_v24 = vpack.c.bf16 %v505_v18, %v504_v16 }
 0x3b0   :  { %v6705_v26 = vpack.c.bf16 %v491_v22, %v490_v21  ;;  %542 = vrot.lane.b32.xlu1 %v6703_v24, %s6363_s21 }
 0x3b1   :  { %v6709_v27 = vpop.f32.mrb[4].mxu1 }
 0x3b2   :  { %v486_v28 = vadd.f32 %v483_v59, %v6709_v27  ;;  %v506_v29 = vadd.f32 %v502_v11, %v6709_v27  ;;  %v5251_v31 = vpop.f32.mrb[5].mxu1  ;;  %5261 = vmatprep.mubr.msk.bf16.mxu1 %vm546_vm3, %v6705_v26 }
 0x3b3   :  { %v6715_v32 = vpop.f32.mrb[6].mxu1 }
 0x3b4   :  { %v6717_v35 = vpack.c.bf16 %v506_v29, %v506_v29  ;;  %v5252_v36 = vpop.f32.mrb[7].mxu1  ;;  %v487_v37 = vadd.f32 %v483_v59, %v6715_v32  ;;  %v507_v40 = vadd.f32 %v502_v11, %v6715_v32  ;;  %v492_v58 = vmul.f32 0.35355338, %v486_v28 }
 0x3b6   :  { %544 = vrot.lane.b32.xlu1 %v6717_v35, %s6363_s21  ;;  %v493_v39 = vmul.f32 0.35355338, %v487_v37  ;;  %v6747_v61 = vpack.c.bf16 %v492_v58, %v492_v58 }
 0x3b9   :  { %v6722_v38 = vpop.f32.mrb[8].mxu1 }
 0x3ba   :  { %v488_v41 = vadd.f32 %v483_v59, %v6722_v38  ;;  %v508_v42 = vadd.f32 %v502_v11, %v6722_v38  ;;  %v5255_v44 = vpop.f32.mrb[9].mxu1 }
 0x3bb   :  { %v6727_v45 = vpop.f32.mrb[10].mxu1 }
 0x3bc   :  { %v494_v46 = vmul.f32 0.35355338, %v488_v41  ;;  %v6729_v47 = vpack.c.bf16 %v508_v42, %v507_v40  ;;  %v489_v49 = vadd.f32 %v483_v59, %v6727_v45  ;;  %v509_v50 = vadd.f32 %v502_v11, %v6727_v45  ;;  %v5256_v51 = vpop.f32.mrb[11].mxu1 }
 0x3bd   :  { %v6760_v59 = vsel %vm173_vm4, 0.0, %v6364_v4 }
 0x3be   :  { %v6733_v52 = vpack.c.bf16 %v494_v46, %v493_v39  ;;  %v6735_v54 = vpack.c.bf16 %v509_v50, %v509_v50  ;;  %609 = vrot.lane.b32.xlu1 %v6729_v47, %s6363_s21  ;;  %v495_v2 = vmul.f32 0.35355338, %v489_v49  ;;  %v512_v46 = vsub.s32 4, %v6658_v7 }
 0x3c0   :  { %5269 = vmatprep.mubr.msk.bf16.mxu0 %vm546_vm3, %v6733_v52  ;;  %611 = vrot.lane.b32.xlu0 %v6735_v54, %s6363_s21  ;;  %v6755_v53 = vpack.c.bf16 %v495_v2, %v495_v2  ;;  %v513_v49 = vrot.slane %v6661_v9, %v512_v46 }
 0x422   :  { %v543_v43 = vpop.permute.xlu1 %542 }
 0x423   :  { %5721 = vmatprep.subr.msk.bf16.mxu1 %vm546_vm3, %v543_v43  ;;  %v554_v55 = vsel %vm546_vm3, %v543_v43, 0 }
 0x424   :  { %5258 = vmatpush3.bf16.xpose.msra.mxu1 %v554_v55 }
 0x428   :  { %v545_v56 = vpop.permute.xlu1 %544 }
 0x429   :  { %5722 = vmatprep.subr.msk.bf16.mxu1 %vm546_vm3, %v545_v56  ;;  %v557_v57 = vsel %vm546_vm3, %v545_v56, 0 }
 0x42c   :  { %5260 = vmatpush3.bf16.xpose.msra.mxu1 %v557_v57 }
 0x430   :  { %v610_v60 = vpop.permute.xlu1 %609 }
 0x431   :  { %5723 = vmatprep.subr.msk.bf16.mxu0 %vm546_vm3, %v610_v60  ;;  %v620_v63 = vsel %vm546_vm3, %v610_v60, 0 }
 0x432   :  { %v612_v48 = vpop.permute.xlu0 %611  ;;  %5266 = vmatpush3.bf16.xpose.msra.mxu0 %v620_v63 }
 0x433   :  { %5262 = vmatmul.mubr.msk.bf16.vlgmr.msra.gmra.mrb[12].mxu1 %vm546_vm3, %v6747_v61  ;;  %5724 = vmatprep.subr.msk.bf16.mxu0 %vm546_vm3, %v612_v48  ;;  %v623_v1 = vsel %vm546_vm3, %v612_v48, 0 }
 0x43a   :  { %5268 = vmatpush3.bf16.xpose.msra.mxu0 %v623_v1 }
 0x441   :  { %5270 = vmatmul.mubr.msk.bf16.vlgmr.msra.gmra.mrb[12].mxu0 %vm546_vm3, %v6755_v53 }
 0x506   :  { %v5263_v11 = vpop.f32.mrb[12].mxu1 }
 0x507   :  { %v593_v12 = vpop.f32.mrb[13].mxu1  ;;  %v602_v21 = vadd.f32 %v5263_v11, %v6760_v59 }
 0x508   :  { %v594_v14 = vadd.f32 %v593_v12, %v6760_v59  ;;  %v5264_v16 = vpop.f32.mrb[14].mxu1 }
 0x509   :  { %v596_v17 = vpop.f32.mrb[15].mxu1  ;;  %v680_v22 = vsel %vm673_vm5, %v602_v21, -inf }
 0x50a   :  { %v597_v18 = vadd.f32 %v596_v17, %v6760_v59  ;;  %v674_v19 = vsel %vm673_vm5, %v594_v14, -inf }
 0x50b   :  { %675 = vmax.xlane.f32.xlu1 %v674_v19 }
 0x50c   :  { %v677_v6 = vsel %vm673_vm5, %v597_v18, -inf }
 0x50d   :  { %678 = vmax.xlane.f32.xlu0 %v677_v6 }
 0x511   :  { %681 = vmax.xlane.f32.xlu0 %v680_v22 }
 0x514   :  { %v5271_v28 = vpop.f32.mrb[12].mxu0 }
 0x515   :  { %v668_v29 = vadd.f32 %v5271_v28, %v6760_v59  ;;  %v659_v31 = vpop.f32.mrb[13].mxu0 }
 0x516   :  { %v5272_v36 = vpop.f32.mrb[14].mxu0  ;;  %v660_v37 = vadd.f32 %v659_v31, %v6760_v59 }
 0x517   :  { %v662_v40 = vpop.f32.mrb[15].mxu0  ;;  %v689_v41 = vsel %vm673_vm5, %v668_v29, -inf }
 0x518   :  { %v663_v42 = vadd.f32 %v662_v40, %v6760_v59  ;;  %690 = vmax.xlane.f32.xlu0 %v689_v41  ;;  %v683_v39 = vsel %vm673_vm5, %v660_v37, -inf }
 0x51a   :  { %v686_v44 = vsel %vm673_vm5, %v663_v42, -inf }
 0x51b   :  { %687 = vmax.xlane.f32.xlu1 %v686_v44 }
 0x51c   :  { %684 = vmax.xlane.f32.xlu0 %v683_v39 }
 0x52c   :  { %515 = vrot.lane.b32.xlu1 %v513_v49, %s6348_s25 }
 0x598   :  { %v676_v50 = vpop.xlane.xlu1 %675 }
 0x599   :  { %v692_v3 = vsub.f32 %v594_v14, %v676_v50 }
 0x59b   :  { %v698_v12 = vmul.f32 1.442695, %v692_v3 }
 0x5a8   :  { %v688_v51 = vpop.xlane.xlu1 %687 }
 0x5a9   :  { %v696_v43 = vsub.f32 %v663_v42, %v688_v51 }
 0x5ab   :  { %v706_v55 = vmul.f32 1.442695, %v696_v43 }
 0x5ac   :  { %v516_v56 = vpop.permute.xlu1 %515 }
 0x5ad   :  { %5834 = vpow2.f32 %v706_v55  ;;  %v518_v57 = vadd.f32 %v516_v56, %v6695_v62  ;;  %v519_v58 = vadd.f32 %v516_v56, %v6698_v15  ;;  %v521_v60 = vadd.f32 %v516_v56, %v6715_v32  ;;  %v679_v32 = vpop.xlane.xlu0 %678 }
 0x5ae   :  { %v522_v63 = vadd.f32 %v516_v56, %v6722_v38  ;;  %v520_v9 = vadd.f32 %v516_v56, %v6709_v27  ;;  %v693_v16 = vsub.f32 %v597_v18, %v679_v32  ;;  %v523_v39 = vadd.f32 %v516_v56, %v6727_v45 }
 0x5af   :  { %v6783_v48 = vpack.c.bf16 %v519_v58, %v518_v57 }
 0x5b0   :  { %v6786_v1 = vpack.c.bf16 %v522_v63, %v521_v60  ;;  %v6790_v2 = vpack.c.bf16 %v520_v9, %v520_v9  ;;  %v700_v17 = vmul.f32 1.442695, %v693_v16  ;;  %v6812_v49 = vpack.c.bf16 %v523_v39, %v523_v39 }
 0x5b1   :  { %746 = vrot.lane.b32.xlu0 %v6783_v48, %s6348_s25  ;;  %v682_v27 = vpop.xlane.xlu0 %681 }
 0x5b2   :  { %v694_v38 = vsub.f32 %v602_v21, %v682_v27 }
 0x5b4   :  { %v702_v4 = vmul.f32 1.442695, %v694_v38 }
 0x5b5   :  { %748 = vrot.lane.b32.xlu0 %v6790_v2, %s6348_s25  ;;  %v691_v11 = vpop.xlane.xlu0 %690 }
 0x5b6   :  { %5836 = vpow2.f32 %v702_v4  ;;  %v697_v19 = vsub.f32 %v668_v29, %v691_v11 }
 0x5b7   :  { %v6794_v62 = vpop.eup %5834  ;;  %5838 = vpow2.f32 %v698_v12 }
 0x5b8   :  { %v722_v15 = vsel %vm673_vm5, %v6794_v62, 0.0  ;;  %5840 = vpow2.f32 %v700_v17  ;;  %v708_v22 = vmul.f32 1.442695, %v697_v19 }
 0x5b9   :  { %723 = vadd.xlane.f32.xlu1 %v722_v15  ;;  %811 = vrot.lane.b32.xlu0 %v6786_v1, %s6348_s25  ;;  %v685_v6 = vpop.xlane.xlu0 %684 }
 0x5ba   :  { %v695_v21 = vsub.f32 %v660_v37, %v685_v6  ;;  %5842 = vpow2.f32 %v708_v22 }
 0x5bc   :  { %v704_v18 = vmul.f32 1.442695, %v695_v21 }
 0x5be   :  { %5844 = vpow2.f32 %v704_v18 }
 0x5c0   :  { %v5837_v14 = vpop.eup %5836 }
 0x5c1   :  { %v716_v28 = vsel %vm673_vm5, %v5837_v14, 0.0  ;;  %v5839_v31 = vpop.eup %5838 }
 0x5c2   :  { %v710_v29 = vsel %vm673_vm5, %v5839_v31, 0.0  ;;  %v5841_v36 = vpop.eup %5840 }
 0x5c3   :  { %v713_v40 = vsel %vm673_vm5, %v5841_v36, 0.0 }
 0x5c4   :  { %v5843_v41 = vpop.eup %5842 }
 0x5c5   :  { %v725_v37 = vsel %vm673_vm5, %v5843_v41, 0.0 }
 0x5c8   :  { %v5845_v42 = vpop.eup %5844 }
 0x5c9   :  { %v719_v44 = vsel %vm673_vm5, %v5845_v42, 0.0 }
 0x5ca   :  { %882 = vrot.lane.b32.xlu1 %v6703_v24, %s6365_s29 }
 0x5ce   :  { %954 = vrot.lane.b32.xlu1 %v6735_v54, %s6365_s29 }
 0x5d2   :  { %950 = vrot.lane.b32.xlu1 %v6755_v53, %s6366_s0 }
 0x5d8   :  { %717 = vadd.xlane.f32.xlu0 %v716_v28 }
 0x5dc   :  { %711 = vadd.xlane.f32.xlu0 %v710_v29 }
 0x5e0   :  { %714 = vadd.xlane.f32.xlu0 %v713_v40 }
 0x5e4   :  { %726 = vadd.xlane.f32.xlu0 %v725_v37 }
 0x5e8   :  { %720 = vadd.xlane.f32.xlu0 %v719_v44 }
 0x5fe   :  { %813 = vrot.lane.b32.xlu0 %v6812_v49, %s6348_s25 }
 0x602   :  { %884 = vrot.lane.b32.xlu0 %v6717_v35, %s6365_s29 }
 0x606   :  { %952 = vrot.lane.b32.xlu0 %v6729_v47, %s6365_s29 }
 0x60a   :  { %878 = vrot.lane.b32.xlu0 %v6705_v26, %s6366_s0 }
 0x60e   :  { %880 = vrot.lane.b32.xlu0 %v6747_v61, %s6366_s0 }
 0x612   :  { %948 = vrot.lane.b32.xlu0 %v6733_v52, %s6366_s0 }
 0x623   :  { %v747_v45 = vpop.permute.xlu0 %746 }
 0x624   :  { %5273 = vmatprep.subr.bf16.mxu0 %v747_v45 }
 0x625   :  { %5274 = vmatpush3.bf16.msra.mxu0 %v747_v45 }
 0x627   :  { %v749_v50 = vpop.permute.xlu0 %748 }
 0x628   :  { %5725 = vmatprep.subr.msk.bf16.mxu0 %vm757_vm6, %v749_v50  ;;  %v759_v51 = vsel %vm757_vm6, %v749_v50, 0 }
 0x629   :  { %5276 = vmatpush3.bf16.msra.mxu0 %v759_v51 }
 0x62b   :  { %v812_v43 = vpop.permute.xlu0 %811 }
 0x62c   :  { %5281 = vmatprep.subr.bf16.mxu0 %v812_v43 }
 0x646   :  { %v724_v55 = vpop.xlane.xlu1 %723 }
 0x64a   :  { %v883_v56 = vpop.permute.xlu1 %882 }
 0x64b   :  { %5727 = vmatprep.subr.msk.bf16.mxu1 %vm546_vm3, %v883_v56  ;;  %v893_v57 = vsel %vm546_vm3, %v883_v56, 0 }
 0x64c   :  { %5290 = vmatpush3.bf16.xpose.msra.mxu1 %v893_v57 }
 0x665   :  { %v718_v58 = vpop.xlane.xlu0 %717 }
 0x666   :  { %5846 = vrcp.f32 %v718_v58 }
 0x669   :  { %v712_v60 = vpop.xlane.xlu0 %711 }
 0x66a   :  { %5848 = vrcp.f32 %v712_v60 }
 0x66d   :  { %v715_v63 = vpop.xlane.xlu0 %714 }
 0x66e   :  { %5850 = vrcp.f32 %v715_v63 }
 0x670   :  { %v5847_v15 = vpop.eup %5846 }
 0x671   :  { %v727_v9 = vpop.xlane.xlu0 %726  ;;  %v736_v3 = vmul.f32 %v5847_v15, %v5837_v14 }
 0x672   :  { %5852 = vrcp.f32 %v727_v9 }
 0x673   :  { %5854 = vrcp.f32 %v724_v55  ;;  %v741_v17 = vpack.c.bf16 %v736_v3, %v736_v3 }
 0x674   :  { %v5849_v27 = vpop.eup %5848 }
 0x675   :  { %v721_v32 = vpop.xlane.xlu0 %720  ;;  %v734_v11 = vmul.f32 %v5849_v27, %v5839_v31 }
 0x676   :  { %5856 = vrcp.f32 %v721_v32 }
 0x678   :  { %v5851_v38 = vpop.eup %5850 }
 0x679   :  { %v814_v4 = vpop.permute.xlu0 %813  ;;  %v735_v12 = vmul.f32 %v5851_v38, %v5841_v36 }
 0x67a   :  { %v823_v36 = vsel %vm757_vm6, %v814_v4, 0 }
 0x67b   :  { %v740_v16 = vpack.c.bf16 %v735_v12, %v734_v11 }
 0x67c   :  { %v5853_v19 = vpop.eup %5852 }
 0x67d   :  { %5277 = vmatprep.mubr.msk.bf16.mxu0 %vm673_vm5, %v740_v16  ;;  %v885_v6 = vpop.permute.xlu0 %884  ;;  %v5855_v22 = vpop.eup %5854  ;;  %v739_v14 = vmul.f32 %v5853_v19, %v5843_v41 }
 0x67e   :  { %5278 = vmatmul.mubr.msk.bf16.vlgmr.msra.gmra.mrb[16].mxu0 %vm673_vm5, %v741_v17  ;;  %5728 = vmatprep.subr.msk.bf16.mxu1 %vm546_vm3, %v885_v6  ;;  %v896_v21 = vsel %vm546_vm3, %v885_v6, 0  ;;  %v738_v29 = vmul.f32 %v5855_v22, %v6794_v62  ;;  %v955_v62 = vpop.permute.xlu1 %954 }
 0x67f   :  { %5282 = vmatpush3.bf16.msra.mxu0 %v812_v43  ;;  %5292 = vmatpush3.bf16.xpose.msra.mxu1 %v896_v21  ;;  %v743_v37 = vpack.c.bf16 %v739_v14, %v739_v14  ;;  %v966_v45 = vsel %vm546_vm3, %v955_v62, 0 }
 0x680   :  { %v5857_v18 = vpop.eup %5856  ;;  %5726 = vmatprep.subr.msk.bf16.mxu0 %vm757_vm6, %v814_v4 }
 0x681   :  { %v953_v28 = vpop.permute.xlu0 %952  ;;  %v737_v31 = vmul.f32 %v5857_v18, %v5845_v42 }
 0x682   :  { %v963_v41 = vsel %vm546_vm3, %v953_v28, 0  ;;  %v951_v50 = vpop.permute.xlu1 %950 }
 0x683   :  { %5284 = vmatpush3.bf16.msra.mxu0 %v823_v36  ;;  %v742_v40 = vpack.c.bf16 %v738_v29, %v737_v31 }
 0x684   :  { %5729 = vmatprep.subr.msk.bf16.mxu0 %vm546_vm3, %v953_v28 }
 0x685   :  { %5285 = vmatprep.mubr.msk.bf16.mxu0 %vm673_vm5, %v742_v40  ;;  %v879_v44 = vpop.permute.xlu0 %878 }
 0x686   :  { %5286 = vmatmul.mubr.msk.bf16.vlgmr.msra.gmra.mrb[20].mxu0 %vm673_vm5, %v743_v37  ;;  %5293 = vmatprep.mubr.msk.bf16.mxu1 %vm546_vm3, %v879_v44 }
 0x689   :  { %v881_v39 = vpop.permute.xlu0 %880 }
 0x68a   :  { %5294 = vmatmul.mubr.msk.bf16.vlgmr.msra.gmra.mrb[16].mxu1 %vm546_vm3, %v881_v39 }
 0x68c   :  { %5298 = vmatpush3.bf16.xpose.msra.mxu0 %v963_v41 }
 0x68d   :  { %5730 = vmatprep.subr.msk.bf16.mxu0 %vm546_vm3, %v955_v62  ;;  %v949_v42 = vpop.permute.xlu0 %948 }
 0x68e   :  { %5301 = vmatprep.mubr.msk.bf16.mxu0 %vm546_vm3, %v949_v42 }
 0x694   :  { %5300 = vmatpush3.bf16.xpose.msra.mxu0 %v966_v45 }
 0x69b   :  { %5302 = vmatmul.mubr.msk.bf16.vlgmr.msra.gmra.mrb[24].mxu0 %vm546_vm3, %v951_v50 }
 0x751   :  { %v6847_v51 = vpop.f32.mrb[16].mxu0 }
 0x752   :  { %v6849_v43 = vpop.f32.mrb[17].mxu0 }
 0x753   :  { %v5280_v55 = vpop.f32.mrb[18].mxu0 }
 0x754   :  { %v6851_v56 = vpop.f32.mrb[19].mxu0 }
 0x755   :  { %v873_v57 = vpack.c.bf16 %v6851_v56, %v6849_v43 }
 0x759   :  { %v6855_v58 = vpop.f32.mrb[20].mxu0 }
 0x75a   :  { %v6857_v60 = vpop.f32.mrb[21].mxu0 }
 0x75b   :  { %v874_v63 = vpack.c.bf16 %v6857_v60, %v6847_v51  ;;  %v5288_v9 = vpop.f32.mrb[22].mxu0 }
 0x75c   :  { %v6861_v15 = vpop.f32.mrb[23].mxu0 }
 0x75d   :  { %v875_v32 = vpack.c.bf16 %v6855_v58, %v6861_v15  ;;  %v5295_v27 = vpop.f32.mrb[16].mxu1 }
 0x75e   :  { %v932_v38 = vpop.f32.mrb[17].mxu1  ;;  %v941_v12 = vadd.f32 %v5295_v27, %v6760_v59 }
 0x75f   :  { %v933_v3 = vadd.f32 %v932_v38, %v6760_v59  ;;  %v5296_v4 = vpop.f32.mrb[18].mxu1 }
 0x760   :  { %v935_v11 = vpop.f32.mrb[19].mxu1  ;;  %v1022_v6 = vsel %vm673_vm5, %v941_v12, -inf }
 0x761   :  { %v936_v16 = vadd.f32 %v935_v11, %v6760_v59  ;;  %v1016_v17 = vsel %vm673_vm5, %v933_v3, -inf }
 0x762   :  { %1017 = vmax.xlane.f32.xlu0 %v1016_v17 }
 0x763   :  { %v1019_v19 = vsel %vm673_vm5, %v936_v16, -inf }
 0x764   :  { %1020 = vmax.xlane.f32.xlu1 %v1019_v19 }
 0x766   :  { %1023 = vmax.xlane.f32.xlu0 %v1022_v6 }
 0x76e   :  { %v5303_v22 = vpop.f32.mrb[24].mxu0 }
 0x76f   :  { %v1002_v21 = vpop.f32.mrb[25].mxu0  ;;  %v1011_v31 = vadd.f32 %v5303_v22, %v6760_v59 }
 0x770   :  { %v1003_v18 = vadd.f32 %v1002_v21, %v6760_v59  ;;  %v5304_v14 = vpop.f32.mrb[26].mxu0 }
 0x771   :  { %v1005_v28 = vpop.f32.mrb[27].mxu0  ;;  %v1031_v37 = vsel %vm673_vm5, %v1011_v31, -inf }
 0x772   :  { %v1006_v29 = vadd.f32 %v1005_v28, %v6760_v59  ;;  %v1025_v36 = vsel %vm673_vm5, %v1003_v18, -inf }
 0x773   :  { %1026 = vmax.xlane.f32.xlu0 %v1025_v36 }
 0x774   :  { %v1028_v40 = vsel %vm673_vm5, %v1006_v29, -inf }
 0x775   :  { %1029 = vmax.xlane.f32.xlu1 %v1028_v40 }
 0x777   :  { %1032 = vmax.xlane.f32.xlu0 %v1031_v37 }
 0x7ef   :  { %v1018_v44 = vpop.xlane.xlu0 %1017 }
 0x7f0   :  { %v1034_v39 = vsub.f32 %v933_v3, %v1018_v44 }
 0x7f1   :  { %v1021_v41 = vpop.xlane.xlu1 %1020 }
 0x7f2   :  { %v1040_v62 = vmul.f32 1.442695, %v1034_v39  ;;  %v1035_v42 = vsub.f32 %v936_v16, %v1021_v41 }
 0x7f3   :  { %v1024_v45 = vpop.xlane.xlu0 %1023 }
 0x7f4   :  { %5858 = vpow2.f32 %v1040_v62  ;;  %v1042_v50 = vmul.f32 1.442695, %v1035_v42  ;;  %v1036_v55 = vsub.f32 %v941_v12, %v1024_v45 }
 0x7f6   :  { %5860 = vpow2.f32 %v1042_v50  ;;  %v1044_v9 = vmul.f32 1.442695, %v1036_v55 }
 0x7f8   :  { %5862 = vpow2.f32 %v1044_v9 }
 0x7fe   :  { %v5859_v27 = vpop.eup %5858 }
 0x7ff   :  { %v1052_v38 = vsel %vm673_vm5, %v5859_v27, 0.0 }
 0x800   :  { %v5861_v4 = vpop.eup %5860  ;;  %v1027_v11 = vpop.xlane.xlu0 %1026  ;;  %1053 = vadd.xlane.f32.xlu1 %v1052_v38 }
 0x801   :  { %v1055_v17 = vsel %vm673_vm5, %v5861_v4, 0.0  ;;  %v1037_v3 = vsub.f32 %v1003_v18, %v1027_v11 }
 0x802   :  { %v5863_v19 = vpop.eup %5862  ;;  %1056 = vadd.xlane.f32.xlu0 %v1055_v17 }
 0x803   :  { %v1058_v16 = vsel %vm673_vm5, %v5863_v19, 0.0  ;;  %v1046_v12 = vmul.f32 1.442695, %v1037_v3 }
 0x804   :  { %v1033_v6 = vpop.xlane.xlu0 %1032  ;;  %1059 = vadd.xlane.f32.xlu1 %v1058_v16 }
 0x805   :  { %v1039_v22 = vsub.f32 %v1011_v31, %v1033_v6  ;;  %v1030_v31 = vpop.xlane.xlu1 %1029 }
 0x806   :  { %v1038_v40 = vsub.f32 %v1006_v29, %v1030_v31 }
 0x807   :  { %v1050_v21 = vmul.f32 1.442695, %v1039_v22 }
 0x808   :  { %v1048_v37 = vmul.f32 1.442695, %v1038_v40 }
 0x809   :  { %5864 = vpow2.f32 %v1050_v21 }
 0x80a   :  { %5866 = vpow2.f32 %v1046_v12  ;;  %v525_v12 = vld [vmem:[#allocation10 + $0x4] sm:$0xf] }
 0x80b   :  { %5868 = vpow2.f32 %v1048_v37 }
 0x813   :  { %v6880_v14 = vpop.eup %5864 }
 0x814   :  { %v1067_v28 = vsel %vm673_vm5, %v6880_v14, 0.0  ;;  %v6884_v36 = vpop.eup %5866 }
 0x815   :  { %1068 = vadd.xlane.f32.xlu0 %v1067_v28  ;;  %1086 = vrot.lane.b32.xlu1 %v6783_v48, %s6367_s4  ;;  %v1061_v18 = vsel %vm673_vm5, %v6884_v36, 0.0  ;;  %v5869_v44 = vpop.eup %5868 }
 0x816   :  { %v1064_v39 = vsel %vm673_vm5, %v5869_v44, 0.0 }
 0x819   :  { %1062 = vadd.xlane.f32.xlu0 %v1061_v18  ;;  %1148 = vrot.lane.b32.xlu1 %v6786_v1, %s6367_s4 }
 0x82f   :  { %1088 = vrot.lane.b32.xlu0 %v6790_v2, %s6367_s4 }
 0x833   :  { %1355 = vrot.lane.b32.xlu0 %v6703_v24, %s6368_s19 }
 0x837   :  { %1423 = vrot.lane.b32.xlu0 %v6729_v47, %s6368_s19 }
 0x83b   :  { %1353 = vrot.lane.b32.xlu0 %v6747_v61, %s6369_s15 }
 0x83d   :  { %1065 = vadd.xlane.f32.xlu1 %v1064_v39 }
 0x83f   :  { %1419 = vrot.lane.b32.xlu0 %v6733_v52, %s6369_s15 }
 0x84e   :  { %1150 = vrot.lane.b32.xlu1 %v6812_v49, %s6367_s4 }
 0x852   :  { %1357 = vrot.lane.b32.xlu1 %v6717_v35, %s6368_s19 }
 0x856   :  { %1351 = vrot.lane.b32.xlu1 %v6705_v26, %s6369_s15 }
 0x85a   :  { %1425 = vrot.lane.b32.xlu1 %v6735_v54, %s6368_s19 }
 0x85e   :  { %1421 = vrot.lane.b32.xlu1 %v6755_v53, %s6369_s15 }
 0x88d   :  { %v1054_v29 = vpop.xlane.xlu1 %1053 }
 0x88e   :  { %5870 = vrcp.f32 %v1054_v29 }
 0x88f   :  { %v1057_v41 = vpop.xlane.xlu0 %1056 }
 0x890   :  { %5872 = vrcp.f32 %v1057_v41 }
 0x891   :  { %v1060_v62 = vpop.xlane.xlu1 %1059 }
 0x892   :  { %5874 = vrcp.f32 %v1060_v62 }
 0x895   :  { %v1087_v42 = vpop.permute.xlu1 %1086 }
 0x896   :  { %5305 = vmatprep.subr.bf16.mxu1 %v1087_v42 }
 0x897   :  { %5306 = vmatpush3.bf16.msra.mxu1 %v1087_v42  ;;  %v524_v42 = vld [vmem:[#allocation10] sm:$0xf] }
 0x898   :  { %v5871_v45 = vpop.eup %5870 }
 0x899   :  { %v1149_v50 = vpop.permute.xlu1 %1148  ;;  %v1076_v9 = vmul.f32 %v5871_v45, %v5859_v27  ;;  %v1223_v27 = vsel %vm757_vm6, %v525_v12, 0 }
 0x89a   :  { %v5873_v55 = vpop.eup %5872  ;;  %5313 = vmatprep.subr.bf16.mxu0 %v1149_v50 }
 0x89b   :  { %5314 = vmatpush3.bf16.msra.mxu0 %v1149_v50  ;;  %v1077_v38 = vmul.f32 %v5873_v55, %v5861_v4 }
 0x89c   :  { %v5875_v3 = vpop.eup %5874 }
 0x89d   :  { %v1082_v11 = vpack.c.bf16 %v1077_v38, %v1076_v9  ;;  %v1078_v6 = vmul.f32 %v5875_v3, %v5863_v19  ;;  %v1292_v9 = vsel %vm757_vm6, %v524_v42, 0 }
 0x89f   :  { %5309 = vmatprep.mubr.msk.bf16.mxu1 %vm673_vm5, %v1082_v11  ;;  %v1083_v28 = vpack.c.bf16 %v1078_v6, %v1078_v6 }
 0x8a2   :  { %v1069_v17 = vpop.xlane.xlu0 %1068 }
 0x8a3   :  { %5876 = vrcp.f32 %v1069_v17 }
 0x8a6   :  { %v1063_v16 = vpop.xlane.xlu0 %1062 }
 0x8a7   :  { %5878 = vrcp.f32 %v1063_v16 }
 0x8aa   :  { %v1089_v22 = vpop.permute.xlu0 %1088 }
 0x8ab   :  { %5731 = vmatprep.subr.msk.bf16.mxu1 %vm757_vm6, %v1089_v22  ;;  %v1098_v21 = vsel %vm757_vm6, %v1089_v22, 0 }
 0x8ac   :  { %5308 = vmatpush3.bf16.msra.mxu1 %v1098_v21 }
 0x8ad   :  { %5321 = vmatprep.subr.bf16.mxu1 %v6360_v0  ;;  %v5877_v40 = vpop.eup %5876 }
 0x8ae   :  { %v1356_v4 = vpop.permute.xlu0 %1355  ;;  %v1081_v29 = vmul.f32 %v5877_v40, %v6880_v14 }
 0x8af   :  { %5310 = vmatmul.mubr.msk.bf16.vlgmr.msra.gmra.mrb[20].mxu1 %vm673_vm5, %v1083_v28  ;;  %v1366_v16 = vsel %vm546_vm3, %v1356_v4, 0 }
 0x8b0   :  { %5322 = vmatpush3.bf16.msra.mxu1 %v1223_v27  ;;  %5323 = vmatprep.mubr.msk.bf16.mxu1 %vm6361_vm0, %v6360_v0  ;;  %v1085_v55 = vpack.c.bf16 %v1081_v29, %v1081_v29 }
 0x8b1   :  { %5733 = vmatprep.subr.msk.bf16.mxu1 %vm546_vm3, %v1356_v4  ;;  %v5879_v37 = vpop.eup %5878 }
 0x8b2   :  { %v1079_v41 = vmul.f32 %v5879_v37, %v6884_v36  ;;  %v1424_v38 = vpop.permute.xlu0 %1423 }
 0x8b3   :  { %v1434_v36 = vsel %vm546_vm3, %v1424_v38, 0 }
 0x8b6   :  { %v1354_v43 = vpop.permute.xlu0 %1353 }
 0x8ba   :  { %v1420_v56 = vpop.permute.xlu0 %1419 }
 0x8ca   :  { %v1066_v19 = vpop.xlane.xlu1 %1065 }
 0x8cb   :  { %5880 = vrcp.f32 %v1066_v19 }
 0x8ce   :  { %v1151_v18 = vpop.permute.xlu1 %1150 }
 0x8cf   :  { %5732 = vmatprep.subr.msk.bf16.mxu0 %vm757_vm6, %v1151_v18  ;;  %v1160_v31 = vsel %vm757_vm6, %v1151_v18, 0 }
 0x8d0   :  { %5316 = vmatpush3.bf16.msra.mxu0 %v1160_v31 }
 0x8d1   :  { %5335 = vmatprep.subr.bf16.mxu0 %v6360_v0 }
 0x8d2   :  { %v1358_v50 = vpop.permute.xlu1 %1357 }
 0x8d3   :  { %v1369_v58 = vsel %vm546_vm3, %v1358_v50, 0 }
 0x8d5   :  { %v5881_v39 = vpop.eup %5880 }
 0x8d6   :  { %v1080_v62 = vmul.f32 %v5881_v39, %v5869_v44  ;;  %v1352_v14 = vpop.permute.xlu1 %1351 }
 0x8d8   :  { %v1084_v45 = vpack.c.bf16 %v1080_v62, %v1079_v41 }
 0x8da   :  { %5317 = vmatprep.mubr.msk.bf16.mxu0 %vm673_vm5, %v1084_v45  ;;  %v1426_v44 = vpop.permute.xlu1 %1425 }
 0x8db   :  { %5318 = vmatmul.mubr.msk.bf16.vlgmr.msra.gmra.mrb[28].mxu0 %vm673_vm5, %v1085_v55  ;;  %v1437_v11 = vsel %vm546_vm3, %v1426_v44, 0 }
 0x8dc   :  { %5336 = vmatpush3.bf16.msra.mxu0 %v1292_v9  ;;  %5337 = vmatprep.mubr.msk.bf16.mxu0 %vm6361_vm0, %v6360_v0 }
 0x8dd   :  { %5735 = vmatprep.subr.msk.bf16.mxu0 %vm546_vm3, %v1424_v38 }
 0x8e3   :  { %5338 = vmatmul.mubr.msk.bf16.vlgmr.msra.gmra.mrb[32].mxu0 %vm546_vm3, %v873_v57  ;;  %v1422_v57 = vpop.permute.xlu1 %1421 }
 0x8e4   :  { %5341 = vmatprep.mubr.msk.bf16.mxu0 %vm6361_vm0, %v6360_v0 }
 0x8e5   :  { %5358 = vmatpush3.bf16.xpose.msra.mxu0 %v1434_v36 }
 0x8e6   :  { %5736 = vmatprep.subr.msk.bf16.mxu0 %vm546_vm3, %v1426_v44 }
 0x8eb   :  { %5342 = vmatmul.mubr.msk.bf16.gmra.mrb[36].mxu0 %vm546_vm3, %v874_v63 }
 0x8ec   :  { %5345 = vmatprep.mubr.msk.bf16.mxu0 %vm6361_vm0, %v6360_v0 }
 0x8ed   :  { %5360 = vmatpush3.bf16.xpose.msra.mxu0 %v1437_v11 }
 0x8f3   :  { %5346 = vmatmul.mubr.msk.bf16.gmra.mrb[40].mxu0 %vm546_vm3, %v875_v32 }
 0x8f4   :  { %5361 = vmatprep.mubr.msk.bf16.mxu0 %vm546_vm3, %v1420_v56 }
 0x8fb   :  { %5362 = vmatmul.mubr.msk.bf16.vlgmr.msra.gmra.mrb[44].mxu0 %vm546_vm3, %v1422_v57 }
 0x982   :  { %v5311_v51 = vpop.f32.mrb[20].mxu1 }
 0x983   :  { %v1134_v60 = vpop.f32.mrb[21].mxu1 }
 0x984   :  { %v5312_v63 = vpop.f32.mrb[22].mxu1 }
 0x985   :  { %v1137_v17 = vpop.f32.mrb[23].mxu1 }
 0x986   :  { %v1210_v3 = vpack.c.bf16 %v1137_v17, %v1134_v60 }
 0x988   :  { %5324 = vmatmul.mubr.msk.bf16.vlgmr.msra.gmra.mrb[24].mxu1 %vm546_vm3, %v1210_v3 }
 0x989   :  { %5350 = vmatpush3.bf16.xpose.msra.mxu1 %v1366_v16  ;;  %5327 = vmatprep.mubr.msk.bf16.mxu1 %vm6361_vm0, %v6360_v0 }
 0x98a   :  { %5734 = vmatprep.subr.msk.bf16.mxu1 %vm546_vm3, %v1358_v50 }
 0x991   :  { %5352 = vmatpush3.bf16.xpose.msra.mxu1 %v1369_v58 }
 0x9ae   :  { %v5319_v15 = vpop.f32.mrb[28].mxu0 }
 0x9af   :  { %v1196_v32 = vpop.f32.mrb[29].mxu0 }
 0x9b0   :  { %v1211_v6 = vpack.c.bf16 %v1196_v32, %v5311_v51  ;;  %v5320_v22 = vpop.f32.mrb[30].mxu0 }
 0x9b1   :  { %v1199_v12 = vpop.f32.mrb[31].mxu0 }
 0x9b2   :  { %v1212_v21 = vpack.c.bf16 %v5319_v15, %v1199_v12  ;;  %5328 = vmatmul.mubr.msk.bf16.gmra.mrb[28].mxu1 %vm546_vm3, %v1211_v6 }
 0x9b3   :  { %5331 = vmatprep.mubr.msk.bf16.mxu1 %vm6361_vm0, %v6360_v0 }
 0x9b6   :  { %v1328_v28 = vpop.f32.mrb[32].mxu0 }
 0x9b7   :  { %v5339_v27 = vpop.f32.mrb[33].mxu0 }
 0x9b8   :  { %v1331_v4 = vpop.f32.mrb[34].mxu0 }
 0x9b9   :  { %v5340_v19 = vpop.f32.mrb[35].mxu0 }
 0x9ba   :  { %5332 = vmatmul.mubr.msk.bf16.gmra.mrb[32].mxu1 %vm546_vm3, %v1212_v21 }
 0x9bb   :  { %5353 = vmatprep.mubr.msk.bf16.mxu1 %vm546_vm3, %v1352_v14 }
 0x9be   :  { %v1336_v18 = vpop.f32.mrb[36].mxu0 }
 0x9bf   :  { %v5343_v31 = vpop.f32.mrb[37].mxu0 }
 0x9c0   :  { %v1339_v40 = vpop.f32.mrb[38].mxu0 }
 0x9c1   :  { %v5344_v37 = vpop.f32.mrb[39].mxu0 }
 0x9c2   :  { %5354 = vmatmul.mubr.msk.bf16.vlgmr.msra.gmra.mrb[36].mxu1 %vm546_vm3, %v1354_v43 }
 0x9c6   :  { %v1344_v39 = vpop.f32.mrb[40].mxu0 }
 0x9c7   :  { %v5347_v29 = vpop.f32.mrb[41].mxu0 }
 0x9c8   :  { %v1347_v41 = vpop.f32.mrb[42].mxu0 }
 0x9c9   :  { %v5348_v62 = vpop.f32.mrb[43].mxu0 }
 0x9ce   :  { %v5363_v42 = vpop.f32.mrb[44].mxu0 }
 0x9cf   :  { %v1473_v45 = vpop.f32.mrb[45].mxu0  ;;  %v1482_v29 = vadd.f32 %v5363_v42, %v6760_v59 }
 0x9d0   :  { %v5364_v50 = vpop.f32.mrb[46].mxu0 }
 0x9d1   :  { %v1476_v55 = vpop.f32.mrb[47].mxu0  ;;  %v1502_v62 = vsel %vm673_vm5, %v1482_v29, -inf }
 0xa5b   :  { %v1259_v9 = vpop.f32.mrb[24].mxu1 }
 0xa5c   :  { %v6966_v38 = vadd.f32 %v1328_v28, %v1259_v9  ;;  %v5325_v36 = vpop.f32.mrb[25].mxu1 }
 0xa5d   :  { %v1262_v44 = vpop.f32.mrb[26].mxu1 }
 0xa5e   :  { %v6968_v14 = vadd.f32 %v1331_v4, %v1262_v44  ;;  %v5326_v11 = vpop.f32.mrb[27].mxu1 }
 0xa85   :  { %v1267_v56 = vpop.f32.mrb[28].mxu1 }
 0xa86   :  { %v6970_v57 = vadd.f32 %v1336_v18, %v1267_v56  ;;  %v5329_v43 = vpop.f32.mrb[29].mxu1  ;;  %v1477_v18 = vadd.f32 %v1476_v55, %v6760_v59 }
 0xa87   :  { %v1270_v51 = vpop.f32.mrb[30].mxu1 }
 0xa88   :  { %v6972_v60 = vadd.f32 %v1339_v40, %v1270_v51  ;;  %v5330_v63 = vpop.f32.mrb[31].mxu1  ;;  %v1474_v40 = vadd.f32 %v1473_v45, %v6760_v59 }
 0xa8d   :  { %v1275_v17 = vpop.f32.mrb[32].mxu1 }
 0xa8e   :  { %v6974_v3 = vadd.f32 %v1344_v39, %v1275_v17  ;;  %v5333_v16 = vpop.f32.mrb[33].mxu1  ;;  %v1499_v39 = vsel %vm673_vm5, %v1477_v18, -inf }
 0xa8f   :  { %v1278_v58 = vpop.f32.mrb[34].mxu1 }
 0xa90   :  { %v6976_v15 = vadd.f32 %v1347_v41, %v1278_v58  ;;  %v5334_v32 = vpop.f32.mrb[35].mxu1  ;;  %v1496_v41 = vsel %vm673_vm5, %v1474_v40, -inf }
 0xa95   :  { %v5355_v6 = vpop.f32.mrb[36].mxu1 }
 0xa96   :  { %v1405_v22 = vpop.f32.mrb[37].mxu1  ;;  %v1414_v27 = vadd.f32 %v5355_v6, %v6760_v59 }
 0xa97   :  { %v1406_v12 = vadd.f32 %v1405_v22, %v6760_v59  ;;  %v5356_v21 = vpop.f32.mrb[38].mxu1 }
 0xa98   :  { %v1408_v28 = vpop.f32.mrb[39].mxu1  ;;  %v1493_v37 = vsel %vm673_vm5, %v1414_v27, -inf }
 0xa99   :  { %v1409_v4 = vadd.f32 %v1408_v28, %v6760_v59  ;;  %v1487_v19 = vsel %vm673_vm5, %v1406_v12, -inf }
 0xa9a   :  { %1488 = vmax.xlane.f32.xlu0 %v1487_v19 }
 0xa9b   :  { %v1490_v31 = vsel %vm673_vm5, %v1409_v4, -inf }
 0xa9c   :  { %1491 = vmax.xlane.f32.xlu1 %v1490_v31 }
 0xa9e   :  { %1494 = vmax.xlane.f32.xlu0 %v1493_v37 }
 0xaa0   :  { %1500 = vmax.xlane.f32.xlu1 %v1499_v39 }
 0xaa2   :  { %1497 = vmax.xlane.f32.xlu0 %v1496_v41 }
 0xaa6   :  { %1503 = vmax.xlane.f32.xlu0 %v1502_v62 }
 0xb27   :  { %v1489_v50 = vpop.xlane.xlu0 %1488 }
 0xb28   :  { %v1505_v31 = vsub.f32 %v1406_v12, %v1489_v50 }
 0xb29   :  { %v1492_v55 = vpop.xlane.xlu1 %1491 }
 0xb2a   :  { %v1506_v43 = vsub.f32 %v1409_v4, %v1492_v55  ;;  %v1511_v37 = vmul.f32 1.442695, %v1505_v31 }
 0xb2b   :  { %v1495_v9 = vpop.xlane.xlu0 %1494 }
 0xb2c   :  { %v1513_v17 = vmul.f32 1.442695, %v1506_v43 }
 0xb2d   :  { %v1501_v36 = vpop.xlane.xlu1 %1500 }
 0xb2e   :  { %v1509_v44 = vsub.f32 %v1477_v18, %v1501_v36  ;;  %v1507_v18 = vsub.f32 %v1414_v27, %v1495_v9 }
 0xb2f   :  { %v1498_v45 = vpop.xlane.xlu0 %1497 }
 0xb30   :  { %v1519_v11 = vmul.f32 1.442695, %v1509_v44  ;;  %v1508_v56 = vsub.f32 %v1474_v40, %v1498_v45  ;;  %v1515_v40 = vmul.f32 1.442695, %v1507_v18 }
 0xb32   :  { %5882 = vpow2.f32 %v1519_v11  ;;  %v1517_v51 = vmul.f32 1.442695, %v1508_v56 }
 0xb33   :  { %v1504_v63 = vpop.xlane.xlu0 %1503 }
 0xb34   :  { %5884 = vpow2.f32 %v1517_v51  ;;  %v1510_v42 = vsub.f32 %v1482_v29, %v1504_v63 }
 0xb36   :  { %v1521_v16 = vmul.f32 1.442695, %v1510_v42 }
 0xb38   :  { %5886 = vpow2.f32 %v1521_v16 }
 0xb39   :  { %5888 = vpow2.f32 %v1513_v17 }
 0xb3a   :  { %5890 = vpow2.f32 %v1515_v40 }
 0xb3b   :  { %5892 = vpow2.f32 %v1511_v37 }
 0xb3c   :  { %v5883_v58 = vpop.eup %5882 }
 0xb3d   :  { %v1535_v32 = vsel %vm673_vm5, %v5883_v58, 0.0 }
 0xb3e   :  { %v5885_v6 = vpop.eup %5884  ;;  %1536 = vadd.xlane.f32.xlu1 %v1535_v32 }
 0xb3f   :  { %v1532_v22 = vsel %vm673_vm5, %v5885_v6, 0.0 }
 0xb40   :  { %1533 = vadd.xlane.f32.xlu0 %v1532_v22 }
 0xb42   :  { %v6992_v21 = vpop.eup %5886 }
 0xb43   :  { %v1538_v28 = vsel %vm673_vm5, %v6992_v21, 0.0  ;;  %v6996_v4 = vpop.eup %5888 }
 0xb44   :  { %1539 = vadd.xlane.f32.xlu0 %v1538_v28  ;;  %v1526_v19 = vsel %vm673_vm5, %v6996_v4, 0.0  ;;  %v5891_v27 = vpop.eup %5890  ;;  %v526_v28 = vld [vmem:[#allocation10 + $0x8] sm:$0xf] }
 0xb45   :  { %v1529_v12 = vsel %vm673_vm5, %v5891_v27, 0.0  ;;  %v5893_v39 = vpop.eup %5892  ;;  %v1694_v18 = vsel %vm757_vm6, %v526_v28, 0 }
 0xb48   :  { %1527 = vadd.xlane.f32.xlu0 %v1526_v19 }
 0xb4f   :  { %1557 = vrot.lane.b32.xlu1 %v6783_v48, %s6370_s30 }
 0xb5e   :  { %1559 = vrot.lane.b32.xlu0 %v6790_v2, %s6370_s30 }
 0xb62   :  { %1763 = vrot.lane.b32.xlu0 %v6703_v24, %s6371_s3  ;;  %v1523_v24 = vsel %vm673_vm5, %v5893_v39, 0.0 }
 0xb66   :  { %1831 = vrot.lane.b32.xlu0 %v6729_v47, %s6371_s3 }
 0xb6a   :  { %1761 = vrot.lane.b32.xlu0 %v6747_v61, %s6372_s16 }
 0xb6e   :  { %1827 = vrot.lane.b32.xlu0 %v6733_v52, %s6372_s16 }
 0xb73   :  { %1530 = vadd.xlane.f32.xlu1 %v1529_v12 }
 0xb77   :  { %1524 = vadd.xlane.f32.xlu1 %v1523_v24 }
 0xb88   :  { %1619 = vrot.lane.b32.xlu1 %v6786_v1, %s6370_s30 }
 0xb8c   :  { %1621 = vrot.lane.b32.xlu1 %v6812_v49, %s6370_s30 }
 0xb90   :  { %1765 = vrot.lane.b32.xlu1 %v6717_v35, %s6371_s3 }
 0xb94   :  { %1759 = vrot.lane.b32.xlu1 %v6705_v26, %s6372_s16 }
 0xb98   :  { %1833 = vrot.lane.b32.xlu1 %v6735_v54, %s6371_s3 }
 0xb9c   :  { %1829 = vrot.lane.b32.xlu1 %v6755_v53, %s6372_s16 }
 0xbcb   :  { %v1537_v47 = vpop.xlane.xlu1 %1536 }
 0xbcc   :  { %5894 = vrcp.f32 %v1537_v47 }
 0xbcd   :  { %v1534_v52 = vpop.xlane.xlu0 %1533 }
 0xbce   :  { %5896 = vrcp.f32 %v1534_v52 }
 0xbcf   :  { %v1558_v61 = vpop.permute.xlu1 %1557 }
 0xbd0   :  { %5365 = vmatprep.subr.bf16.mxu1 %v1558_v61 }
 0xbd1   :  { %5366 = vmatpush3.bf16.msra.mxu1 %v1558_v61  ;;  %v1540_v29 = vpop.xlane.xlu0 %1539 }
 0xbd2   :  { %5898 = vrcp.f32 %v1540_v29 }
 0xbd5   :  { %v1528_v41 = vpop.xlane.xlu0 %1527 }
 0xbd6   :  { %v5895_v62 = vpop.eup %5894 }
 0xbd7   :  { %v1551_v26 = vmul.f32 %v5895_v62, %v5883_v58 }
 0xbd8   :  { %v5897_v35 = vpop.eup %5896 }
 0xbd9   :  { %v1560_v50 = vpop.permute.xlu0 %1559  ;;  %v1550_v55 = vmul.f32 %v5897_v35, %v5885_v6 }
 0xbda   :  { %5737 = vmatprep.subr.msk.bf16.mxu1 %vm757_vm6, %v1560_v50  ;;  %v1569_v54 = vsel %vm757_vm6, %v1560_v50, 0 }
 0xbdb   :  { %5368 = vmatpush3.bf16.msra.mxu1 %v1569_v54  ;;  %v1555_v53 = vpack.c.bf16 %v1551_v26, %v1550_v55 }
 0xbdc   :  { %5381 = vmatprep.subr.bf16.mxu1 %v6360_v0  ;;  %v5899_v44 = vpop.eup %5898 }
 0xbdd   :  { %5377 = vmatprep.mubr.msk.bf16.mxu0 %vm673_vm5, %v1555_v53  ;;  %v1552_v11 = vmul.f32 %v5899_v44, %v6992_v21  ;;  %v1764_v42 = vpop.permute.xlu0 %1763 }
 0xbde   :  { %v1774_v37 = vsel %vm546_vm3, %v1764_v42, 0 }
 0xbdf   :  { %v1556_v16 = vpack.c.bf16 %v1552_v11, %v1552_v11 }
 0xbe1   :  { %v1832_v40 = vpop.permute.xlu0 %1831 }
 0xbe2   :  { %v1842_v55 = vsel %vm546_vm3, %v1832_v40, 0 }
 0xc00   :  { %v1531_v9 = vpop.xlane.xlu1 %1530 }
 0xc01   :  { %5900 = vrcp.f32 %v1531_v9 }
 0xc02   :  { %5902 = vrcp.f32 %v1528_v41 }
 0xc04   :  { %v1525_v36 = vpop.xlane.xlu1 %1524 }
 0xc05   :  { %5904 = vrcp.f32 %v1525_v36 }
 0xc08   :  { %v1620_v45 = vpop.permute.xlu1 %1619 }
 0xc09   :  { %5373 = vmatprep.subr.bf16.mxu0 %v1620_v45 }
 0xc0a   :  { %5374 = vmatpush3.bf16.msra.mxu0 %v1620_v45 }
 0xc0b   :  { %v5901_v56 = vpop.eup %5900 }
 0xc0c   :  { %v1622_v43 = vpop.permute.xlu1 %1621  ;;  %v5903_v51 = vpop.eup %5902  ;;  %v1549_v58 = vmul.f32 %v5901_v56, %v5891_v27 }
 0xc0d   :  { %5738 = vmatprep.subr.msk.bf16.mxu0 %vm757_vm6, %v1622_v43  ;;  %v1631_v63 = vsel %vm757_vm6, %v1622_v43, 0  ;;  %v1548_v22 = vmul.f32 %v5903_v51, %v6996_v4  ;;  %v1762_v27 = vpop.permute.xlu0 %1761 }
 0xc0e   :  { %5376 = vmatpush3.bf16.msra.mxu0 %v1631_v63  ;;  %v1554_v19 = vpack.c.bf16 %v1549_v58, %v1549_v58 }
 0xc0f   :  { %v5905_v17 = vpop.eup %5904  ;;  %5739 = vmatprep.subr.msk.bf16.mxu0 %vm546_vm3, %v1764_v42 }
 0xc10   :  { %v1766_v32 = vpop.permute.xlu1 %1765  ;;  %v1547_v6 = vmul.f32 %v5905_v17, %v5893_v39 }
 0xc11   :  { %5378 = vmatmul.mubr.msk.bf16.vlgmr.msra.gmra.mrb[48].mxu0 %vm673_vm5, %v1556_v16  ;;  %v1777_v4 = vsel %vm546_vm3, %v1766_v32, 0  ;;  %v1828_v51 = vpop.permute.xlu0 %1827 }
 0xc12   :  { %v1553_v21 = vpack.c.bf16 %v1548_v22, %v1547_v6 }
 0xc14   :  { %v1760_v31 = vpop.permute.xlu1 %1759  ;;  %5369 = vmatprep.mubr.msk.bf16.mxu1 %vm673_vm5, %v1553_v21 }
 0xc15   :  { %5370 = vmatmul.mubr.msk.bf16.vlgmr.msra.gmra.mrb[40].mxu1 %vm673_vm5, %v1554_v19  ;;  %5399 = vmatprep.mubr.msk.bf16.mxu0 %vm546_vm3, %v1760_v31 }
 0xc16   :  { %5382 = vmatpush3.bf16.msra.mxu1 %v1694_v18  ;;  %5383 = vmatprep.mubr.msk.bf16.mxu1 %vm6361_vm0, %v6360_v0 }
 0xc17   :  { %5741 = vmatprep.subr.msk.bf16.mxu1 %vm546_vm3, %v1832_v40  ;;  %5396 = vmatpush3.bf16.xpose.msra.mxu0 %v1774_v37 }
 0xc18   :  { %5740 = vmatprep.subr.msk.bf16.mxu0 %vm546_vm3, %v1766_v32  ;;  %v1834_v26 = vpop.permute.xlu1 %1833 }
 0xc19   :  { %v1845_v54 = vsel %vm546_vm3, %v1834_v26, 0 }
 0xc1c   :  { %v1830_v17 = vpop.permute.xlu1 %1829 }
 0xc1f   :  { %5398 = vmatpush3.bf16.xpose.msra.mxu0 %v1777_v4 }
 0xc26   :  { %5400 = vmatmul.mubr.msk.bf16.vlgmr.msra.gmra.mrb[52].mxu0 %vm546_vm3, %v1762_v27 }
 0xce4   :  { %v5379_v12 = vpop.f32.mrb[48].mxu0 }
 0xce5   :  { %v1667_v39 = vpop.f32.mrb[49].mxu0 }
 0xce6   :  { %v5380_v24 = vpop.f32.mrb[50].mxu0 }
 0xce7   :  { %v1670_v47 = vpop.f32.mrb[51].mxu0 }
 0xce8   :  { %v1683_v52 = vpack.c.bf16 %v5379_v12, %v1670_v47  ;;  %v5371_v61 = vpop.f32.mrb[40].mxu1 }
 0xce9   :  { %v1682_v29 = vpack.c.bf16 %v1667_v39, %v5371_v61  ;;  %v1605_v41 = vpop.f32.mrb[41].mxu1 }
 0xcea   :  { %v5372_v62 = vpop.f32.mrb[42].mxu1 }
 0xceb   :  { %v1608_v35 = vpop.f32.mrb[43].mxu1 }
 0xcec   :  { %v1681_v50 = vpack.c.bf16 %v1608_v35, %v1605_v41 }
 0xcee   :  { %5384 = vmatmul.mubr.msk.bf16.vlgmr.msra.gmra.mrb[44].mxu1 %vm546_vm3, %v1681_v50 }
 0xcef   :  { %5404 = vmatpush3.bf16.xpose.msra.mxu1 %v1842_v55  ;;  %5387 = vmatprep.mubr.msk.bf16.mxu1 %vm6361_vm0, %v6360_v0 }
 0xcf0   :  { %5742 = vmatprep.subr.msk.bf16.mxu1 %vm546_vm3, %v1834_v26 }
 0xcf6   :  { %5388 = vmatmul.mubr.msk.bf16.gmra.mrb[48].mxu1 %vm546_vm3, %v1682_v29 }
 0xcf7   :  { %5406 = vmatpush3.bf16.xpose.msra.mxu1 %v1845_v54  ;;  %5391 = vmatprep.mubr.msk.bf16.mxu1 %vm6361_vm0, %v6360_v0 }
 0xcf8   :  { %5427 = vmatprep.subr.bf16.mxu1 %v6360_v0 }
 0xcf9   :  { %v5401_v53 = vpop.f32.mrb[52].mxu0 }
 0xcfa   :  { %v1813_v9 = vpop.f32.mrb[53].mxu0  ;;  %v1822_v11 = vadd.f32 %v5401_v53, %v6760_v59 }
 0xcfb   :  { %v1814_v36 = vadd.f32 %v1813_v9, %v6760_v59  ;;  %v5402_v44 = vpop.f32.mrb[54].mxu0 }
 0xcfc   :  { %v1816_v45 = vpop.f32.mrb[55].mxu0  ;;  %v1901_v42 = vsel %vm673_vm5, %v1822_v11, -inf }
 0xcfd   :  { %v1817_v56 = vadd.f32 %v1816_v45, %v6760_v59  ;;  %v1895_v43 = vsel %vm673_vm5, %v1814_v36, -inf }
 0xcfe   :  { %5392 = vmatmul.mubr.msk.bf16.gmra.mrb[52].mxu1 %vm546_vm3, %v1683_v52  ;;  %1896 = vmax.xlane.f32.xlu0 %v1895_v43 }
 0xcff   :  { %5407 = vmatprep.mubr.msk.bf16.mxu1 %vm546_vm3, %v1828_v51  ;;  %v1898_v63 = vsel %vm673_vm5, %v1817_v56, -inf }
 0xd00   :  { %1899 = vmax.xlane.f32.xlu1 %v1898_v63 }
 0xd02   :  { %1902 = vmax.xlane.f32.xlu0 %v1901_v42 }
 0xd06   :  { %5408 = vmatmul.mubr.msk.bf16.vlgmr.msra.gmra.mrb[56].mxu1 %vm546_vm3, %v1830_v17 }
 0xd07   :  { %5429 = vmatprep.mubr.msk.bf16.mxu1 %vm6361_vm0, %v6360_v0 }
 0xd8b   :  { %v1897_v21 = vpop.xlane.xlu0 %1896 }
 0xd8d   :  { %v1900_v27 = vpop.xlane.xlu1 %1899 }
 0xd8e   :  { %v1914_v39 = vsub.f32 %v1817_v56, %v1900_v27 }
 0xd8f   :  { %v1903_v12 = vpop.xlane.xlu0 %1902 }
 0xdc1   :  { %v1730_v16 = vpop.f32.mrb[44].mxu1 }
 0xdc2   :  { %v7069_v58 = vadd.f32 %v1730_v16, %v6966_v38  ;;  %v5385_v32 = vpop.f32.mrb[45].mxu1  ;;  %v1913_v38 = vsub.f32 %v1814_v36, %v1897_v21 }
 0xdc3   :  { %v1733_v6 = vpop.f32.mrb[46].mxu1 }
 0xdc4   :  { %v7072_v22 = vadd.f32 %v1733_v6, %v6968_v14  ;;  %v5386_v28 = vpop.f32.mrb[47].mxu1  ;;  %v1919_v47 = vmul.f32 1.442695, %v1913_v38  ;;  %v1915_v14 = vsub.f32 %v1822_v11, %v1903_v12 }
 0xdc6   :  { %5906 = vpow2.f32 %v1919_v47 }
 0xdc9   :  { %v1738_v19 = vpop.f32.mrb[48].mxu1 }
 0xdca   :  { %v7075_v18 = vadd.f32 %v1738_v19, %v6970_v57  ;;  %v5389_v31 = vpop.f32.mrb[49].mxu1  ;;  %v1921_v57 = vmul.f32 1.442695, %v1914_v39 }
 0xdcb   :  { %v1741_v40 = vpop.f32.mrb[50].mxu1 }
 0xdcc   :  { %v7078_v37 = vadd.f32 %v1741_v40, %v6972_v60  ;;  %v5390_v4 = vpop.f32.mrb[51].mxu1  ;;  %v1923_v60 = vmul.f32 1.442695, %v1915_v14  ;;  %5908 = vpow2.f32 %v1921_v57 }
 0xdce   :  { %5910 = vpow2.f32 %v1923_v60 }
 0xdd0   :  { %v5907_v36 = vpop.eup %5906 }
 0xdd1   :  { %v1746_v24 = vpop.f32.mrb[52].mxu1  ;;  %v1931_v11 = vsel %vm673_vm5, %v5907_v36, 0.0 }
 0xdd2   :  { %v7081_v52 = vadd.f32 %v1746_v24, %v6974_v3  ;;  %v5393_v61 = vpop.f32.mrb[53].mxu1 }
 0xdd3   :  { %v1749_v29 = vpop.f32.mrb[54].mxu1 }
 0xdd4   :  { %v7084_v41 = vadd.f32 %v1749_v29, %v6976_v15  ;;  %v5394_v62 = vpop.f32.mrb[55].mxu1 }
 0xdd6   :  { %v5909_v45 = vpop.eup %5908 }
 0xdd7   :  { %v1934_v43 = vsel %vm673_vm5, %v5909_v45, 0.0 }
 0xdd8   :  { %v5911_v56 = vpop.eup %5910 }
 0xdd9   :  { %v5409_v35 = vpop.f32.mrb[56].mxu1  ;;  %v1937_v51 = vsel %vm673_vm5, %v5911_v56, 0.0 }
 0xdda   :  { %v1881_v50 = vpop.f32.mrb[57].mxu1  ;;  %v1890_v3 = vadd.f32 %v5409_v35, %v6760_v59 }
 0xddb   :  { %v1882_v55 = vadd.f32 %v1881_v50, %v6760_v59  ;;  %v5410_v26 = vpop.f32.mrb[58].mxu1 }
 0xddc   :  { %v1884_v54 = vpop.f32.mrb[59].mxu1  ;;  %v1910_v44 = vsel %vm673_vm5, %v1890_v3, -inf }
 0xddd   :  { %v1885_v53 = vadd.f32 %v1884_v54, %v6760_v59  ;;  %v1904_v9 = vsel %vm673_vm5, %v1882_v55, -inf }
 0xdde   :  { %1905 = vmax.xlane.f32.xlu0 %v1904_v9 }
 0xddf   :  { %v1907_v15 = vsel %vm673_vm5, %v1885_v53, -inf }
 0xde0   :  { %1908 = vmax.xlane.f32.xlu1 %v1907_v15 }
 0xde2   :  { %1911 = vmax.xlane.f32.xlu0 %v1910_v44 }
 0xde4   :  { %1932 = vadd.xlane.f32.xlu1 %v1931_v11 }
 0xde6   :  { %1935 = vadd.xlane.f32.xlu0 %v1934_v43 }
 0xde8   :  { %1938 = vadd.xlane.f32.xlu1 %v1937_v51  ;;  %v527_v51 = vld [vmem:[#allocation10 + $0xc] sm:$0xf] }
 0xdf9   :  { %1965 = vrot.lane.b32.xlu1 %v6783_v48, %s6373_s11 }
 0xdfd   :  { %2027 = vrot.lane.b32.xlu1 %v6786_v1, %s6373_s11 }
 0xe6b   :  { %v1906_v63 = vpop.xlane.xlu0 %1905 }
 0xe6c   :  { %v1916_v17 = vsub.f32 %v1882_v55, %v1906_v63  ;;  %v2102_v63 = vsel %vm757_vm6, %v527_v51, 0 }
 0xe6d   :  { %v1909_v42 = vpop.xlane.xlu1 %1908  ;;  %5428 = vmatpush3.bf16.msra.mxu1 %v2102_v63 }
 0xe6e   :  { %v1917_v16 = vsub.f32 %v1885_v53, %v1909_v42  ;;  %v1925_v19 = vmul.f32 1.442695, %v1916_v17  ;;  %5457 = vmatprep.subr.bf16.mxu1 %v6360_v0 }
 0xe6f   :  { %v1912_v32 = vpop.xlane.xlu0 %1911 }
 0xe70   :  { %v1927_v6 = vmul.f32 1.442695, %v1917_v16  ;;  %v1918_v28 = vsub.f32 %v1890_v3, %v1912_v32 }
 0xe71   :  { %v1933_v21 = vpop.xlane.xlu1 %1932 }
 0xe72   :  { %5912 = vpow2.f32 %v1927_v6  ;;  %v1929_v31 = vmul.f32 1.442695, %v1918_v28 }
 0xe73   :  { %5914 = vrcp.f32 %v1933_v21  ;;  %v1936_v40 = vpop.xlane.xlu0 %1935 }
 0xe74   :  { %5916 = vpow2.f32 %v1929_v31 }
 0xe75   :  { %5918 = vrcp.f32 %v1936_v40  ;;  %v1939_v4 = vpop.xlane.xlu1 %1938 }
 0xe76   :  { %5920 = vpow2.f32 %v1925_v19 }
 0xe77   :  { %5922 = vrcp.f32 %v1939_v4 }
 0xe79   :  { %v1966_v48 = vpop.permute.xlu1 %1965 }
 0xe7a   :  { %5411 = vmatprep.subr.bf16.mxu0 %v1966_v48 }
 0xe7b   :  { %5412 = vmatpush3.bf16.msra.mxu0 %v1966_v48  ;;  %v2175_v48 = vsub.s32 5, %v6658_v7 }
 0xe7c   :  { %v5913_v1 = vpop.eup %5912 }
 0xe7d   :  { %v5915_v27 = vpop.eup %5914  ;;  %v1943_v38 = vsel %vm673_vm5, %v5913_v1, 0.0  ;;  %v2028_v62 = vpop.permute.xlu1 %2027 }
 0xe7e   :  { %v5917_v12 = vpop.eup %5916  ;;  %1944 = vadd.xlane.f32.xlu1 %v1943_v38  ;;  %v1955_v14 = vmul.f32 %v5915_v27, %v5907_v36  ;;  %v7130_v38 = vld [vmem:[#allocation14] sm:$0xff] }
 0xe7f   :  { %v5919_v39 = vpop.eup %5918  ;;  %v1946_v24 = vsel %vm673_vm5, %v5917_v12, 0.0 }
 0xe80   :  { %v5921_v47 = vpop.eup %5920  ;;  %1947 = vadd.xlane.f32.xlu0 %v1946_v24  ;;  %v1956_v61 = vmul.f32 %v5919_v39, %v5909_v45 }
 0xe81   :  { %v1940_v57 = vsel %vm673_vm5, %v5921_v47, 0.0  ;;  %v5923_v50 = vpop.eup %5922 }
 0xe82   :  { %v1961_v29 = vpack.c.bf16 %v1956_v61, %v1955_v14  ;;  %v1957_v26 = vmul.f32 %v5923_v50, %v5911_v56 }
 0xe84   :  { %5415 = vmatprep.mubr.msk.bf16.mxu0 %vm673_vm5, %v1961_v29  ;;  %1941 = vadd.xlane.f32.xlu0 %v1940_v57 }
 0xe8f   :  { %2029 = vrot.lane.b32.xlu1 %v6812_v49, %s6373_s11  ;;  %v1962_v49 = vpack.c.bf16 %v1957_v26, %v1957_v26 }
 0xe9a   :  { %1967 = vrot.lane.b32.xlu0 %v6790_v2, %s6373_s11 }
 0xf0b   :  { %v1945_v60 = vpop.xlane.xlu1 %1944 }
 0xf0d   :  { %v1948_v35 = vpop.xlane.xlu0 %1947 }
 0xf0e   :  { %5924 = vrcp.f32 %v1948_v35 }
 0xf0f   :  { %5926 = vrcp.f32 %v1945_v60  ;;  %v2030_v9 = vpop.permute.xlu1 %2029 }
 0xf10   :  { %v2039_v11 = vsel %vm757_vm6, %v2030_v9, 0 }
 0xf11   :  { %v1942_v55 = vpop.xlane.xlu0 %1941 }
 0xf12   :  { %5928 = vrcp.f32 %v1942_v55 }
 0xf15   :  { %v1968_v54 = vpop.permute.xlu0 %1967 }
 0xf16   :  { %5743 = vmatprep.subr.msk.bf16.mxu0 %vm757_vm6, %v1968_v54  ;;  %v1977_v3 = vsel %vm757_vm6, %v1968_v54, 0 }
 0xf17   :  { %5414 = vmatpush3.bf16.msra.mxu0 %v1977_v3 }
 0xf18   :  { %5419 = vmatprep.subr.bf16.mxu0 %v2028_v62  ;;  %v5925_v53 = vpop.eup %5924 }
 0xf19   :  { %v5927_v2 = vpop.eup %5926  ;;  %v1960_v36 = vmul.f32 %v5925_v53, %v5917_v12  ;;  %v2176_v12 = vrot.slane %v7130_v38, %v2175_v48 }
 0xf1a   :  { %5416 = vmatmul.mubr.msk.bf16.vlgmr.msra.gmra.mrb[56].mxu0 %vm673_vm5, %v1962_v49  ;;  %v1959_v45 = vmul.f32 %v5927_v2, %v5913_v1 }
 0xf1b   :  { %5420 = vmatpush3.bf16.msra.mxu0 %v2028_v62  ;;  %v1964_v43 = vpack.c.bf16 %v1960_v36, %v1960_v36 }
 0xf1c   :  { %v5929_v15 = vpop.eup %5928  ;;  %5744 = vmatprep.subr.msk.bf16.mxu0 %vm757_vm6, %v2030_v9 }
 0xf1d   :  { %v1958_v44 = vmul.f32 %v5929_v15, %v5921_v47 }
 0xf1f   :  { %5422 = vmatpush3.bf16.msra.mxu0 %v2039_v11  ;;  %v1963_v56 = vpack.c.bf16 %v1959_v45, %v1958_v44 }
 0xf20   :  { %5441 = vmatprep.subr.bf16.mxu0 %v6360_v0 }
 0xf21   :  { %5423 = vmatprep.mubr.msk.bf16.mxu0 %vm673_vm5, %v1963_v56 }
 0xf22   :  { %5424 = vmatmul.mubr.msk.bf16.vlgmr.msra.gmra.mrb[60].mxu0 %vm673_vm5, %v1964_v43 }
 0xf23   :  { %5445 = vmatprep.mubr.msk.bf16.mxu0 %vm6361_vm0, %v6360_v0 }
 0xfed   :  { %v5417_v42 = vpop.f32.mrb[56].mxu0 }
 0xfee   :  { %v2013_v17 = vpop.f32.mrb[57].mxu0 }
 0xfef   :  { %v5418_v16 = vpop.f32.mrb[58].mxu0 }
 0xff0   :  { %v2016_v32 = vpop.f32.mrb[59].mxu0 }
 0xff1   :  { %v2089_v6 = vpack.c.bf16 %v2016_v32, %v2013_v17 }
 0xff3   :  { %5430 = vmatmul.mubr.msk.bf16.vlgmr.msra.gmra.mrb[60].mxu1 %vm546_vm3, %v2089_v6 }
 0xff4   :  { %5433 = vmatprep.mubr.msk.bf16.mxu1 %vm6361_vm0, %v6360_v0 }
 0xff5   :  { %v5425_v28 = vpop.f32.mrb[60].mxu0 }
 0xff6   :  { %v2075_v21 = vpop.f32.mrb[61].mxu0 }
 0xff7   :  { %v2090_v19 = vpack.c.bf16 %v2075_v21, %v5417_v42  ;;  %v5426_v31 = vpop.f32.mrb[62].mxu0 }
 0xff8   :  { %v2078_v40 = vpop.f32.mrb[63].mxu0 }
 0xff9   :  { %v2091_v4 = vpack.c.bf16 %v5425_v28, %v2078_v40 }
 0xffb   :  { %5434 = vmatmul.mubr.msk.bf16.gmra.mrb[64].mxu1 %vm546_vm3, %v2090_v19 }
 0xffc   :  { %5437 = vmatprep.mubr.msk.bf16.mxu1 %vm6361_vm0, %v6360_v0 }
0x1003   :  { %5438 = vmatmul.mubr.msk.bf16.gmra.mrb[68].mxu1 %vm546_vm3, %v2091_v4 }
0x1004   :  { %5465 = vmatprep.mubr.msk.bf16.mxu1 %vm6361_vm0, %v6360_v0 }
0x10c6   :  { %v2138_v1 = vpop.f32.mrb[60].mxu1 }
0x10c7   :  { %v2161_v27 = vadd.f32 %v2138_v1, %v7069_v58  ;;  %v5431_v39 = vpop.f32.mrb[61].mxu1 }
0x10c8   :  { %v2141_v24 = vpop.f32.mrb[62].mxu1 }
0x10c9   :  { %v2167_v47 = vadd.f32 %v2161_v27, %v6596_v10  ;;  %v2162_v14 = vadd.f32 %v2141_v24, %v7072_v22  ;;  %v5432_v61 = vpop.f32.mrb[63].mxu1 }
0x10cb   :  { %v7137_v29 = vadd.f32 %v2176_v12, %v2167_v47  ;;  %v2168_v57 = vadd.f32 %v2162_v14, %v6598_v13 }
0x10cd   :  { %v7140_v62 = vadd.f32 %v2176_v12, %v2168_v57  ;;  %v2183_v58 = vsel %vm295_vm2, %v7137_v29, 0.0 }
0x10ce   :  { %2184 = vadd.xlane.f32.xlu0 %v2183_v58  ;;  %v2146_v60 = vpop.f32.mrb[64].mxu1 }
0x10cf   :  { %v2163_v35 = vadd.f32 %v2146_v60, %v7075_v18  ;;  %v5435_v50 = vpop.f32.mrb[65].mxu1  ;;  %v2186_v10 = vsel %vm295_vm2, %v7140_v62, 0.0 }
0x10d0   :  { %2187 = vadd.xlane.f32.xlu1 %v2186_v10  ;;  %v2149_v22 = vpop.f32.mrb[66].mxu1  ;;  %v5806_v10 = vld [vmem:[#allocation11] sm:$0xff]  }
0x10d1   :  { %v2169_v55 = vadd.f32 %v2163_v35, %v6604_v20  ;;  %v2164_v26 = vadd.f32 %v2149_v22, %v7078_v37  ;;  %v5436_v13 = vpop.f32.mrb[67].mxu1  ;;  %5442 = vmatpush3.bf16.msra.mxu0 %v5806_v10  ;;  %v5807_v22 = vld [vmem:[#allocation11 + $0x8] sm:$0xff]  }
0x10d2   :  { %5443 = vmatprep.subr.bf16.mxu0 %v6360_v0 }
0x10d3   :  { %v7149_v54 = vadd.f32 %v2176_v12, %v2169_v55  ;;  %v2170_v3 = vadd.f32 %v2164_v26, %v6606_v23 }
0x10d5   :  { %v7152_v49 = vadd.f32 %v2176_v12, %v2170_v3  ;;  %v2189_v18 = vsel %vm295_vm2, %v7149_v54, 0.0  ;;  %5444 = vmatpush3.bf16.msra.mxu0 %v5807_v22 }
0x10d6   :  { %2190 = vadd.xlane.f32.xlu0 %v2189_v18  ;;  %v2154_v53 = vpop.f32.mrb[68].mxu1  ;;  %5477 = vmatprep.subr.bf16.mxu0 %v6360_v0 }
0x10d7   :  { %v2165_v2 = vadd.f32 %v2154_v53, %v7081_v52  ;;  %v5439_v9 = vpop.f32.mrb[69].mxu1  ;;  %v2192_v44 = vsel %vm295_vm2, %v7152_v49, 0.0 }
0x10d8   :  { %v2157_v15 = vpop.f32.mrb[70].mxu1 }
0x10d9   :  { %v2171_v20 = vadd.f32 %v2165_v2, %v6612_v30  ;;  %v2166_v37 = vadd.f32 %v2157_v15, %v7084_v41  ;;  %v5440_v36 = vpop.f32.mrb[71].mxu1  ;;  %v2263_v15 = vsub.s32 6, %v6658_v7 }
0x10da   :  { %2193 = vadd.xlane.f32.xlu0 %v2192_v44 }
0x10db   :  { %v7161_v23 = vadd.f32 %v2176_v12, %v2171_v20  ;;  %v2172_v45 = vadd.f32 %v2166_v37, %v6614_v33  ;;  %v2264_v44 = vrot.slane %v7130_v38, %v2263_v15 }
0x10dd   :  { %v7164_v11 = vadd.f32 %v2176_v12, %v2172_v45  ;;  %v2195_v52 = vsel %vm295_vm2, %v7161_v23, 0.0  ;;  %v2273_v45 = vsub.s32 7, %v6658_v7 }
0x10de   :  { %2196 = vadd.xlane.f32.xlu1 %v2195_v52 }
0x10df   :  { %v2198_v30 = vsel %vm295_vm2, %v7164_v11, 0.0 }
0x10e0   :  { %2199 = vadd.xlane.f32.xlu0 %v2198_v30 }
0x115b   :  { %v2185_v41 = vpop.xlane.xlu0 %2184 }
0x115c   :  { %v2201_v56 = vmul.f32 0.03125, %v2185_v41 }
0x115d   :  { %v2188_v43 = vpop.xlane.xlu1 %2187 }
0x115e   :  { %v2207_v51 = vsub.f32 %v7137_v29, %v2201_v56  ;;  %v2202_v63 = vmul.f32 0.03125, %v2188_v43 }
0x1160   :  { %v2208_v42 = vsub.f32 %v7140_v62, %v2202_v63  ;;  %v2213_v17 = vmul.f32 %v2207_v51, %v2207_v51 }
0x1162   :  { %v2219_v33 = vsel %vm295_vm2, %v2213_v17, 0.0  ;;  %v2214_v16 = vmul.f32 %v2208_v42, %v2208_v42 }
0x1163   :  { %v2191_v32 = vpop.xlane.xlu0 %2190  ;;  %2220 = vadd.xlane.f32.xlu1 %v2219_v33 }
0x1164   :  { %v2203_v6 = vmul.f32 0.03125, %v2191_v32  ;;  %v2222_v28 = vsel %vm295_vm2, %v2214_v16, 0.0  ;;  %v2274_v32 = vrot.slane %v7130_v38, %v2273_v45 }
0x1165   :  { %2223 = vadd.xlane.f32.xlu0 %v2222_v28 }
0x1166   :  { %v7175_v21 = vsub.f32 %v7149_v54, %v2203_v6 }
0x1167   :  { %v2194_v19 = vpop.xlane.xlu0 %2193 }
0x1168   :  { %v2204_v31 = vmul.f32 0.03125, %v2194_v19  ;;  %v2215_v40 = vmul.f32 %v7175_v21, %v7175_v21 }
0x116a   :  { %v7180_v4 = vsub.f32 %v7152_v49, %v2204_v31  ;;  %v2225_v1 = vsel %vm295_vm2, %v2215_v40, 0.0 }
0x116b   :  { %2226 = vadd.xlane.f32.xlu1 %v2225_v1  ;;  %v2197_v27 = vpop.xlane.xlu1 %2196 }
0x116c   :  { %v2205_v12 = vmul.f32 0.03125, %v2197_v27  ;;  %v2216_v39 = vmul.f32 %v7180_v4, %v7180_v4 }
0x116d   :  { %v2200_v24 = vpop.xlane.xlu0 %2199 }
0x116e   :  { %v7186_v47 = vsub.f32 %v7161_v23, %v2205_v12  ;;  %v2206_v14 = vmul.f32 0.03125, %v2200_v24  ;;  %v2228_v61 = vsel %vm295_vm2, %v2216_v39, 0.0 }
0x116f   :  { %2229 = vadd.xlane.f32.xlu0 %v2228_v61 }
0x1170   :  { %v7190_v57 = vsub.f32 %v7164_v11, %v2206_v14  ;;  %v2217_v58 = vmul.f32 %v7186_v47, %v7186_v47 }
0x1172   :  { %v2231_v60 = vsel %vm295_vm2, %v2217_v58, 0.0  ;;  %v2218_v35 = vmul.f32 %v7190_v57, %v7190_v57 }
0x1173   :  { %2232 = vadd.xlane.f32.xlu1 %v2231_v60 }
0x1174   :  { %v2234_v50 = vsel %vm295_vm2, %v2218_v35, 0.0 }
0x1175   :  { %2235 = vadd.xlane.f32.xlu0 %v2234_v50 }
0x11f0   :  { %v2221_v55 = vpop.xlane.xlu1 %2220 }
0x11f1   :  { %v2237_v26 = vmul.f32 0.03125, %v2221_v55 }
0x11f2   :  { %v2224_v13 = vpop.xlane.xlu0 %2223 }
0x11f3   :  { %v2243_v3 = vadd.f32 1e-06, %v2237_v26  ;;  %v2238_v18 = vmul.f32 0.03125, %v2224_v13  ;;  %v5810_v13 = vld [vmem:[#allocation13 + $0x10] sm:$0xff]  }
0x11f5   :  { %5930 = vrsqrt.f32 %v2243_v3  ;;  %v2244_v53 = vadd.f32 1e-06, %v2238_v18  ;;  %v5811_v3 = vld [vmem:[#allocation13 + $0x18] sm:$0xff]   ;;  %v7224_v18 = vld [vmem:[#allocation14 + $0x8] sm:$0x3] }
0x11f7   :  { %5932 = vrsqrt.f32 %v2244_v53  ;;  %v2291_v53 = vrot.slane %v7224_v18, %v6668_v25 }
0x11f8   :  { %v2227_v2 = vpop.xlane.xlu1 %2226 }
0x11f9   :  { %v2239_v9 = vmul.f32 0.03125, %v2227_v2 }
0x11fb   :  { %v2245_v20 = vadd.f32 1e-06, %v2239_v9 }
0x11fc   :  { %v2230_v37 = vpop.xlane.xlu0 %2229 }
0x11fd   :  { %5934 = vrsqrt.f32 %v2245_v20  ;;  %v2240_v36 = vmul.f32 0.03125, %v2230_v37 }
0x11ff   :  { %v5931_v52 = vpop.eup %5930  ;;  %v2246_v30 = vadd.f32 1e-06, %v2240_v36 }
0x1200   :  { %v2255_v41 = vmul.f32 %v5931_v52, %v2207_v51  ;;  %v2233_v56 = vpop.xlane.xlu1 %2232 }
0x1201   :  { %v5933_v43 = vpop.eup %5932  ;;  %5936 = vrsqrt.f32 %v2246_v30  ;;  %v2241_v63 = vmul.f32 0.03125, %v2233_v56 }
0x1202   :  { %v2265_v17 = vmul.f32 %v2264_v44, %v2255_v41  ;;  %v2256_v33 = vmul.f32 %v5933_v43, %v2208_v42  ;;  %v2236_v16 = vpop.xlane.xlu0 %2235 }
0x1203   :  { %v2247_v6 = vadd.f32 1e-06, %v2241_v63  ;;  %v2242_v28 = vmul.f32 0.03125, %v2236_v16 }
0x1204   :  { %v2266_v19 = vmul.f32 %v2264_v44, %v2256_v33  ;;  %v2275_v40 = vadd.f32 %v2274_v32, %v2265_v17 }
0x1205   :  { %5938 = vrsqrt.f32 %v2247_v6  ;;  %v2248_v31 = vadd.f32 1e-06, %v2242_v28 }
0x1206   :  { %v2276_v1 = vadd.f32 %v2274_v32, %v2266_v19 }
0x1207   :  { %v5935_v27 = vpop.eup %5934  ;;  %5940 = vrsqrt.f32 %v2248_v31 }
0x1208   :  { %v2281_v51 = vpack.c.bf16 %v2276_v1, %v2275_v40  ;;  %v2257_v12 = vmul.f32 %v5935_v27, %v7175_v21 }
0x120a   :  { %5446 = vmatmul.mubr.msk.bf16.vlgmr.msra.gmra.mrb[64].mxu0 %vm295_vm2, %v2281_v51  ;;  %v2267_v39 = vmul.f32 %v2264_v44, %v2257_v12 }
0x120b   :  { %v5937_v42 = vpop.eup %5936  ;;  %5449 = vmatprep.mubr.msk.bf16.mxu0 %vm6361_vm0, %v6360_v0 }
0x120c   :  { %v2258_v38 = vmul.f32 %v5937_v42, %v7180_v4  ;;  %v2277_v61 = vadd.f32 %v2274_v32, %v2267_v39 }
0x120e   :  { %v2268_v24 = vmul.f32 %v2264_v44, %v2258_v38 }
0x120f   :  { %v5939_v14 = vpop.eup %5938 }
0x1210   :  { %v2278_v58 = vadd.f32 %v2274_v32, %v2268_v24  ;;  %v2259_v60 = vmul.f32 %v5939_v14, %v7186_v47  ;;  %v5808_v47 = vld [vmem:[#allocation13] sm:$0xff]  }
0x1211   :  { %v5941_v35 = vpop.eup %5940  ;;  %5458 = vmatpush3.bf16.msra.mxu1 %v5808_v47 }
0x1212   :  { %v2282_v50 = vpack.c.bf16 %v2278_v58, %v2277_v61  ;;  %v2260_v10 = vmul.f32 %v5941_v35, %v7190_v57  ;;  %v2269_v21 = vmul.f32 %v2264_v44, %v2259_v60  ;;  %5459 = vmatprep.subr.bf16.mxu1 %v6360_v0  ;;  %v5809_v57 = vld [vmem:[#allocation13 + $0x8] sm:$0xff]  }
0x1214   :  { %5450 = vmatmul.mubr.msk.bf16.gmra.mrb[68].mxu0 %vm295_vm2, %v2282_v50  ;;  %v2270_v22 = vmul.f32 %v2264_v44, %v2260_v10  ;;  %v2279_v4 = vadd.f32 %v2274_v32, %v2269_v21 }
0x1215   :  { %5453 = vmatprep.mubr.msk.bf16.mxu0 %vm6361_vm0, %v6360_v0  ;;  %5460 = vmatpush3.bf16.msra.mxu1 %v5809_v57 }
0x1216   :  { %v2280_v55 = vadd.f32 %v2274_v32, %v2270_v22  ;;  %5461 = vmatprep.subr.bf16.mxu1 %v6360_v0 }
0x1218   :  { %v2283_v26 = vpack.c.bf16 %v2280_v55, %v2279_v4 }
0x1219   :  { %5462 = vmatpush3.bf16.msra.mxu1 %v5810_v13 }
0x121a   :  { %5463 = vmatprep.subr.bf16.mxu1 %v6360_v0 }
0x121c   :  { %5454 = vmatmul.mubr.msk.bf16.gmra.mrb[72].mxu0 %vm295_vm2, %v2283_v26 }
0x121d   :  { %5481 = vmatprep.mubr.msk.bf16.mxu0 %vm6361_vm0, %v6360_v0  ;;  %5464 = vmatpush3.bf16.msra.mxu1 %v5811_v3 }
0x12dd   :  { %v2347_v2 = vpop.f32.mrb[64].mxu0 }
0x12de   :  { %v2348_v9 = vadd.f32 %v2347_v2, %v2291_v53  ;;  %v5447_v20 = vpop.f32.mrb[65].mxu0 }
0x12df   :  { %v2350_v37 = vpop.f32.mrb[66].mxu0 }
0x12e0   :  { %v2370_v36 = vmul.f32 %v2348_v9, %v2348_v9  ;;  %v2351_v44 = vadd.f32 %v2350_v37, %v2291_v53  ;;  %v5448_v52 = vpop.f32.mrb[67].mxu0 }
0x12e2   :  { %v2376_v30 = vmul.f32 %v2370_v36, %v2348_v9  ;;  %v2371_v41 = vmul.f32 %v2351_v44, %v2351_v44 }
0x12e4   :  { %v2382_v56 = vmul.f32 0.044715, %v2376_v30  ;;  %v2377_v43 = vmul.f32 %v2371_v41, %v2351_v44 }
0x12e6   :  { %v2388_v63 = vadd.f32 %v2382_v56, %v2348_v9  ;;  %v2383_v17 = vmul.f32 0.044715, %v2377_v43 }
0x12e7   :  { %v2355_v33 = vpop.f32.mrb[68].mxu0 }
0x12e8   :  { %v2394_v16 = vmul.f32 0.7978846, %v2388_v63  ;;  %v2389_v32 = vadd.f32 %v2383_v17, %v2351_v44  ;;  %v2356_v6 = vadd.f32 %v2355_v33, %v2291_v53  ;;  %v5451_v28 = vpop.f32.mrb[69].mxu0 }
0x12e9   :  { %v2358_v19 = vpop.f32.mrb[70].mxu0 }
0x12ea   :  { %5942 = vtanh.f32 %v2394_v16  ;;  %v2395_v31 = vmul.f32 0.7978846, %v2389_v32  ;;  %v2372_v40 = vmul.f32 %v2356_v6, %v2356_v6  ;;  %v2359_v1 = vadd.f32 %v2358_v19, %v2291_v53  ;;  %v5452_v27 = vpop.f32.mrb[71].mxu0 }
0x12ec   :  { %5944 = vtanh.f32 %v2395_v31  ;;  %v2378_v51 = vmul.f32 %v2372_v40, %v2356_v6  ;;  %v2373_v12 = vmul.f32 %v2359_v1, %v2359_v1 }
0x12ee   :  { %v2384_v42 = vmul.f32 0.044715, %v2378_v51  ;;  %v2379_v38 = vmul.f32 %v2373_v12, %v2359_v1 }
0x12ef   :  { %v2363_v39 = vpop.f32.mrb[72].mxu0 }
0x12f0   :  { %v2390_v24 = vadd.f32 %v2384_v42, %v2356_v6  ;;  %v2385_v14 = vmul.f32 0.044715, %v2379_v38  ;;  %v2364_v61 = vadd.f32 %v2363_v39, %v2291_v53  ;;  %v5455_v58 = vpop.f32.mrb[73].mxu0 }
0x12f1   :  { %v2366_v60 = vpop.f32.mrb[74].mxu0 }
0x12f2   :  { %v2396_v35 = vmul.f32 0.7978846, %v2390_v24  ;;  %v2391_v50 = vadd.f32 %v2385_v14, %v2359_v1  ;;  %v2374_v10 = vmul.f32 %v2364_v61, %v2364_v61  ;;  %v2367_v21 = vadd.f32 %v2366_v60, %v2291_v53  ;;  %v5456_v22 = vpop.f32.mrb[75].mxu0 }
0x12f4   :  { %v5943_v55 = vpop.eup %5942  ;;  %5946 = vtanh.f32 %v2396_v35  ;;  %v2397_v4 = vmul.f32 0.7978846, %v2391_v50  ;;  %v2380_v26 = vmul.f32 %v2374_v10, %v2364_v61  ;;  %v2375_v47 = vmul.f32 %v2367_v21, %v2367_v21 }
0x12f5   :  { %v2406_v57 = vadd.f32 1.0, %v5943_v55 }
0x12f6   :  { %v5945_v13 = vpop.eup %5944  ;;  %5948 = vtanh.f32 %v2397_v4  ;;  %v2386_v3 = vmul.f32 0.044715, %v2380_v26  ;;  %v2381_v2 = vmul.f32 %v2375_v47, %v2367_v21 }
0x12f7   :  { %v2412_v20 = vmul.f32 0.5, %v2406_v57  ;;  %v2407_v37 = vadd.f32 1.0, %v5945_v13 }
0x12f8   :  { %v2392_v36 = vadd.f32 %v2386_v3, %v2364_v61  ;;  %v2387_v52 = vmul.f32 0.044715, %v2381_v2 }
0x12f9   :  { %v2413_v30 = vmul.f32 0.5, %v2407_v37  ;;  %v2418_v43 = vmul.f32 %v2412_v20, %v2348_v9 }
0x12fa   :  { %v2398_v41 = vmul.f32 0.7978846, %v2392_v36  ;;  %v2393_v56 = vadd.f32 %v2387_v52, %v2367_v21 }
0x12fb   :  { %v2419_v53 = vmul.f32 %v2413_v30, %v2351_v44 }
0x12fc   :  { %5950 = vtanh.f32 %v2398_v41  ;;  %v2399_v63 = vmul.f32 0.7978846, %v2393_v56 }
0x12fd   :  { %v2424_v17 = vpack.c.bf16 %v2419_v53, %v2418_v43 }
0x12fe   :  { %v5947_v33 = vpop.eup %5946  ;;  %5952 = vtanh.f32 %v2399_v63 }
0x12ff   :  { %v2408_v16 = vadd.f32 1.0, %v5947_v33  ;;  %5466 = vmatmul.mubr.msk.bf16.vlgmr.msra.gmra.mrb[72].mxu1 %vm2463_vm7, %v2424_v17 }
0x1300   :  { %v5949_v32 = vpop.eup %5948  ;;  %5469 = vmatprep.mubr.msk.bf16.mxu1 %vm6361_vm0, %v6360_v0 }
0x1301   :  { %v2414_v28 = vmul.f32 0.5, %v2408_v16  ;;  %v2409_v19 = vadd.f32 1.0, %v5949_v32 }
0x1303   :  { %v2415_v31 = vmul.f32 0.5, %v2409_v19  ;;  %v2420_v40 = vmul.f32 %v2414_v28, %v2356_v6  ;;  %v2438_v6 = vrot.slane %v7224_v18, %v6674_v34 }
0x1305   :  { %v2421_v27 = vmul.f32 %v2415_v31, %v2359_v1 }
0x1306   :  { %v5951_v9 = vpop.eup %5950 }
0x1307   :  { %v2410_v44 = vadd.f32 1.0, %v5951_v9  ;;  %v2425_v51 = vpack.c.bf16 %v2421_v27, %v2420_v40 }
0x1308   :  { %v5953_v12 = vpop.eup %5952 }
0x1309   :  { %v2416_v42 = vmul.f32 0.5, %v2410_v44  ;;  %v2411_v38 = vadd.f32 1.0, %v5953_v12  ;;  %5470 = vmatmul.mubr.msk.bf16.gmra.mrb[76].mxu1 %vm2463_vm7, %v2425_v51 }
0x130a   :  { %5473 = vmatprep.mubr.msk.bf16.mxu1 %vm6361_vm0, %v6360_v0 }
0x130b   :  { %v2417_v39 = vmul.f32 0.5, %v2411_v38  ;;  %v2422_v24 = vmul.f32 %v2416_v42, %v2364_v61 }
0x130d   :  { %v2423_v14 = vmul.f32 %v2417_v39, %v2367_v21 }
0x130f   :  { %v2426_v58 = vpack.c.bf16 %v2423_v14, %v2422_v24 }
0x1311   :  { %5474 = vmatmul.mubr.msk.bf16.gmra.mrb[80].mxu1 %vm2463_vm7, %v2426_v58 }
0x13d2   :  { %v2507_v1 = vpop.f32.mrb[72].mxu1 }
0x13d3   :  { %v2508_v60 = vadd.f32 %v2507_v1, %v2438_v6  ;;  %v5467_v35 = vpop.f32.mrb[73].mxu1 }
0x13d4   :  { %v2510_v50 = vpop.f32.mrb[74].mxu1 }
0x13d5   :  { %v7238_v10 = vadd.f32 %v2508_v60, %v7137_v29  ;;  %v2511_v22 = vadd.f32 %v2510_v50, %v2438_v6  ;;  %v5468_v55 = vpop.f32.mrb[75].mxu1 }
0x13d7   :  { %v7241_v4 = vadd.f32 %v2511_v22, %v7140_v62  ;;  %v2539_v61 = vsel %vm295_vm2, %v7238_v10, 0.0 }
0x13d8   :  { %2540 = vadd.xlane.f32.xlu1 %v2539_v61 }
0x13d9   :  { %v2542_v21 = vsel %vm295_vm2, %v7241_v4, 0.0 }
0x13da   :  { %2543 = vadd.xlane.f32.xlu0 %v2542_v21  ;;  %v5812_v21 = vld [vmem:[#allocation8 + $0x10] sm:$0xff]  }
0x13db   :  { %5478 = vmatpush3.bf16.msra.mxu0 %v5812_v21 }
0x13dc   :  { %v2515_v18 = vpop.f32.mrb[76].mxu1  ;;  %5479 = vmatprep.subr.bf16.mxu0 %v6360_v0 }
0x13dd   :  { %v2516_v26 = vadd.f32 %v2515_v18, %v2438_v6  ;;  %v5471_v47 = vpop.f32.mrb[77].mxu1  ;;  %v5813_v18 = vld [vmem:[#allocation8 + $0x18] sm:$0xff]  }
0x13de   :  { %v2518_v57 = vpop.f32.mrb[78].mxu1 }
0x13df   :  { %v7248_v29 = vadd.f32 %v2516_v26, %v7149_v54  ;;  %v2519_v13 = vadd.f32 %v2518_v57, %v2438_v6  ;;  %v5472_v3 = vpop.f32.mrb[79].mxu1  ;;  %5480 = vmatpush3.bf16.msra.mxu0 %v5813_v18  ;;  %v7296_v26 = vld [vmem:[#allocation14 + $0x10] sm:$0xff] }
0x13e0   :  { %v2742_v47 = vrot.slane %v7296_v26, %v498_v8 }
0x13e1   :  { %v7251_v62 = vadd.f32 %v2519_v13, %v7152_v49  ;;  %v2545_v2 = vsel %vm295_vm2, %v7248_v29, 0.0 }
0x13e2   :  { %2546 = vadd.xlane.f32.xlu1 %v2545_v2 }
0x13e3   :  { %v2548_v20 = vsel %vm295_vm2, %v7251_v62, 0.0 }
0x13e4   :  { %2549 = vadd.xlane.f32.xlu0 %v2548_v20  ;;  %v2523_v37 = vpop.f32.mrb[80].mxu1 }
0x13e5   :  { %v2524_v36 = vadd.f32 %v2523_v37, %v2438_v6  ;;  %v5475_v52 = vpop.f32.mrb[81].mxu1 }
0x13e6   :  { %v2526_v30 = vpop.f32.mrb[82].mxu1 }
0x13e7   :  { %v7258_v54 = vadd.f32 %v2524_v36, %v7161_v23  ;;  %v2527_v41 = vadd.f32 %v2526_v30, %v2438_v6  ;;  %v5476_v56 = vpop.f32.mrb[83].mxu1 }
0x13e9   :  { %v7261_v49 = vadd.f32 %v2527_v41, %v7164_v11  ;;  %v2551_v43 = vsel %vm295_vm2, %v7258_v54, 0.0 }
0x13ea   :  { %2552 = vadd.xlane.f32.xlu1 %v2551_v43  ;;  %v2620_v43 = vrot.slane %v7296_v26, %v6668_v25 }
0x13eb   :  { %v2554_v53 = vsel %vm295_vm2, %v7261_v49, 0.0 }
0x13ec   :  { %2555 = vadd.xlane.f32.xlu0 %v2554_v53 }
0x1465   :  { %v2541_v63 = vpop.xlane.xlu1 %2540 }
0x1466   :  { %v2557_v17 = vmul.f32 0.03125, %v2541_v63 }
0x1467   :  { %v2544_v33 = vpop.xlane.xlu0 %2543 }
0x1468   :  { %v2563_v16 = vsub.f32 %v7238_v10, %v2557_v17  ;;  %v2558_v23 = vmul.f32 0.03125, %v2544_v33  ;;  %v2630_v33 = vrot.slane %v7296_v26, %v6674_v34 }
0x146a   :  { %v2564_v32 = vsub.f32 %v7241_v4, %v2558_v23  ;;  %v2569_v28 = vmul.f32 %v2563_v16, %v2563_v16 }
0x146c   :  { %v2575_v11 = vsel %vm295_vm2, %v2569_v28, 0.0  ;;  %v2570_v19 = vmul.f32 %v2564_v32, %v2564_v32 }
0x146d   :  { %2576 = vadd.xlane.f32.xlu1 %v2575_v11 }
0x146e   :  { %v2578_v31 = vsel %vm295_vm2, %v2570_v19, 0.0 }
0x146f   :  { %v2547_v40 = vpop.xlane.xlu1 %2546  ;;  %2579 = vadd.xlane.f32.xlu0 %v2578_v31 }
0x1470   :  { %v2559_v27 = vmul.f32 0.03125, %v2547_v40 }
0x1471   :  { %v2550_v9 = vpop.xlane.xlu0 %2549 }
0x1472   :  { %v7272_v44 = vsub.f32 %v7248_v29, %v2559_v27  ;;  %v2560_v51 = vmul.f32 0.03125, %v2550_v9 }
0x1474   :  { %v7275_v12 = vsub.f32 %v7251_v62, %v2560_v51  ;;  %v2571_v42 = vmul.f32 %v7272_v44, %v7272_v44 }
0x1476   :  { %v2581_v38 = vsel %vm295_vm2, %v2571_v42, 0.0  ;;  %v2572_v39 = vmul.f32 %v7275_v12, %v7275_v12 }
0x1477   :  { %2582 = vadd.xlane.f32.xlu1 %v2581_v38  ;;  %v2553_v24 = vpop.xlane.xlu1 %2552 }
0x1478   :  { %v2561_v14 = vmul.f32 0.03125, %v2553_v24  ;;  %v2584_v58 = vsel %vm295_vm2, %v2572_v39, 0.0 }
0x1479   :  { %2585 = vadd.xlane.f32.xlu0 %v2584_v58  ;;  %v2556_v6 = vpop.xlane.xlu0 %2555 }
0x147a   :  { %v7284_v1 = vsub.f32 %v7258_v54, %v2561_v14  ;;  %v2562_v60 = vmul.f32 0.03125, %v2556_v6 }
0x147c   :  { %v7287_v35 = vsub.f32 %v7261_v49, %v2562_v60  ;;  %v2573_v50 = vmul.f32 %v7284_v1, %v7284_v1 }
0x147e   :  { %v2587_v22 = vsel %vm295_vm2, %v2573_v50, 0.0  ;;  %v2574_v55 = vmul.f32 %v7287_v35, %v7287_v35 }
0x147f   :  { %2588 = vadd.xlane.f32.xlu1 %v2587_v22 }
0x1480   :  { %v2590_v61 = vsel %vm295_vm2, %v2574_v55, 0.0 }
0x1481   :  { %2591 = vadd.xlane.f32.xlu0 %v2590_v61 }
0x1490   :  { %2744 = vrot.lane.b32.xlu1 %v2742_v47, %s6362_s9 }
0x14fa   :  { %v2577_v57 = vpop.xlane.xlu1 %2576 }
0x14fb   :  { %v2593_v13 = vmul.f32 0.03125, %v2577_v57 }
0x14fc   :  { %v2580_v3 = vpop.xlane.xlu0 %2579 }
0x14fd   :  { %v2599_v2 = vadd.f32 1e-06, %v2593_v13  ;;  %v2594_v20 = vmul.f32 0.03125, %v2580_v3  ;;  %v2726_v3 = vrot.slane %v7296_v26, %v6691_v5 }
0x14ff   :  { %5954 = vrsqrt.f32 %v2599_v2  ;;  %v2600_v37 = vadd.f32 1e-06, %v2594_v20 }
0x1501   :  { %5956 = vrsqrt.f32 %v2600_v37 }
0x1504   :  { %v2583_v36 = vpop.xlane.xlu1 %2582 }
0x1505   :  { %v2595_v52 = vmul.f32 0.03125, %v2583_v36 }
0x1506   :  { %v2586_v30 = vpop.xlane.xlu0 %2585 }
0x1507   :  { %v2601_v41 = vadd.f32 1e-06, %v2595_v52  ;;  %v2596_v56 = vmul.f32 0.03125, %v2586_v30 }
0x1509   :  { %v5955_v53 = vpop.eup %5954  ;;  %5958 = vrsqrt.f32 %v2601_v41  ;;  %v2602_v8 = vadd.f32 1e-06, %v2596_v56 }
0x150a   :  { %v2611_v63 = vmul.f32 %v5955_v53, %v2563_v16 }
0x150b   :  { %v5957_v17 = vpop.eup %5956  ;;  %5960 = vrsqrt.f32 %v2602_v8 }
0x150c   :  { %v2621_v23 = vmul.f32 %v2620_v43, %v2611_v63  ;;  %v2612_v28 = vmul.f32 %v5957_v17, %v2564_v32  ;;  %v2589_v11 = vpop.xlane.xlu1 %2588 }
0x150d   :  { %v2597_v19 = vmul.f32 0.03125, %v2589_v11 }
0x150e   :  { %v2622_v31 = vmul.f32 %v2620_v43, %v2612_v28  ;;  %v2592_v40 = vpop.xlane.xlu0 %2591  ;;  %v2631_v51 = vadd.f32 %v2630_v33, %v2621_v23 }
0x150f   :  { %v2603_v27 = vadd.f32 1e-06, %v2597_v19  ;;  %v2598_v9 = vmul.f32 0.03125, %v2592_v40 }
0x1510   :  { %v2632_v42 = vadd.f32 %v2630_v33, %v2622_v31  ;;  %v2745_v2 = vpop.permute.xlu1 %2744 }
0x1511   :  { %5962 = vrsqrt.f32 %v2603_v27  ;;  %v2604_v38 = vadd.f32 1e-06, %v2598_v9 }
0x1512   :  { %v2637_v39 = vpack.c.bf16 %v2632_v42, %v2631_v51 }
0x1513   :  { %v5959_v24 = vpop.eup %5958  ;;  %5964 = vrsqrt.f32 %v2604_v38 }
0x1514   :  { %5482 = vmatmul.mubr.msk.bf16.vlgmr.msra.gmra.mrb[76].mxu0 %vm295_vm2, %v2637_v39  ;;  %v2613_v16 = vmul.f32 %v5959_v24, %v7272_v44 }
0x1515   :  { %v5961_v14 = vpop.eup %5960  ;;  %5485 = vmatprep.mubr.msk.bf16.mxu0 %vm6361_vm0, %v6360_v0 }
0x1516   :  { %v2614_v32 = vmul.f32 %v5961_v14, %v7275_v12  ;;  %v2623_v58 = vmul.f32 %v2620_v43, %v2613_v16 }
0x1518   :  { %v2624_v6 = vmul.f32 %v2620_v43, %v2614_v32  ;;  %v2633_v60 = vadd.f32 %v2630_v33, %v2623_v58 }
0x151a   :  { %v2634_v50 = vadd.f32 %v2630_v33, %v2624_v6 }
0x151b   :  { %v5963_v22 = vpop.eup %5962 }
0x151c   :  { %v2638_v55 = vpack.c.bf16 %v2634_v50, %v2633_v60  ;;  %v2615_v61 = vmul.f32 %v5963_v22, %v7284_v1 }
0x151d   :  { %v5965_v21 = vpop.eup %5964 }
0x151e   :  { %5486 = vmatmul.mubr.msk.bf16.gmra.mrb[80].mxu0 %vm295_vm2, %v2638_v55  ;;  %v2616_v18 = vmul.f32 %v5965_v21, %v7287_v35  ;;  %v2625_v44 = vmul.f32 %v2620_v43, %v2615_v61 }
0x151f   :  { %5489 = vmatprep.mubr.msk.bf16.mxu0 %vm6361_vm0, %v6360_v0 }
0x1520   :  { %v2626_v47 = vmul.f32 %v2620_v43, %v2616_v18  ;;  %v2635_v57 = vadd.f32 %v2630_v33, %v2625_v44 }
0x1522   :  { %v2636_v12 = vadd.f32 %v2630_v33, %v2626_v47 }
0x1524   :  { %v2639_v13 = vpack.c.bf16 %v2636_v12, %v2635_v57 }
0x1526   :  { %5490 = vmatmul.mubr.msk.bf16.gmra.mrb[84].mxu0 %vm295_vm2, %v2639_v13 }
0x15e7   :  { %v7319_v1 = vpop.f32.mrb[76].mxu0 }
0x15e8   :  { %v2727_v20 = vadd.f32 %v2726_v3, %v7319_v1  ;;  %v5483_v37 = vpop.f32.mrb[77].mxu0  ;;  %v2747_v36 = vadd.f32 %v2745_v2, %v7319_v1 }
0x15e9   :  { %v7322_v35 = vpop.f32.mrb[78].mxu0 }
0x15ea   :  { %v2728_v52 = vadd.f32 %v2726_v3, %v7322_v35  ;;  %v2748_v30 = vadd.f32 %v2745_v2, %v7322_v35  ;;  %v5484_v41 = vpop.f32.mrb[79].mxu0  ;;  %v2733_v56 = vmul.f32 0.35355338, %v2727_v20 }
0x15ec   :  { %v2734_v43 = vmul.f32 0.35355338, %v2728_v52  ;;  %v7327_v53 = vpack.c.bf16 %v2748_v30, %v2747_v36 }
0x15ee   :  { %v7329_v8 = vpack.c.bf16 %v2734_v43, %v2733_v56  ;;  %2786 = vrot.lane.b32.xlu0 %v7327_v53, %s6363_s21 }
0x15f0   :  { %5497 = vmatprep.mubr.msk.bf16.mxu1 %vm546_vm3, %v7329_v8 }
0x15f1   :  { %v7335_v63 = vpop.f32.mrb[80].mxu0 }
0x15f2   :  { %v2729_v17 = vadd.f32 %v2726_v3, %v7335_v63  ;;  %v2749_v33 = vadd.f32 %v2745_v2, %v7335_v63  ;;  %v5487_v23 = vpop.f32.mrb[81].mxu0 }
0x15f3   :  { %v7339_v28 = vpop.f32.mrb[82].mxu0 }
0x15f4   :  { %v7341_v11 = vpack.c.bf16 %v2749_v33, %v2749_v33  ;;  %v5488_v19 = vpop.f32.mrb[83].mxu0  ;;  %v2730_v31 = vadd.f32 %v2726_v3, %v7339_v28  ;;  %v2750_v27 = vadd.f32 %v2745_v2, %v7339_v28  ;;  %v2735_v21 = vmul.f32 0.35355338, %v2729_v17 }
0x15f6   :  { %2788 = vrot.lane.b32.xlu1 %v7341_v11, %s6363_s21  ;;  %v2736_v38 = vmul.f32 0.35355338, %v2730_v31  ;;  %v7371_v18 = vpack.c.bf16 %v2735_v21, %v2735_v21 }
0x15f9   :  { %v7346_v40 = vpop.f32.mrb[84].mxu0 }
0x15fa   :  { %v2731_v9 = vadd.f32 %v2726_v3, %v7346_v40  ;;  %v2751_v51 = vadd.f32 %v2745_v2, %v7346_v40  ;;  %v5491_v42 = vpop.f32.mrb[85].mxu0 }
0x15fb   :  { %v7351_v39 = vpop.f32.mrb[86].mxu0 }
0x15fc   :  { %v2737_v24 = vmul.f32 0.35355338, %v2731_v9  ;;  %v7353_v16 = vpack.c.bf16 %v2751_v51, %v2750_v27  ;;  %v2732_v14 = vadd.f32 %v2726_v3, %v7351_v39  ;;  %v2752_v32 = vadd.f32 %v2745_v2, %v7351_v39  ;;  %v5492_v58 = vpop.f32.mrb[87].mxu0 }
0x15fe   :  { %v7357_v6 = vpack.c.bf16 %v2737_v24, %v2736_v38  ;;  %v7359_v60 = vpack.c.bf16 %v2752_v32, %v2752_v32  ;;  %2852 = vrot.lane.b32.xlu1 %v7353_v16, %s6363_s21  ;;  %v2738_v13 = vmul.f32 0.35355338, %v2732_v14  ;;  %v2756_v14 = vrot.slane %v7296_v26, %v512_v46 }
0x1600   :  { %5505 = vmatprep.mubr.msk.bf16.mxu0 %vm546_vm3, %v7357_v6  ;;  %2854 = vrot.lane.b32.xlu0 %v7359_v60, %s6363_s21  ;;  %v7379_v3 = vpack.c.bf16 %v2738_v13, %v2738_v13 }
0x1660   :  { %v2787_v50 = vpop.permute.xlu0 %2786 }
0x1661   :  { %5745 = vmatprep.subr.msk.bf16.mxu1 %vm546_vm3, %v2787_v50  ;;  %v2797_v22 = vsel %vm546_vm3, %v2787_v50, 0 }
0x1662   :  { %5494 = vmatpush3.bf16.xpose.msra.mxu1 %v2797_v22 }
0x1668   :  { %v2789_v55 = vpop.permute.xlu1 %2788 }
0x1669   :  { %5746 = vmatprep.subr.msk.bf16.mxu1 %vm546_vm3, %v2789_v55  ;;  %v2800_v61 = vsel %vm546_vm3, %v2789_v55, 0 }
0x166a   :  { %5496 = vmatpush3.bf16.xpose.msra.mxu1 %v2800_v61 }
0x1670   :  { %v2853_v44 = vpop.permute.xlu1 %2852 }
0x1671   :  { %5498 = vmatmul.mubr.msk.bf16.vlgmr.msra.gmra.mrb[84].mxu1 %vm546_vm3, %v7371_v18  ;;  %5747 = vmatprep.subr.msk.bf16.mxu0 %vm546_vm3, %v2853_v44  ;;  %v2863_v47 = vsel %vm546_vm3, %v2853_v44, 0 }
0x1672   :  { %5502 = vmatpush3.bf16.xpose.msra.mxu0 %v2863_v47  ;;  %v2855_v57 = vpop.permute.xlu0 %2854 }
0x1673   :  { %5748 = vmatprep.subr.msk.bf16.mxu0 %vm546_vm3, %v2855_v57  ;;  %v2866_v12 = vsel %vm546_vm3, %v2855_v57, 0 }
0x167a   :  { %5504 = vmatpush3.bf16.xpose.msra.mxu0 %v2866_v12 }
0x1681   :  { %5506 = vmatmul.mubr.msk.bf16.vlgmr.msra.gmra.mrb[88].mxu0 %vm546_vm3, %v7379_v3 }
0x1744   :  { %v5499_v2 = vpop.f32.mrb[84].mxu1 }
0x1745   :  { %v2836_v20 = vpop.f32.mrb[85].mxu1  ;;  %v2845_v56 = vadd.f32 %v5499_v2, %v6760_v59 }
0x1746   :  { %v2837_v37 = vadd.f32 %v2836_v20, %v6760_v59  ;;  %v5500_v36 = vpop.f32.mrb[86].mxu1 }
0x1747   :  { %v2839_v52 = vpop.f32.mrb[87].mxu1  ;;  %v2922_v17 = vsel %vm673_vm5, %v2845_v56, -inf }
0x1748   :  { %v2840_v30 = vadd.f32 %v2839_v52, %v6760_v59  ;;  %v2916_v41 = vsel %vm673_vm5, %v2837_v37, -inf }
0x1749   :  { %2917 = vmax.xlane.f32.xlu1 %v2916_v41 }
0x174a   :  { %v2919_v43 = vsel %vm673_vm5, %v2840_v30, -inf }
0x174b   :  { %2920 = vmax.xlane.f32.xlu0 %v2919_v43 }
0x174f   :  { %2923 = vmax.xlane.f32.xlu0 %v2922_v17 }
0x1754   :  { %v5507_v33 = vpop.f32.mrb[88].mxu0 }
0x1755   :  { %v2902_v23 = vpop.f32.mrb[89].mxu0  ;;  %v2911_v9 = vadd.f32 %v5507_v33, %v6760_v59 }
0x1756   :  { %v2903_v19 = vadd.f32 %v2902_v23, %v6760_v59  ;;  %v5508_v31 = vpop.f32.mrb[90].mxu0 }
0x1757   :  { %v2905_v27 = vpop.f32.mrb[91].mxu0  ;;  %v2931_v24 = vsel %vm673_vm5, %v2911_v9, -inf }
0x1758   :  { %v2906_v51 = vadd.f32 %v2905_v27, %v6760_v59  ;;  %v2925_v42 = vsel %vm673_vm5, %v2903_v19, -inf }
0x1759   :  { %2926 = vmax.xlane.f32.xlu1 %v2925_v42 }
0x175a   :  { %v2928_v38 = vsel %vm673_vm5, %v2906_v51, -inf }
0x175b   :  { %2929 = vmax.xlane.f32.xlu0 %v2928_v38 }
0x175d   :  { %2932 = vmax.xlane.f32.xlu1 %v2931_v24 }
0x1771   :  { %2758 = vrot.lane.b32.xlu0 %v2756_v14, %s6348_s25 }
0x17d8   :  { %v2921_v32 = vpop.xlane.xlu0 %2920 }
0x17d9   :  { %v2935_v2 = vsub.f32 %v2840_v30, %v2921_v32 }
0x17db   :  { %v2942_v36 = vmul.f32 1.442695, %v2935_v2 }
0x17dc   :  { %v2924_v58 = vpop.xlane.xlu0 %2923 }
0x17e8   :  { %v2930_v50 = vpop.xlane.xlu0 %2929 }
0x17e9   :  { %v2938_v17 = vsub.f32 %v2906_v51, %v2930_v50 }
0x17eb   :  { %v2948_v23 = vmul.f32 1.442695, %v2938_v17 }
0x17ec   :  { %v2759_v22 = vpop.permute.xlu0 %2758 }
0x17ed   :  { %v2761_v55 = vadd.f32 %v2759_v22, %v7319_v1  ;;  %v2762_v61 = vadd.f32 %v2759_v22, %v7322_v35  ;;  %v2763_v21 = vadd.f32 %v2759_v22, %v7335_v63  ;;  %v2764_v44 = vadd.f32 %v2759_v22, %v7339_v28  ;;  %v2918_v35 = vpop.xlane.xlu1 %2917 }
0x17ee   :  { %v2765_v47 = vadd.f32 %v2759_v22, %v7346_v40  ;;  %v2766_v26 = vadd.f32 %v2759_v22, %v7351_v39  ;;  %v2936_v63 = vsub.f32 %v2845_v56, %v2924_v58  ;;  %v2934_v40 = vsub.f32 %v2837_v37, %v2918_v35 }
0x17ef   :  { %v7404_v57 = vpack.c.bf16 %v2762_v61, %v2761_v55  ;;  %v7406_v12 = vpack.c.bf16 %v2763_v21, %v2763_v21 }
0x17f0   :  { %v7408_v46 = vpack.c.bf16 %v2765_v47, %v2764_v44  ;;  %v7419_v1 = vpack.c.bf16 %v2766_v26, %v2766_v26  ;;  %v2944_v13 = vmul.f32 1.442695, %v2936_v63  ;;  %v2940_v39 = vmul.f32 1.442695, %v2934_v40 }
0x17f1   :  { %2988 = vrot.lane.b32.xlu0 %v7404_v57, %s6348_s25  ;;  %2990 = vrot.lane.b32.xlu1 %v7406_v12, %s6348_s25  ;;  %v2927_v28 = vpop.xlane.xlu1 %2926 }
0x17f2   :  { %5966 = vpow2.f32 %v2944_v13  ;;  %v2937_v41 = vsub.f32 %v2903_v19, %v2927_v28 }
0x17f3   :  { %5968 = vpow2.f32 %v2940_v39 }
0x17f4   :  { %5970 = vpow2.f32 %v2942_v36  ;;  %v2946_v43 = vmul.f32 1.442695, %v2937_v41 }
0x17f5   :  { %3052 = vrot.lane.b32.xlu0 %v7408_v46, %s6348_s25  ;;  %v2933_v20 = vpop.xlane.xlu1 %2932 }
0x17f6   :  { %v2939_v52 = vsub.f32 %v2911_v9, %v2933_v20 }
0x17f8   :  { %v2950_v37 = vmul.f32 1.442695, %v2939_v52 }
0x17f9   :  { %3123 = vrot.lane.b32.xlu0 %v7327_v53, %s6365_s29 }
0x17fa   :  { %5972 = vpow2.f32 %v2950_v37 }
0x17fb   :  { %5974 = vpow2.f32 %v2946_v43 }
0x17fc   :  { %v5967_v56 = vpop.eup %5966  ;;  %5976 = vpow2.f32 %v2948_v23 }
0x17fd   :  { %3054 = vrot.lane.b32.xlu0 %v7419_v1, %s6348_s25  ;;  %v2958_v30 = vsel %vm673_vm5, %v5967_v56, 0.0  ;;  %v5969_v33 = vpop.eup %5968  ;;  %s6374_s25 = smov [#allocation19]  }
0x17fe   :  { %v2952_v31 = vsel %vm673_vm5, %v5969_v33, 0.0  ;;  %v5971_v27 = vpop.eup %5970  ;;  %s4872_s13 = sshll.u32 %s6374_s25, 4  ;;  %s4873_s13 = int_to_ptr.vmem [resolvable:$true] %s4872_s13 }
0x17ff   :  { %v2955_v9 = vsel %vm673_vm5, %v5971_v27, 0.0  ;;  %s6310_s17 = scalar_lea.vmem %s4873_s13, 32  ;;  %p6315_p11 = scmp.lt.s32.totalorder %s4873_s13, %s4873_s13 }
0x1800   :  { %p6311_p10 = scmp.ne.s32.totalorder %s4873_s13, %s6310_s17  ;;  %p6316_p12 = scmp.lt.s32.totalorder %s6310_s17, %s6310_s17 }
0x1801   :  { %3125 = vrot.lane.b32.xlu0 %v7341_v11, %s6365_s29 }
0x1802   :  { %p6317_p13 = por %p6316_p12, %p6315_p11 }
0x1804   :  { %v7434_v42 = vpop.eup %5972  ;;  %p6318_p0 = pnand %p6317_p13, %p6311_p10 }
0x1805   :  { %3193 = vrot.lane.b32.xlu0 %v7353_v16, %s6365_s29  ;;  %v2967_v19 = vsel %vm673_vm5, %v7434_v42, 0.0  ;;  %v5975_v51 = vpop.eup %5974 }
0x1806   :  { %v2961_v38 = vsel %vm673_vm5, %v5975_v51, 0.0  ;;  %v5977_v24 = vpop.eup %5976 }
0x1807   :  { %v2964_v14 = vsel %vm673_vm5, %v5977_v24, 0.0 }
0x1809   :  { %3121 = vrot.lane.b32.xlu0 %v7371_v18, %s6366_s0 }
0x180d   :  { %3189 = vrot.lane.b32.xlu0 %v7357_v6, %s6366_s0 }
0x1815   :  { %2959 = vadd.xlane.f32.xlu1 %v2958_v30 }
0x1819   :  { %2953 = vadd.xlane.f32.xlu1 %v2952_v31 }
0x181d   :  { %2956 = vadd.xlane.f32.xlu1 %v2955_v9 }
0x1821   :  { %2968 = vadd.xlane.f32.xlu1 %v2967_v19 }
0x1825   :  { %2962 = vadd.xlane.f32.xlu1 %v2961_v38 }
0x1829   :  { %2965 = vadd.xlane.f32.xlu1 %v2964_v14 }
0x183a   :  { %3119 = vrot.lane.b32.xlu1 %v7329_v8, %s6366_s0 }
0x183e   :  { %3195 = vrot.lane.b32.xlu1 %v7359_v60, %s6365_s29 }
0x1842   :  { %3191 = vrot.lane.b32.xlu1 %v7379_v3, %s6366_s0 }
0x1863   :  { %v2989_v32 = vpop.permute.xlu0 %2988  ;;  %v2991_v58 = vpop.permute.xlu1 %2990 }
0x1864   :  { %5509 = vmatprep.subr.bf16.mxu1 %v2989_v32  ;;  %v3000_v22 = vsel %vm757_vm6, %v2991_v58, 0 }
0x1865   :  { %5510 = vmatpush3.bf16.msra.mxu1 %v2989_v32 }
0x1866   :  { %5749 = vmatprep.subr.msk.bf16.mxu1 %vm757_vm6, %v2991_v58 }
0x1867   :  { %v3053_v50 = vpop.permute.xlu0 %3052 }
0x1868   :  { %5517 = vmatprep.subr.bf16.mxu0 %v3053_v50 }
0x1869   :  { %5512 = vmatpush3.bf16.msra.mxu1 %v3000_v22  ;;  %5518 = vmatpush3.bf16.msra.mxu0 %v3053_v50 }
0x186b   :  { %v3124_v55 = vpop.permute.xlu0 %3123 }
0x186c   :  { %5751 = vmatprep.subr.msk.bf16.mxu1 %vm546_vm3, %v3124_v55  ;;  %v3134_v30 = vsel %vm546_vm3, %v3124_v55, 0 }
0x186f   :  { %v3055_v61 = vpop.permute.xlu0 %3054 }
0x1870   :  { %v3064_v21 = vsel %vm757_vm6, %v3055_v61, 0  ;;  %5750 = vmatprep.subr.msk.bf16.mxu0 %vm757_vm6, %v3055_v61 }
0x1871   :  { %5520 = vmatpush3.bf16.msra.mxu0 %v3064_v21 }
0x1873   :  { %v3126_v44 = vpop.permute.xlu0 %3125 }
0x1874   :  { %v3137_v38 = vsel %vm546_vm3, %v3126_v44, 0 }
0x1877   :  { %v3194_v47 = vpop.permute.xlu0 %3193 }
0x1878   :  { %5753 = vmatprep.subr.msk.bf16.mxu0 %vm546_vm3, %v3194_v47  ;;  %v3204_v58 = vsel %vm546_vm3, %v3194_v47, 0 }
0x18a2   :  { %v2960_v26 = vpop.xlane.xlu1 %2959 }
0x18a3   :  { %5978 = vrcp.f32 %v2960_v26 }
0x18a6   :  { %v2954_v35 = vpop.xlane.xlu1 %2953 }
0x18a7   :  { %5980 = vrcp.f32 %v2954_v35 }
0x18aa   :  { %v2957_v63 = vpop.xlane.xlu1 %2956 }
0x18ab   :  { %5982 = vrcp.f32 %v2957_v63 }
0x18ad   :  { %v5979_v40 = vpop.eup %5978 }
0x18ae   :  { %v2969_v28 = vpop.xlane.xlu1 %2968  ;;  %v2978_v20 = vmul.f32 %v5979_v40, %v5967_v56 }
0x18af   :  { %5984 = vrcp.f32 %v2969_v28 }
0x18b0   :  { %v2983_v43 = vpack.c.bf16 %v2978_v20, %v2978_v20 }
0x18b1   :  { %v5981_v39 = vpop.eup %5980 }
0x18b2   :  { %v2963_v13 = vpop.xlane.xlu1 %2962  ;;  %v2976_v52 = vmul.f32 %v5981_v39, %v5969_v33  ;;  %v3122_v33 = vpop.permute.xlu0 %3121 }
0x18b3   :  { %5986 = vrcp.f32 %v2963_v13 }
0x18b5   :  { %v5983_v2 = vpop.eup %5982 }
0x18b6   :  { %v2966_v36 = vpop.xlane.xlu1 %2965  ;;  %v2977_v41 = vmul.f32 %v5983_v2, %v5971_v27  ;;  %v3190_v50 = vpop.permute.xlu0 %3189 }
0x18b7   :  { %5988 = vrcp.f32 %v2966_v36 }
0x18b8   :  { %v2982_v37 = vpack.c.bf16 %v2977_v41, %v2976_v52 }
0x18b9   :  { %v5985_v56 = vpop.eup %5984 }
0x18ba   :  { %5513 = vmatprep.mubr.msk.bf16.mxu1 %vm673_vm5, %v2982_v37  ;;  %v3120_v17 = vpop.permute.xlu1 %3119  ;;  %v2981_v27 = vmul.f32 %v5985_v56, %v7434_v42 }
0x18bb   :  { %5514 = vmatmul.mubr.msk.bf16.vlgmr.msra.gmra.mrb[88].mxu1 %vm673_vm5, %v2983_v43 }
0x18bc   :  { %5526 = vmatpush3.bf16.xpose.msra.mxu1 %v3134_v30  ;;  %5529 = vmatprep.mubr.msk.bf16.mxu1 %vm546_vm3, %v3120_v17  ;;  %v2985_v32 = vpack.c.bf16 %v2981_v27, %v2981_v27 }
0x18bd   :  { %5752 = vmatprep.subr.msk.bf16.mxu1 %vm546_vm3, %v3126_v44  ;;  %v5987_v23 = vpop.eup %5986 }
0x18be   :  { %v2979_v9 = vmul.f32 %v5987_v23, %v5975_v51  ;;  %v3196_v22 = vpop.permute.xlu1 %3195 }
0x18bf   :  { %v3207_v42 = vsel %vm546_vm3, %v3196_v22, 0 }
0x18c1   :  { %v5989_v31 = vpop.eup %5988 }
0x18c2   :  { %v2980_v19 = vmul.f32 %v5989_v31, %v5977_v24  ;;  %v3192_v51 = vpop.permute.xlu1 %3191 }
0x18c4   :  { %5528 = vmatpush3.bf16.xpose.msra.mxu1 %v3137_v38  ;;  %v2984_v14 = vpack.c.bf16 %v2980_v19, %v2979_v9 }
0x18c6   :  { %5521 = vmatprep.mubr.msk.bf16.mxu0 %vm673_vm5, %v2984_v14 }
0x18c7   :  { %5522 = vmatmul.mubr.msk.bf16.vlgmr.msra.gmra.mrb[92].mxu0 %vm673_vm5, %v2985_v32 }
0x18c8   :  { %5534 = vmatpush3.bf16.xpose.msra.mxu0 %v3204_v58  ;;  %5537 = vmatprep.mubr.msk.bf16.mxu0 %vm546_vm3, %v3190_v50 }
0x18c9   :  { %5754 = vmatprep.subr.msk.bf16.mxu0 %vm546_vm3, %v3196_v22 }
0x18cb   :  { %5530 = vmatmul.mubr.msk.bf16.vlgmr.msra.gmra.mrb[92].mxu1 %vm546_vm3, %v3122_v33 }
0x18d0   :  { %5536 = vmatpush3.bf16.xpose.msra.mxu0 %v3207_v42 }
0x18d7   :  { %5538 = vmatmul.mubr.msk.bf16.vlgmr.msra.gmra.mrb[96].mxu0 %vm546_vm3, %v3192_v51 }
0x198e   :  { %v7467_v24 = vpop.f32.mrb[88].mxu1 }
0x198f   :  { %v7469_v55 = vpop.f32.mrb[89].mxu1 }
0x1990   :  { %v5516_v61 = vpop.f32.mrb[90].mxu1 }
0x1991   :  { %v7471_v21 = vpop.f32.mrb[91].mxu1 }
0x1992   :  { %v3114_v44 = vpack.c.bf16 %v7471_v21, %v7469_v55 }
0x199a   :  { %v7475_v47 = vpop.f32.mrb[92].mxu0 }
0x199b   :  { %v7477_v26 = vpop.f32.mrb[93].mxu0 }
0x199c   :  { %v3115_v35 = vpack.c.bf16 %v7477_v26, %v7467_v24  ;;  %v5524_v63 = vpop.f32.mrb[94].mxu0 }
0x199d   :  { %v7481_v28 = vpop.f32.mrb[95].mxu0 }
0x199e   :  { %v3116_v40 = vpack.c.bf16 %v7475_v47, %v7481_v28  ;;  %v5531_v13 = vpop.f32.mrb[92].mxu1 }
0x199f   :  { %v3173_v39 = vpop.f32.mrb[93].mxu1  ;;  %v3182_v52 = vadd.f32 %v5531_v13, %v6760_v59 }
0x19a0   :  { %v3174_v2 = vadd.f32 %v3173_v39, %v6760_v59  ;;  %v5532_v20 = vpop.f32.mrb[94].mxu1 }
0x19a1   :  { %v3176_v36 = vpop.f32.mrb[95].mxu1  ;;  %v3263_v17 = vsel %vm673_vm5, %v3182_v52, -inf }
0x19a2   :  { %v3177_v41 = vadd.f32 %v3176_v36, %v6760_v59  ;;  %v3257_v37 = vsel %vm673_vm5, %v3174_v2, -inf }
0x19a3   :  { %3258 = vmax.xlane.f32.xlu0 %v3257_v37 }
0x19a4   :  { %v3260_v43 = vsel %vm673_vm5, %v3177_v41, -inf }
0x19a5   :  { %3261 = vmax.xlane.f32.xlu1 %v3260_v43 }
0x19a7   :  { %3264 = vmax.xlane.f32.xlu0 %v3263_v17 }
0x19aa   :  { %v5539_v30 = vpop.f32.mrb[96].mxu0 }
0x19ab   :  { %v3243_v56 = vpop.f32.mrb[97].mxu0  ;;  %v3252_v27 = vadd.f32 %v5539_v30, %v6760_v59 }
0x19ac   :  { %v3244_v23 = vadd.f32 %v3243_v56, %v6760_v59  ;;  %v5540_v31 = vpop.f32.mrb[98].mxu0 }
0x19ad   :  { %v3246_v33 = vpop.f32.mrb[99].mxu0  ;;  %v3272_v14 = vsel %vm673_vm5, %v3252_v27, -inf }
0x19ae   :  { %v3247_v9 = vadd.f32 %v3246_v33, %v6760_v59  ;;  %v3266_v19 = vsel %vm673_vm5, %v3244_v23, -inf }
0x19af   :  { %3267 = vmax.xlane.f32.xlu0 %v3266_v19 }
0x19b0   :  { %v3269_v38 = vsel %vm673_vm5, %v3247_v9, -inf }
0x19b1   :  { %3270 = vmax.xlane.f32.xlu1 %v3269_v38 }
0x19b3   :  { %3273 = vmax.xlane.f32.xlu0 %v3272_v14 }
0x19c2   :  { %3327 = vrot.lane.b32.xlu1 %v7404_v57, %s6367_s4 }
0x1a30   :  { %v3259_v32 = vpop.xlane.xlu0 %3258 }
0x1a31   :  { %v3275_v50 = vsub.f32 %v3174_v2, %v3259_v32 }
0x1a32   :  { %v3262_v58 = vpop.xlane.xlu1 %3261 }
0x1a33   :  { %v3276_v22 = vsub.f32 %v3177_v41, %v3262_v58  ;;  %v3281_v63 = vmul.f32 1.442695, %v3275_v50 }
0x1a34   :  { %v3265_v42 = vpop.xlane.xlu0 %3264 }
0x1a35   :  { %v3283_v51 = vmul.f32 1.442695, %v3276_v22  ;;  %v3277_v61 = vsub.f32 %v3182_v52, %v3265_v42 }
0x1a37   :  { %5990 = vpow2.f32 %v3283_v51  ;;  %v3285_v13 = vmul.f32 1.442695, %v3277_v61 }
0x1a39   :  { %5992 = vpow2.f32 %v3285_v13 }
0x1a3a   :  { %5994 = vpow2.f32 %v3281_v63 }
0x1a3c   :  { %v3268_v39 = vpop.xlane.xlu0 %3267 }
0x1a3d   :  { %v3278_v36 = vsub.f32 %v3244_v23, %v3268_v39 }
0x1a3e   :  { %v3271_v20 = vpop.xlane.xlu1 %3270 }
0x1a3f   :  { %v3287_v2 = vmul.f32 1.442695, %v3278_v36  ;;  %v3279_v32 = vsub.f32 %v3247_v9, %v3271_v20 }
0x1a40   :  { %v3274_v37 = vpop.xlane.xlu0 %3273 }
0x1a41   :  { %v5991_v43 = vpop.eup %5990  ;;  %v3280_v17 = vsub.f32 %v3252_v27, %v3274_v37  ;;  %v3289_v58 = vmul.f32 1.442695, %v3279_v32 }
0x1a42   :  { %v3328_v30 = vpop.permute.xlu1 %3327  ;;  %v3296_v56 = vsel %vm673_vm5, %v5991_v43, 0.0 }
0x1a43   :  { %v5993_v31 = vpop.eup %5992  ;;  %v3291_v41 = vmul.f32 1.442695, %v3280_v17  ;;  %3297 = vadd.xlane.f32.xlu0 %v3296_v56  ;;  %5541 = vmatprep.subr.bf16.mxu1 %v3328_v30 }
0x1a44   :  { %5542 = vmatpush3.bf16.msra.mxu1 %v3328_v30  ;;  %v3299_v52 = vsel %vm673_vm5, %v5993_v31, 0.0  ;;  %v5995_v33 = vpop.eup %5994 }
0x1a45   :  { %5996 = vpow2.f32 %v3291_v41  ;;  %3300 = vadd.xlane.f32.xlu1 %v3299_v52  ;;  %v3293_v23 = vsel %vm673_vm5, %v5995_v33, 0.0  ;;  %v2769_v41 = vld [vmem:[#allocation10 + $0x14] sm:$0xf] }
0x1a46   :  { %5998 = vpow2.f32 %v3287_v2 }
0x1a47   :  { %6000 = vpow2.f32 %v3289_v58 }
0x1a49   :  { %3294 = vadd.xlane.f32.xlu1 %v3293_v23 }
0x1a4f   :  { %v7502_v19 = vpop.eup %5996 }
0x1a50   :  { %v3308_v27 = vsel %vm673_vm5, %v7502_v19, 0.0  ;;  %v7506_v38 = vpop.eup %5998 }
0x1a51   :  { %3309 = vadd.xlane.f32.xlu0 %v3308_v27  ;;  %v3302_v14 = vsel %vm673_vm5, %v7506_v38, 0.0  ;;  %v6001_v50 = vpop.eup %6000  ;;  %v3464_v27 = vsel %vm757_vm6, %v2769_v41, 0 }
0x1a52   :  { %v3305_v9 = vsel %vm673_vm5, %v6001_v50, 0.0 }
0x1a55   :  { %3303 = vadd.xlane.f32.xlu0 %v3302_v14 }
0x1a5a   :  { %3389 = vrot.lane.b32.xlu1 %v7408_v46, %s6367_s4 }
0x1a6b   :  { %3329 = vrot.lane.b32.xlu0 %v7406_v12, %s6367_s4 }
0x1a6f   :  { %3596 = vrot.lane.b32.xlu0 %v7327_v53, %s6368_s19 }
0x1a73   :  { %3664 = vrot.lane.b32.xlu0 %v7353_v16, %s6368_s19 }
0x1a77   :  { %3594 = vrot.lane.b32.xlu0 %v7371_v18, %s6369_s15 }
0x1a7b   :  { %3660 = vrot.lane.b32.xlu0 %v7357_v6, %s6369_s15 }
0x1a7e   :  { %3306 = vadd.xlane.f32.xlu1 %v3305_v9 }
0x1a8f   :  { %3391 = vrot.lane.b32.xlu1 %v7419_v1, %s6367_s4 }
0x1a93   :  { %3598 = vrot.lane.b32.xlu1 %v7341_v11, %s6368_s19 }
0x1a97   :  { %3592 = vrot.lane.b32.xlu1 %v7329_v8, %s6369_s15 }
0x1a9b   :  { %3666 = vrot.lane.b32.xlu1 %v7359_v60, %s6368_s19 }
0x1a9f   :  { %3662 = vrot.lane.b32.xlu1 %v7379_v3, %s6369_s15 }
0x1ad0   :  { %v3298_v22 = vpop.xlane.xlu0 %3297 }
0x1ad1   :  { %6002 = vrcp.f32 %v3298_v22 }
0x1ad2   :  { %v3301_v42 = vpop.xlane.xlu1 %3300 }
0x1ad6   :  { %v3295_v51 = vpop.xlane.xlu1 %3294 }
0x1ad7   :  { %6004 = vrcp.f32 %v3295_v51 }
0x1ad8   :  { %6006 = vrcp.f32 %v3301_v42 }
0x1ada   :  { %v3390_v61 = vpop.permute.xlu1 %3389 }
0x1adb   :  { %5549 = vmatprep.subr.bf16.mxu0 %v3390_v61  ;;  %v6003_v13 = vpop.eup %6002 }
0x1adc   :  { %5550 = vmatpush3.bf16.msra.mxu0 %v3390_v61  ;;  %v3318_v17 = vmul.f32 %v6003_v13, %v5991_v43  ;;  %v2768_v61 = vld [vmem:[#allocation10 + $0x10] sm:$0xf] }
0x1ade   :  { %v3310_v63 = vpop.xlane.xlu0 %3309 }
0x1adf   :  { %6008 = vrcp.f32 %v3310_v63 }
0x1ae1   :  { %v6005_v39 = vpop.eup %6004 }
0x1ae2   :  { %v6007_v20 = vpop.eup %6006  ;;  %v3304_v36 = vpop.xlane.xlu0 %3303  ;;  %v3317_v37 = vmul.f32 %v6005_v39, %v5995_v33 }
0x1ae3   :  { %v3319_v56 = vmul.f32 %v6007_v20, %v5993_v31  ;;  %6010 = vrcp.f32 %v3304_v36  ;;  %v3533_v20 = vsel %vm757_vm6, %v2768_v61, 0 }
0x1ae4   :  { %v3323_v30 = vpack.c.bf16 %v3318_v17, %v3317_v37 }
0x1ae5   :  { %v3324_v23 = vpack.c.bf16 %v3319_v56, %v3319_v56 }
0x1ae6   :  { %v3330_v2 = vpop.permute.xlu0 %3329  ;;  %5545 = vmatprep.mubr.msk.bf16.mxu1 %vm673_vm5, %v3323_v30 }
0x1ae7   :  { %v3339_v52 = vsel %vm757_vm6, %v3330_v2, 0  ;;  %5755 = vmatprep.subr.msk.bf16.mxu1 %vm757_vm6, %v3330_v2 }
0x1ae8   :  { %5544 = vmatpush3.bf16.msra.mxu1 %v3339_v52 }
0x1ae9   :  { %5557 = vmatprep.subr.bf16.mxu1 %v6360_v0  ;;  %v6009_v32 = vpop.eup %6008 }
0x1aea   :  { %v3597_v33 = vpop.permute.xlu0 %3596  ;;  %v3322_v22 = vmul.f32 %v6009_v32, %v7502_v19 }
0x1aeb   :  { %5546 = vmatmul.mubr.msk.bf16.vlgmr.msra.gmra.mrb[96].mxu1 %vm673_vm5, %v3324_v23  ;;  %v3607_v56 = vsel %vm546_vm3, %v3597_v33, 0 }
0x1aec   :  { %5558 = vmatpush3.bf16.msra.mxu1 %v3464_v27  ;;  %5559 = vmatprep.mubr.msk.bf16.mxu1 %vm6361_vm0, %v6360_v0  ;;  %v3326_v39 = vpack.c.bf16 %v3322_v22, %v3322_v22 }
0x1aed   :  { %5757 = vmatprep.subr.msk.bf16.mxu1 %vm546_vm3, %v3597_v33  ;;  %v6011_v58 = vpop.eup %6010 }
0x1aee   :  { %v3320_v42 = vmul.f32 %v6011_v58, %v7506_v38  ;;  %v3665_v36 = vpop.permute.xlu0 %3664 }
0x1aef   :  { %v3675_v38 = vsel %vm546_vm3, %v3665_v36, 0 }
0x1af2   :  { %v3595_v55 = vpop.permute.xlu0 %3594 }
0x1af6   :  { %v3661_v21 = vpop.permute.xlu0 %3660 }
0x1b0b   :  { %v3307_v43 = vpop.xlane.xlu1 %3306 }
0x1b0c   :  { %6012 = vrcp.f32 %v3307_v43 }
0x1b0f   :  { %v3392_v31 = vpop.permute.xlu1 %3391 }
0x1b10   :  { %v3401_v14 = vsel %vm757_vm6, %v3392_v31, 0  ;;  %5756 = vmatprep.subr.msk.bf16.mxu0 %vm757_vm6, %v3392_v31 }
0x1b11   :  { %5552 = vmatpush3.bf16.msra.mxu0 %v3401_v14 }
0x1b12   :  { %5571 = vmatprep.subr.bf16.mxu0 %v6360_v0 }
0x1b13   :  { %v3599_v13 = vpop.permute.xlu1 %3598 }
0x1b14   :  { %v3610_v47 = vsel %vm546_vm3, %v3599_v13, 0 }
0x1b16   :  { %v6013_v9 = vpop.eup %6012 }
0x1b17   :  { %v3321_v51 = vmul.f32 %v6013_v9, %v6001_v50  ;;  %v3593_v19 = vpop.permute.xlu1 %3592 }
0x1b19   :  { %v3325_v63 = vpack.c.bf16 %v3321_v51, %v3320_v42 }
0x1b1b   :  { %5553 = vmatprep.mubr.msk.bf16.mxu0 %vm673_vm5, %v3325_v63  ;;  %v3667_v50 = vpop.permute.xlu1 %3666 }
0x1b1c   :  { %5554 = vmatmul.mubr.msk.bf16.vlgmr.msra.gmra.mrb[100].mxu0 %vm673_vm5, %v3326_v39  ;;  %v3678_v37 = vsel %vm546_vm3, %v3667_v50, 0 }
0x1b1d   :  { %5572 = vmatpush3.bf16.msra.mxu0 %v3533_v20  ;;  %5573 = vmatprep.mubr.msk.bf16.mxu0 %vm6361_vm0, %v6360_v0 }
0x1b1e   :  { %5759 = vmatprep.subr.msk.bf16.mxu0 %vm546_vm3, %v3665_v36 }
0x1b24   :  { %5574 = vmatmul.mubr.msk.bf16.vlgmr.msra.gmra.mrb[104].mxu0 %vm546_vm3, %v3114_v44  ;;  %v3663_v44 = vpop.permute.xlu1 %3662 }
0x1b25   :  { %5577 = vmatprep.mubr.msk.bf16.mxu0 %vm6361_vm0, %v6360_v0 }
0x1b26   :  { %5594 = vmatpush3.bf16.xpose.msra.mxu0 %v3675_v38 }
0x1b27   :  { %5760 = vmatprep.subr.msk.bf16.mxu0 %vm546_vm3, %v3667_v50 }
0x1b2c   :  { %5578 = vmatmul.mubr.msk.bf16.gmra.mrb[108].mxu0 %vm546_vm3, %v3115_v35 }
0x1b2d   :  { %5581 = vmatprep.mubr.msk.bf16.mxu0 %vm6361_vm0, %v6360_v0 }
0x1b2e   :  { %5596 = vmatpush3.bf16.xpose.msra.mxu0 %v3678_v37 }
0x1b34   :  { %5582 = vmatmul.mubr.msk.bf16.gmra.mrb[112].mxu0 %vm546_vm3, %v3116_v40 }
0x1b35   :  { %5597 = vmatprep.mubr.msk.bf16.mxu0 %vm546_vm3, %v3661_v21 }
0x1b3c   :  { %5598 = vmatmul.mubr.msk.bf16.vlgmr.msra.gmra.mrb[116].mxu0 %vm546_vm3, %v3663_v44 }
0x1bbe   :  { %v5547_v24 = vpop.f32.mrb[96].mxu1 }
0x1bbf   :  { %v3375_v26 = vpop.f32.mrb[97].mxu1 }
0x1bc0   :  { %v5548_v35 = vpop.f32.mrb[98].mxu1 }
0x1bc1   :  { %v3378_v17 = vpop.f32.mrb[99].mxu1 }
0x1bc2   :  { %v3451_v30 = vpack.c.bf16 %v3378_v17, %v3375_v26 }
0x1bc4   :  { %5560 = vmatmul.mubr.msk.bf16.vlgmr.msra.gmra.mrb[100].mxu1 %vm546_vm3, %v3451_v30 }
0x1bc5   :  { %5586 = vmatpush3.bf16.xpose.msra.mxu1 %v3607_v56  ;;  %5563 = vmatprep.mubr.msk.bf16.mxu1 %vm6361_vm0, %v6360_v0 }
0x1bc6   :  { %5758 = vmatprep.subr.msk.bf16.mxu1 %vm546_vm3, %v3599_v13 }
0x1bcd   :  { %5588 = vmatpush3.bf16.xpose.msra.mxu1 %v3610_v47 }
0x1bef   :  { %v5555_v28 = vpop.f32.mrb[100].mxu0 }
0x1bf0   :  { %v3437_v40 = vpop.f32.mrb[101].mxu0 }
0x1bf1   :  { %v3452_v2 = vpack.c.bf16 %v3437_v40, %v5547_v24  ;;  %v5556_v41 = vpop.f32.mrb[102].mxu0 }
0x1bf2   :  { %v3440_v52 = vpop.f32.mrb[103].mxu0 }
0x1bf3   :  { %v3453_v23 = vpack.c.bf16 %v5555_v28, %v3440_v52  ;;  %5564 = vmatmul.mubr.msk.bf16.gmra.mrb[104].mxu1 %vm546_vm3, %v3452_v2 }
0x1bf4   :  { %5567 = vmatprep.mubr.msk.bf16.mxu1 %vm6361_vm0, %v6360_v0 }
0x1bf7   :  { %v3569_v27 = vpop.f32.mrb[104].mxu0 }
0x1bf8   :  { %v5575_v33 = vpop.f32.mrb[105].mxu0 }
0x1bf9   :  { %v3572_v43 = vpop.f32.mrb[106].mxu0 }
0x1bfa   :  { %v5576_v31 = vpop.f32.mrb[107].mxu0 }
0x1bfb   :  { %5568 = vmatmul.mubr.msk.bf16.gmra.mrb[108].mxu1 %vm546_vm3, %v3453_v23 }
0x1bfc   :  { %5589 = vmatprep.mubr.msk.bf16.mxu1 %vm546_vm3, %v3593_v19 }
0x1bff   :  { %v3577_v14 = vpop.f32.mrb[108].mxu0 }
0x1c00   :  { %v5579_v32 = vpop.f32.mrb[109].mxu0 }
0x1c01   :  { %v3580_v58 = vpop.f32.mrb[110].mxu0 }
0x1c02   :  { %v5580_v9 = vpop.f32.mrb[111].mxu0 }
0x1c03   :  { %5590 = vmatmul.mubr.msk.bf16.vlgmr.msra.gmra.mrb[112].mxu1 %vm546_vm3, %v3595_v55 }
0x1c07   :  { %v3585_v22 = vpop.f32.mrb[112].mxu0 }
0x1c08   :  { %v5583_v42 = vpop.f32.mrb[113].mxu0 }
0x1c09   :  { %v3588_v51 = vpop.f32.mrb[114].mxu0 }
0x1c0a   :  { %v5584_v61 = vpop.f32.mrb[115].mxu0 }
0x1c0f   :  { %v5599_v63 = vpop.f32.mrb[116].mxu0 }
0x1c10   :  { %v3714_v13 = vpop.f32.mrb[117].mxu0 }
0x1c11   :  { %v5600_v39 = vpop.f32.mrb[118].mxu0  ;;  %v3715_v9 = vadd.f32 %v3714_v13, %v6760_v59 }
0x1c12   :  { %v3717_v20 = vpop.f32.mrb[119].mxu0 }
0x1c13   :  { %v3718_v32 = vadd.f32 %v3717_v20, %v6760_v59  ;;  %v3737_v61 = vsel %vm673_vm5, %v3715_v9, -inf }
0x1c15   :  { %v3740_v42 = vsel %vm673_vm5, %v3718_v32, -inf }
0x1c97   :  { %v3500_v36 = vpop.f32.mrb[100].mxu1 }
0x1c98   :  { %v7586_v38 = vadd.f32 %v3569_v27, %v3500_v36  ;;  %v5561_v50 = vpop.f32.mrb[101].mxu1 }
0x1c99   :  { %v3503_v37 = vpop.f32.mrb[102].mxu1 }
0x1c9a   :  { %v7588_v19 = vadd.f32 %v3572_v43, %v3503_v37  ;;  %v5562_v21 = vpop.f32.mrb[103].mxu1 }
0x1cc6   :  { %v3508_v44 = vpop.f32.mrb[104].mxu1 }
0x1cc7   :  { %v7590_v24 = vadd.f32 %v3577_v14, %v3508_v44  ;;  %v5565_v55 = vpop.f32.mrb[105].mxu1 }
0x1cc8   :  { %v3511_v26 = vpop.f32.mrb[106].mxu1 }
0x1cc9   :  { %v7592_v35 = vadd.f32 %v3580_v58, %v3511_v26  ;;  %v5566_v17 = vpop.f32.mrb[107].mxu1 }
0x1cce   :  { %v3516_v30 = vpop.f32.mrb[108].mxu1 }
0x1ccf   :  { %v7594_v56 = vadd.f32 %v3585_v22, %v3516_v30  ;;  %v5569_v47 = vpop.f32.mrb[109].mxu1 }
0x1cd0   :  { %v3519_v28 = vpop.f32.mrb[110].mxu1 }
0x1cd1   :  { %v7596_v40 = vadd.f32 %v3588_v51, %v3519_v28  ;;  %v5570_v2 = vpop.f32.mrb[111].mxu1  ;;  %v3723_v51 = vadd.f32 %v5599_v63, %v6760_v59 }
0x1cd3   :  { %v3743_v39 = vsel %vm673_vm5, %v3723_v51, -inf }
0x1cd6   :  { %v5591_v41 = vpop.f32.mrb[112].mxu1 }
0x1cd7   :  { %v3646_v52 = vpop.f32.mrb[113].mxu1  ;;  %v3655_v43 = vadd.f32 %v5591_v41, %v6760_v59 }
0x1cd8   :  { %v3647_v23 = vadd.f32 %v3646_v52, %v6760_v59  ;;  %v5592_v27 = vpop.f32.mrb[114].mxu1 }
0x1cd9   :  { %v3649_v33 = vpop.f32.mrb[115].mxu1  ;;  %v3734_v22 = vsel %vm673_vm5, %v3655_v43, -inf }
0x1cda   :  { %v3650_v31 = vadd.f32 %v3649_v33, %v6760_v59  ;;  %v3728_v14 = vsel %vm673_vm5, %v3647_v23, -inf }
0x1cdb   :  { %3729 = vmax.xlane.f32.xlu0 %v3728_v14 }
0x1cdc   :  { %v3731_v58 = vsel %vm673_vm5, %v3650_v31, -inf }
0x1cdd   :  { %3732 = vmax.xlane.f32.xlu1 %v3731_v58 }
0x1cdf   :  { %3735 = vmax.xlane.f32.xlu0 %v3734_v22 }
0x1ce1   :  { %3741 = vmax.xlane.f32.xlu1 %v3740_v42 }
0x1ce3   :  { %3738 = vmax.xlane.f32.xlu0 %v3737_v61 }
0x1ce7   :  { %3744 = vmax.xlane.f32.xlu0 %v3743_v39 }
0x1d68   :  { %v3730_v20 = vpop.xlane.xlu0 %3729 }
0x1d6a   :  { %v3733_v36 = vpop.xlane.xlu1 %3732 }
0x1d6b   :  { %v3747_v26 = vsub.f32 %v3650_v31, %v3733_v36 }
0x1d6c   :  { %v3736_v50 = vpop.xlane.xlu0 %3735 }
0x1d6d   :  { %v3754_v47 = vmul.f32 1.442695, %v3747_v26  ;;  %v3748_v58 = vsub.f32 %v3655_v43, %v3736_v50 }
0x1d6e   :  { %v3742_v37 = vpop.xlane.xlu1 %3741 }
0x1d6f   :  { %v3750_v21 = vsub.f32 %v3718_v32, %v3742_v37  ;;  %v3756_v22 = vmul.f32 1.442695, %v3748_v58 }
0x1d70   :  { %v3739_v13 = vpop.xlane.xlu0 %3738 }
0x1d71   :  { %v3760_v44 = vmul.f32 1.442695, %v3750_v21  ;;  %v3749_v55 = vsub.f32 %v3715_v9, %v3739_v13  ;;  %v3746_v9 = vsub.f32 %v3647_v23, %v3730_v20 }
0x1d73   :  { %6014 = vpow2.f32 %v3760_v44  ;;  %v3758_v17 = vmul.f32 1.442695, %v3749_v55  ;;  %v3752_v42 = vmul.f32 1.442695, %v3746_v9 }
0x1d74   :  { %v3745_v30 = vpop.xlane.xlu0 %3744 }
0x1d75   :  { %6016 = vpow2.f32 %v3758_v17  ;;  %v3751_v63 = vsub.f32 %v3723_v51, %v3745_v30 }
0x1d77   :  { %v3762_v28 = vmul.f32 1.442695, %v3751_v63 }
0x1d79   :  { %6018 = vpow2.f32 %v3762_v28 }
0x1d7a   :  { %6020 = vpow2.f32 %v3754_v47 }
0x1d7b   :  { %6022 = vpow2.f32 %v3756_v22 }
0x1d7c   :  { %6024 = vpow2.f32 %v3752_v42 }
0x1d7d   :  { %v6015_v2 = vpop.eup %6014 }
0x1d7e   :  { %v3776_v41 = vsel %vm673_vm5, %v6015_v2, 0.0 }
0x1d7f   :  { %v6017_v52 = vpop.eup %6016  ;;  %3777 = vadd.xlane.f32.xlu1 %v3776_v41 }
0x1d80   :  { %v3773_v27 = vsel %vm673_vm5, %v6017_v52, 0.0 }
0x1d81   :  { %3774 = vadd.xlane.f32.xlu0 %v3773_v27 }
0x1d83   :  { %v6019_v33 = vpop.eup %6018 }
0x1d84   :  { %v3779_v31 = vsel %vm673_vm5, %v6019_v33, 0.0  ;;  %v7613_v14 = vpop.eup %6020 }
0x1d85   :  { %3780 = vadd.xlane.f32.xlu0 %v3779_v31  ;;  %v3767_v32 = vsel %vm673_vm5, %v7613_v14, 0.0  ;;  %v6023_v43 = vpop.eup %6022 }
0x1d86   :  { %v3770_v51 = vsel %vm673_vm5, %v6023_v43, 0.0  ;;  %v6025_v23 = vpop.eup %6024 }
0x1d87   :  { %v3764_v61 = vsel %vm673_vm5, %v6025_v23, 0.0 }
0x1d89   :  { %3768 = vadd.xlane.f32.xlu0 %v3767_v32  ;;  %v2770_v32 = vld [vmem:[#allocation10 + $0x18] sm:$0xf] }
0x1d8a   :  { %v3935_v9 = vsel %vm757_vm6, %v2770_v32, 0 }
0x1d90   :  { %3798 = vrot.lane.b32.xlu1 %v7404_v57, %s6370_s30 }
0x1d9f   :  { %3800 = vrot.lane.b32.xlu0 %v7406_v12, %s6370_s30 }
0x1da3   :  { %4004 = vrot.lane.b32.xlu0 %v7327_v53, %s6371_s3 }
0x1da7   :  { %4072 = vrot.lane.b32.xlu0 %v7353_v16, %s6371_s3 }
0x1dab   :  { %4002 = vrot.lane.b32.xlu0 %v7371_v18, %s6372_s16 }
0x1daf   :  { %4068 = vrot.lane.b32.xlu0 %v7357_v6, %s6372_s16 }
0x1db4   :  { %3771 = vadd.xlane.f32.xlu1 %v3770_v51 }
0x1db8   :  { %3765 = vadd.xlane.f32.xlu1 %v3764_v61 }
0x1dc9   :  { %3860 = vrot.lane.b32.xlu1 %v7408_v46, %s6370_s30 }
0x1dcd   :  { %3862 = vrot.lane.b32.xlu1 %v7419_v1, %s6370_s30 }
0x1dd1   :  { %4006 = vrot.lane.b32.xlu1 %v7341_v11, %s6371_s3 }
0x1dd5   :  { %4000 = vrot.lane.b32.xlu1 %v7329_v8, %s6372_s16 }
0x1dd9   :  { %4074 = vrot.lane.b32.xlu1 %v7359_v60, %s6371_s3 }
0x1ddd   :  { %4070 = vrot.lane.b32.xlu1 %v7379_v3, %s6372_s16 }
0x1e0c   :  { %v3778_v53 = vpop.xlane.xlu1 %3777 }
0x1e0d   :  { %6026 = vrcp.f32 %v3778_v53 }
0x1e0e   :  { %v3775_v16 = vpop.xlane.xlu0 %3774 }
0x1e0f   :  { %6028 = vrcp.f32 %v3775_v16 }
0x1e10   :  { %v3799_v6 = vpop.permute.xlu1 %3798 }
0x1e11   :  { %5601 = vmatprep.subr.bf16.mxu1 %v3799_v6 }
0x1e12   :  { %v3781_v18 = vpop.xlane.xlu0 %3780  ;;  %5602 = vmatpush3.bf16.msra.mxu1 %v3799_v6 }
0x1e13   :  { %6030 = vrcp.f32 %v3781_v18 }
0x1e16   :  { %v3769_v39 = vpop.xlane.xlu0 %3768 }
0x1e17   :  { %v6027_v20 = vpop.eup %6026 }
0x1e18   :  { %v3792_v8 = vmul.f32 %v6027_v20, %v6015_v2 }
0x1e19   :  { %v6029_v11 = vpop.eup %6028 }
0x1e1a   :  { %v3801_v36 = vpop.permute.xlu0 %3800  ;;  %v3791_v50 = vmul.f32 %v6029_v11, %v6017_v52 }
0x1e1b   :  { %v3810_v37 = vsel %vm757_vm6, %v3801_v36, 0  ;;  %5761 = vmatprep.subr.msk.bf16.mxu1 %vm757_vm6, %v3801_v36 }
0x1e1c   :  { %5604 = vmatpush3.bf16.msra.mxu1 %v3810_v37  ;;  %v3796_v60 = vpack.c.bf16 %v3792_v8, %v3791_v50 }
0x1e1d   :  { %5617 = vmatprep.subr.bf16.mxu1 %v6360_v0  ;;  %v6031_v13 = vpop.eup %6030 }
0x1e1e   :  { %5613 = vmatprep.mubr.msk.bf16.mxu0 %vm673_vm5, %v3796_v60  ;;  %v3793_v55 = vmul.f32 %v6031_v13, %v6019_v33  ;;  %v4005_v47 = vpop.permute.xlu0 %4004 }
0x1e1f   :  { %v4015_v42 = vsel %vm546_vm3, %v4005_v47, 0 }
0x1e20   :  { %v3797_v41 = vpack.c.bf16 %v3793_v55, %v3793_v55 }
0x1e41   :  { %v3772_v3 = vpop.xlane.xlu1 %3771 }
0x1e42   :  { %6032 = vrcp.f32 %v3772_v3 }
0x1e43   :  { %6034 = vrcp.f32 %v3769_v39 }
0x1e45   :  { %v3766_v21 = vpop.xlane.xlu1 %3765 }
0x1e46   :  { %6036 = vrcp.f32 %v3766_v21 }
0x1e49   :  { %v3861_v44 = vpop.permute.xlu1 %3860 }
0x1e4a   :  { %5609 = vmatprep.subr.bf16.mxu0 %v3861_v44 }
0x1e4b   :  { %5610 = vmatpush3.bf16.msra.mxu0 %v3861_v44 }
0x1e4c   :  { %v6033_v26 = vpop.eup %6032 }
0x1e4d   :  { %v3863_v17 = vpop.permute.xlu1 %3862  ;;  %v6035_v30 = vpop.eup %6034  ;;  %v3790_v2 = vmul.f32 %v6033_v26, %v6023_v43 }
0x1e4e   :  { %v3872_v63 = vsel %vm757_vm6, %v3863_v17, 0  ;;  %5762 = vmatprep.subr.msk.bf16.mxu0 %vm757_vm6, %v3863_v17  ;;  %v3789_v31 = vmul.f32 %v6035_v30, %v7613_v14  ;;  %v4073_v43 = vpop.permute.xlu0 %4072 }
0x1e4f   :  { %5612 = vmatpush3.bf16.msra.mxu0 %v3872_v63  ;;  %v3795_v58 = vpack.c.bf16 %v3790_v2, %v3790_v2  ;;  %v4083_v8 = vsel %vm546_vm3, %v4073_v43, 0 }
0x1e50   :  { %v6037_v28 = vpop.eup %6036  ;;  %5763 = vmatprep.subr.msk.bf16.mxu0 %vm546_vm3, %v4005_v47 }
0x1e51   :  { %v4007_v52 = vpop.permute.xlu1 %4006  ;;  %v3788_v27 = vmul.f32 %v6037_v28, %v6025_v23 }
0x1e52   :  { %5614 = vmatmul.mubr.msk.bf16.vlgmr.msra.gmra.mrb[120].mxu0 %vm673_vm5, %v3797_v41  ;;  %v4018_v14 = vsel %vm546_vm3, %v4007_v52, 0  ;;  %v4003_v51 = vpop.permute.xlu0 %4002 }
0x1e53   :  { %v3794_v33 = vpack.c.bf16 %v3789_v31, %v3788_v27 }
0x1e55   :  { %5605 = vmatprep.mubr.msk.bf16.mxu1 %vm673_vm5, %v3794_v33  ;;  %v4001_v22 = vpop.permute.xlu1 %4000 }
0x1e56   :  { %5606 = vmatmul.mubr.msk.bf16.vlgmr.msra.gmra.mrb[116].mxu1 %vm673_vm5, %v3795_v58  ;;  %5635 = vmatprep.mubr.msk.bf16.mxu0 %vm546_vm3, %v4001_v22  ;;  %v4069_v63 = vpop.permute.xlu0 %4068 }
0x1e57   :  { %5618 = vmatpush3.bf16.msra.mxu1 %v3935_v9  ;;  %5619 = vmatprep.mubr.msk.bf16.mxu1 %vm6361_vm0, %v6360_v0 }
0x1e58   :  { %5765 = vmatprep.subr.msk.bf16.mxu1 %vm546_vm3, %v4073_v43  ;;  %5632 = vmatpush3.bf16.xpose.msra.mxu0 %v4015_v42 }
0x1e59   :  { %5764 = vmatprep.subr.msk.bf16.mxu0 %vm546_vm3, %v4007_v52  ;;  %v4075_v37 = vpop.permute.xlu1 %4074 }
0x1e5a   :  { %v4086_v60 = vsel %vm546_vm3, %v4075_v37, 0 }
0x1e5d   :  { %v4071_v2 = vpop.permute.xlu1 %4070 }
0x1e60   :  { %5634 = vmatpush3.bf16.xpose.msra.mxu0 %v4018_v14 }
0x1e67   :  { %5636 = vmatmul.mubr.msk.bf16.vlgmr.msra.gmra.mrb[124].mxu0 %vm546_vm3, %v4003_v51 }
0x1f25   :  { %v5615_v23 = vpop.f32.mrb[120].mxu0 }
0x1f26   :  { %v3908_v61 = vpop.f32.mrb[121].mxu0 }
0x1f27   :  { %v5616_v53 = vpop.f32.mrb[122].mxu0 }
0x1f28   :  { %v3911_v16 = vpop.f32.mrb[123].mxu0 }
0x1f29   :  { %v3924_v6 = vpack.c.bf16 %v5615_v23, %v3911_v16  ;;  %v5607_v18 = vpop.f32.mrb[116].mxu1 }
0x1f2a   :  { %v3923_v39 = vpack.c.bf16 %v3908_v61, %v5607_v18  ;;  %v3846_v20 = vpop.f32.mrb[117].mxu1 }
0x1f2b   :  { %v5608_v11 = vpop.f32.mrb[118].mxu1 }
0x1f2c   :  { %v3849_v36 = vpop.f32.mrb[119].mxu1 }
0x1f2d   :  { %v3922_v50 = vpack.c.bf16 %v3849_v36, %v3846_v20 }
0x1f2f   :  { %5620 = vmatmul.mubr.msk.bf16.vlgmr.msra.gmra.mrb[120].mxu1 %vm546_vm3, %v3922_v50 }
0x1f30   :  { %5640 = vmatpush3.bf16.xpose.msra.mxu1 %v4083_v8  ;;  %5623 = vmatprep.mubr.msk.bf16.mxu1 %vm6361_vm0, %v6360_v0 }
0x1f31   :  { %5766 = vmatprep.subr.msk.bf16.mxu1 %vm546_vm3, %v4075_v37 }
0x1f37   :  { %5624 = vmatmul.mubr.msk.bf16.gmra.mrb[124].mxu1 %vm546_vm3, %v3923_v39 }
0x1f38   :  { %5642 = vmatpush3.bf16.xpose.msra.mxu1 %v4086_v60  ;;  %5627 = vmatprep.mubr.msk.bf16.mxu1 %vm6361_vm0, %v6360_v0 }
0x1f39   :  { %5663 = vmatprep.subr.bf16.mxu1 %v6360_v0 }
0x1f3a   :  { %v5637_v3 = vpop.f32.mrb[124].mxu0 }
0x1f3b   :  { %v4054_v21 = vpop.f32.mrb[125].mxu0  ;;  %v4063_v26 = vadd.f32 %v5637_v3, %v6760_v59 }
0x1f3c   :  { %v4055_v13 = vadd.f32 %v4054_v21, %v6760_v59  ;;  %v5638_v44 = vpop.f32.mrb[126].mxu0 }
0x1f3d   :  { %v4057_v55 = vpop.f32.mrb[127].mxu0  ;;  %v4142_v28 = vsel %vm673_vm5, %v4063_v26, -inf }
0x1f3e   :  { %v4058_v17 = vadd.f32 %v4057_v55, %v6760_v59  ;;  %v4136_v30 = vsel %vm673_vm5, %v4055_v13, -inf }
0x1f3f   :  { %5628 = vmatmul.mubr.msk.bf16.gmra.mrb[128].mxu1 %vm546_vm3, %v3924_v6  ;;  %4137 = vmax.xlane.f32.xlu0 %v4136_v30 }
0x1f40   :  { %5643 = vmatprep.mubr.msk.bf16.mxu1 %vm546_vm3, %v4069_v63  ;;  %v4139_v47 = vsel %vm673_vm5, %v4058_v17, -inf }
0x1f41   :  { %4140 = vmax.xlane.f32.xlu1 %v4139_v47 }
0x1f43   :  { %4143 = vmax.xlane.f32.xlu0 %v4142_v28 }
0x1f47   :  { %5644 = vmatmul.mubr.msk.bf16.vlgmr.msra.gmra.mrb[132].mxu1 %vm546_vm3, %v4071_v2 }
0x1f48   :  { %5665 = vmatprep.mubr.msk.bf16.mxu1 %vm6361_vm0, %v6360_v0 }
0x1fcc   :  { %v4138_v58 = vpop.xlane.xlu0 %4137 }
0x1fce   :  { %v4141_v23 = vpop.xlane.xlu1 %4140 }
0x1fcf   :  { %v4155_v53 = vsub.f32 %v4058_v17, %v4141_v23 }
0x1fd0   :  { %v4144_v61 = vpop.xlane.xlu0 %4143 }
0x2002   :  { %v3971_v41 = vpop.f32.mrb[120].mxu1 }
0x2003   :  { %v7685_v52 = vadd.f32 %v3971_v41, %v7586_v38  ;;  %v5621_v27 = vpop.f32.mrb[121].mxu1  ;;  %v4154_v38 = vsub.f32 %v4055_v13, %v4138_v58 }
0x2004   :  { %v3974_v31 = vpop.f32.mrb[122].mxu1 }
0x2005   :  { %v7688_v32 = vadd.f32 %v3974_v31, %v7588_v19  ;;  %v5622_v33 = vpop.f32.mrb[123].mxu1  ;;  %v4160_v6 = vmul.f32 1.442695, %v4154_v38  ;;  %v4156_v19 = vsub.f32 %v4063_v26, %v4144_v61 }
0x2007   :  { %6038 = vpow2.f32 %v4160_v6 }
0x200a   :  { %v3979_v9 = vpop.f32.mrb[124].mxu1 }
0x200b   :  { %v7691_v22 = vadd.f32 %v3979_v9, %v7590_v24  ;;  %v5625_v42 = vpop.f32.mrb[125].mxu1  ;;  %v4162_v24 = vmul.f32 1.442695, %v4155_v53 }
0x200c   :  { %v3982_v43 = vpop.f32.mrb[126].mxu1 }
0x200d   :  { %v7694_v14 = vadd.f32 %v3982_v43, %v7592_v35  ;;  %v5626_v51 = vpop.f32.mrb[127].mxu1  ;;  %v4164_v35 = vmul.f32 1.442695, %v4156_v19  ;;  %6040 = vpow2.f32 %v4162_v24 }
0x200f   :  { %6042 = vpow2.f32 %v4164_v35 }
0x2011   :  { %v6039_v44 = vpop.eup %6038 }
0x2012   :  { %v3987_v16 = vpop.f32.mrb[128].mxu1  ;;  %v4172_v17 = vsel %vm673_vm5, %v6039_v44, 0.0 }
0x2013   :  { %v7697_v18 = vadd.f32 %v3987_v16, %v7594_v56  ;;  %v5629_v39 = vpop.f32.mrb[129].mxu1 }
0x2014   :  { %v3990_v20 = vpop.f32.mrb[130].mxu1 }
0x2015   :  { %v7700_v11 = vadd.f32 %v3990_v20, %v7596_v40  ;;  %v5630_v36 = vpop.f32.mrb[131].mxu1 }
0x2017   :  { %v6041_v26 = vpop.eup %6040 }
0x2018   :  { %v4175_v63 = vsel %vm673_vm5, %v6041_v26, 0.0 }
0x2019   :  { %v6043_v30 = vpop.eup %6042 }
0x201a   :  { %v5645_v50 = vpop.f32.mrb[132].mxu1 }
0x201b   :  { %v4122_v8 = vpop.f32.mrb[133].mxu1  ;;  %v4131_v56 = vadd.f32 %v5645_v50, %v6760_v59 }
0x201c   :  { %v4123_v37 = vadd.f32 %v4122_v8, %v6760_v59  ;;  %v5646_v60 = vpop.f32.mrb[134].mxu1 }
0x201d   :  { %v4125_v3 = vpop.f32.mrb[135].mxu1  ;;  %v4151_v55 = vsel %vm673_vm5, %v4131_v56, -inf }
0x201e   :  { %v4126_v21 = vadd.f32 %v4125_v3, %v6760_v59  ;;  %v4145_v13 = vsel %vm673_vm5, %v4123_v37, -inf  ;;  %v4178_v59 = vsel %vm673_vm5, %v6043_v30, 0.0 }
0x201f   :  { %4146 = vmax.xlane.f32.xlu0 %v4145_v13 }
0x2020   :  { %v4148_v40 = vsel %vm673_vm5, %v4126_v21, -inf }
0x2021   :  { %4149 = vmax.xlane.f32.xlu1 %v4148_v40 }
0x2023   :  { %4152 = vmax.xlane.f32.xlu0 %v4151_v55 }
0x2025   :  { %4173 = vadd.xlane.f32.xlu1 %v4172_v17 }
0x2027   :  { %4176 = vadd.xlane.f32.xlu0 %v4175_v63 }
0x2029   :  { %4179 = vadd.xlane.f32.xlu1 %v4178_v59  ;;  %v2771_v59 = vld [vmem:[#allocation10 + $0x1c] sm:$0xf] }
0x203a   :  { %4206 = vrot.lane.b32.xlu1 %v7404_v57, %s6373_s11 }
0x203e   :  { %4268 = vrot.lane.b32.xlu1 %v7408_v46, %s6373_s11 }
0x20ac   :  { %v4147_v47 = vpop.xlane.xlu0 %4146 }
0x20ad   :  { %v4157_v2 = vsub.f32 %v4123_v37, %v4147_v47  ;;  %v4343_v47 = vsel %vm757_vm6, %v2771_v59, 0 }
0x20ae   :  { %v4150_v28 = vpop.xlane.xlu1 %4149  ;;  %5664 = vmatpush3.bf16.msra.mxu1 %v4343_v47 }
0x20af   :  { %v4158_v41 = vsub.f32 %v4126_v21, %v4150_v28  ;;  %v4166_v9 = vmul.f32 1.442695, %v4157_v2  ;;  %5693 = vmatprep.subr.bf16.mxu1 %v6360_v0 }
0x20b0   :  { %v4153_v27 = vpop.xlane.xlu0 %4152 }
0x20b1   :  { %v4168_v31 = vmul.f32 1.442695, %v4158_v41  ;;  %v4159_v33 = vsub.f32 %v4131_v56, %v4153_v27 }
0x20b2   :  { %v4174_v58 = vpop.xlane.xlu1 %4173 }
0x20b3   :  { %6044 = vpow2.f32 %v4168_v31  ;;  %v4170_v42 = vmul.f32 1.442695, %v4159_v33 }
0x20b4   :  { %6046 = vrcp.f32 %v4174_v58  ;;  %v4177_v43 = vpop.xlane.xlu0 %4176 }
0x20b5   :  { %6048 = vpow2.f32 %v4170_v42 }
0x20b6   :  { %6050 = vrcp.f32 %v4177_v43  ;;  %v4180_v51 = vpop.xlane.xlu1 %4179 }
0x20b7   :  { %6052 = vpow2.f32 %v4166_v9 }
0x20b8   :  { %6054 = vrcp.f32 %v4180_v51 }
0x20ba   :  { %v4207_v57 = vpop.permute.xlu1 %4206 }
0x20bb   :  { %5647 = vmatprep.subr.bf16.mxu0 %v4207_v57 }
0x20bc   :  { %5648 = vmatpush3.bf16.msra.mxu0 %v4207_v57 }
0x20bd   :  { %v6045_v46 = vpop.eup %6044 }
0x20be   :  { %v6047_v23 = vpop.eup %6046  ;;  %v4184_v38 = vsel %vm673_vm5, %v6045_v46, 0.0  ;;  %v4269_v36 = vpop.permute.xlu1 %4268 }
0x20bf   :  { %v6049_v61 = vpop.eup %6048  ;;  %4185 = vadd.xlane.f32.xlu1 %v4184_v38  ;;  %v4196_v19 = vmul.f32 %v6047_v23, %v6039_v44  ;;  %v7745_v23 = vld [vmem:[#allocation14 + $0x10] sm:$0xff] }
0x20c0   :  { %v6051_v53 = vpop.eup %6050  ;;  %v4187_v16 = vsel %vm673_vm5, %v6049_v61, 0.0  ;;  %v4417_v38 = vrot.slane %v7745_v23, %v2175_v48 }
0x20c1   :  { %v6053_v6 = vpop.eup %6052  ;;  %4188 = vadd.xlane.f32.xlu0 %v4187_v16  ;;  %v4197_v39 = vmul.f32 %v6051_v53, %v6041_v26 }
0x20c2   :  { %v4181_v24 = vsel %vm673_vm5, %v6053_v6, 0.0  ;;  %v6055_v8 = vpop.eup %6054 }
0x20c3   :  { %v4202_v20 = vpack.c.bf16 %v4197_v39, %v4196_v19  ;;  %v4198_v60 = vmul.f32 %v6055_v8, %v6043_v30 }
0x20c5   :  { %5651 = vmatprep.mubr.msk.bf16.mxu0 %vm673_vm5, %v4202_v20  ;;  %4182 = vadd.xlane.f32.xlu0 %v4181_v24 }
0x20d0   :  { %4270 = vrot.lane.b32.xlu1 %v7419_v1, %s6373_s11  ;;  %v4203_v1 = vpack.c.bf16 %v4198_v60, %v4198_v60 }
0x20db   :  { %4208 = vrot.lane.b32.xlu0 %v7406_v12, %s6373_s11 }
0x214c   :  { %v4186_v35 = vpop.xlane.xlu1 %4185 }
0x214e   :  { %v4189_v50 = vpop.xlane.xlu0 %4188 }
0x214f   :  { %6056 = vrcp.f32 %v4189_v50 }
0x2150   :  { %6058 = vrcp.f32 %v4186_v35  ;;  %v4271_v13 = vpop.permute.xlu1 %4270 }
0x2151   :  { %v4280_v17 = vsel %vm757_vm6, %v4271_v13, 0 }
0x2152   :  { %v4183_v37 = vpop.xlane.xlu0 %4182 }
0x2153   :  { %6060 = vrcp.f32 %v4183_v37 }
0x2156   :  { %v4209_v3 = vpop.permute.xlu0 %4208 }
0x2157   :  { %v4218_v56 = vsel %vm757_vm6, %v4209_v3, 0  ;;  %5767 = vmatprep.subr.msk.bf16.mxu0 %vm757_vm6, %v4209_v3 }
0x2158   :  { %5650 = vmatpush3.bf16.msra.mxu0 %v4218_v56 }
0x2159   :  { %5655 = vmatprep.subr.bf16.mxu0 %v4269_v36  ;;  %v6057_v21 = vpop.eup %6056 }
0x215a   :  { %v6059_v12 = vpop.eup %6058  ;;  %v4201_v44 = vmul.f32 %v6057_v21, %v6049_v61 }
0x215b   :  { %5652 = vmatmul.mubr.msk.bf16.vlgmr.msra.gmra.mrb[128].mxu0 %vm673_vm5, %v4203_v1  ;;  %v4200_v26 = vmul.f32 %v6059_v12, %v6045_v46 }
0x215c   :  { %5656 = vmatpush3.bf16.msra.mxu0 %v4269_v36  ;;  %v4205_v63 = vpack.c.bf16 %v4201_v44, %v4201_v44 }
0x215d   :  { %v6061_v40 = vpop.eup %6060  ;;  %5768 = vmatprep.subr.msk.bf16.mxu0 %vm757_vm6, %v4271_v13 }
0x215e   :  { %v4199_v55 = vmul.f32 %v6061_v40, %v6053_v6 }
0x2160   :  { %5658 = vmatpush3.bf16.msra.mxu0 %v4280_v17  ;;  %v4204_v30 = vpack.c.bf16 %v4200_v26, %v4199_v55 }
0x2161   :  { %5677 = vmatprep.subr.bf16.mxu0 %v6360_v0 }
0x2162   :  { %5659 = vmatprep.mubr.msk.bf16.mxu0 %vm673_vm5, %v4204_v30 }
0x2163   :  { %5660 = vmatmul.mubr.msk.bf16.vlgmr.msra.gmra.mrb[132].mxu0 %vm673_vm5, %v4205_v63 }
0x2164   :  { %5681 = vmatprep.mubr.msk.bf16.mxu0 %vm6361_vm0, %v6360_v0 }
0x222e   :  { %v5653_v28 = vpop.f32.mrb[128].mxu0 }
0x222f   :  { %v4254_v2 = vpop.f32.mrb[129].mxu0 }
0x2230   :  { %v5654_v41 = vpop.f32.mrb[130].mxu0 }
0x2231   :  { %v4257_v27 = vpop.f32.mrb[131].mxu0 }
0x2232   :  { %v4330_v31 = vpack.c.bf16 %v4257_v27, %v4254_v2 }
0x2234   :  { %5666 = vmatmul.mubr.msk.bf16.vlgmr.msra.gmra.mrb[136].mxu1 %vm546_vm3, %v4330_v31 }
0x2235   :  { %5669 = vmatprep.mubr.msk.bf16.mxu1 %vm6361_vm0, %v6360_v0 }
0x2236   :  { %v5661_v33 = vpop.f32.mrb[132].mxu0 }
0x2237   :  { %v4316_v58 = vpop.f32.mrb[133].mxu0 }
0x2238   :  { %v4331_v9 = vpack.c.bf16 %v4316_v58, %v5653_v28  ;;  %v5662_v42 = vpop.f32.mrb[134].mxu0 }
0x2239   :  { %v4319_v43 = vpop.f32.mrb[135].mxu0 }
0x223a   :  { %v4332_v51 = vpack.c.bf16 %v5661_v33, %v4319_v43 }
0x223c   :  { %5670 = vmatmul.mubr.msk.bf16.gmra.mrb[140].mxu1 %vm546_vm3, %v4331_v9 }
0x223d   :  { %5673 = vmatprep.mubr.msk.bf16.mxu1 %vm6361_vm0, %v6360_v0 }
0x2244   :  { %5674 = vmatmul.mubr.msk.bf16.gmra.mrb[144].mxu1 %vm546_vm3, %v4332_v51 }
0x2245   :  { %5701 = vmatprep.mubr.msk.bf16.mxu1 %vm6361_vm0, %v6360_v0 }
0x2307   :  { %v4379_v57 = vpop.f32.mrb[136].mxu1 }
0x2308   :  { %v4402_v46 = vadd.f32 %v4379_v57, %v7685_v52  ;;  %v5667_v61 = vpop.f32.mrb[137].mxu1 }
0x2309   :  { %v4382_v53 = vpop.f32.mrb[138].mxu1 }
0x230a   :  { %v4408_v16 = vadd.f32 %v4402_v46, %v7238_v10  ;;  %v4403_v6 = vadd.f32 %v4382_v53, %v7688_v32  ;;  %v5668_v19 = vpop.f32.mrb[139].mxu1  ;;  %v5814_v46 = vld [vmem:[#allocation11 + $0x10] sm:$0xff]  }
0x230b   :  { %5678 = vmatpush3.bf16.msra.mxu0 %v5814_v46 }
0x230c   :  { %v7752_v39 = vadd.f32 %v4417_v38, %v4408_v16  ;;  %v4409_v20 = vadd.f32 %v4403_v6, %v7241_v4  ;;  %5679 = vmatprep.subr.bf16.mxu0 %v6360_v0 }
0x230e   :  { %v4424_v52 = vsel %vm295_vm2, %v7752_v39, 0.0  ;;  %v4419_v24 = vadd.f32 %v4417_v38, %v4409_v20 }
0x230f   :  { %4425 = vadd.xlane.f32.xlu0 %v4424_v52  ;;  %v4387_v36 = vpop.f32.mrb[140].mxu1 }
0x2310   :  { %v4404_v35 = vadd.f32 %v4387_v36, %v7691_v22  ;;  %v5671_v48 = vpop.f32.mrb[141].mxu1  ;;  %v4427_v50 = vsel %vm295_vm2, %v4419_v24, 0.0 }
0x2311   :  { %4428 = vadd.xlane.f32.xlu1 %v4427_v50  ;;  %v4390_v10 = vpop.f32.mrb[142].mxu1 }
0x2312   :  { %v4410_v32 = vadd.f32 %v4404_v35, %v7248_v29  ;;  %v4405_v8 = vadd.f32 %v4390_v10, %v7694_v14  ;;  %v5672_v37 = vpop.f32.mrb[143].mxu1 }
0x2314   :  { %v4411_v4 = vadd.f32 %v4405_v8, %v7251_v62  ;;  %v4420_v60 = vadd.f32 %v4417_v38, %v4410_v32  ;;  %v4505_v32 = vrot.slane %v7745_v23, %v2263_v15 }
0x2316   :  { %v7762_v3 = vadd.f32 %v4417_v38, %v4411_v4  ;;  %v4430_v56 = vsel %vm295_vm2, %v4420_v60, 0.0 }
0x2317   :  { %4431 = vadd.xlane.f32.xlu0 %v4430_v56  ;;  %v4395_v1 = vpop.f32.mrb[144].mxu1 }
0x2318   :  { %v4406_v22 = vadd.f32 %v4395_v1, %v7697_v18  ;;  %v5675_v21 = vpop.f32.mrb[145].mxu1  ;;  %v4433_v14 = vsel %vm295_vm2, %v7762_v3, 0.0 }
0x2319   :  { %v4398_v12 = vpop.f32.mrb[146].mxu1 }
0x231a   :  { %v4412_v13 = vadd.f32 %v4406_v22, %v7258_v54  ;;  %v4407_v29 = vadd.f32 %v4398_v12, %v7700_v11  ;;  %v5676_v40 = vpop.f32.mrb[147].mxu1 }
0x231b   :  { %4434 = vadd.xlane.f32.xlu0 %v4433_v14 }
0x231c   :  { %v4413_v62 = vadd.f32 %v4407_v29, %v7261_v49  ;;  %v4422_v44 = vadd.f32 %v4417_v38, %v4412_v13  ;;  %v4515_v29 = vrot.slane %v7745_v23, %v2273_v45 }
0x231e   :  { %v7771_v55 = vadd.f32 %v4417_v38, %v4413_v62  ;;  %v4436_v43 = vsel %vm295_vm2, %v4422_v44, 0.0  ;;  %v5815_v38 = vld [vmem:[#allocation11 + $0x18] sm:$0xff]  }
0x231f   :  { %5680 = vmatpush3.bf16.msra.mxu0 %v5815_v38 }
0x2320   :  { %v4439_v57 = vsel %vm295_vm2, %v7771_v55, 0.0  ;;  %5713 = vmatprep.subr.bf16.mxu0 %v6360_v0 }
0x239c   :  { %v4426_v26 = vpop.xlane.xlu0 %4425 }
0x239d   :  { %v4442_v17 = vmul.f32 0.03125, %v4426_v26 }
0x239e   :  { %v4429_v30 = vpop.xlane.xlu1 %4428 }
0x239f   :  { %v4448_v18 = vsub.f32 %v7752_v39, %v4442_v17  ;;  %v4443_v63 = vmul.f32 0.03125, %v4429_v30 }
0x23a1   :  { %v4449_v59 = vsub.f32 %v4419_v24, %v4443_v63  ;;  %v4454_v54 = vmul.f32 %v4448_v18, %v4448_v18 }
0x23a3   :  { %v4460_v11 = vsel %vm295_vm2, %v4454_v54, 0.0  ;;  %v4455_v47 = vmul.f32 %v4449_v59, %v4449_v59 }
0x23a4   :  { %4461 = vadd.xlane.f32.xlu1 %v4460_v11  ;;  %v4432_v28 = vpop.xlane.xlu0 %4431 }
0x23a5   :  { %v4444_v2 = vmul.f32 0.03125, %v4432_v28  ;;  %v4463_v41 = vsel %vm295_vm2, %v4455_v47, 0.0  ;;  %v5816_v47 = vld [vmem:[#allocation13 + $0x20] sm:$0xff]   ;;  %v5817_v28 = vld [vmem:[#allocation13 + $0x28] sm:$0xff]  }
0x23a6   :  { %4464 = vadd.xlane.f32.xlu0 %v4463_v41  ;;  %5694 = vmatpush3.bf16.msra.mxu1 %v5816_v47  ;;  %v5819_v41 = vld [vmem:[#allocation13 + $0x38] sm:$0xff]  }
0x23a7   :  { %v4450_v49 = vsub.f32 %v4420_v60, %v4444_v2  ;;  %5695 = vmatprep.subr.bf16.mxu1 %v6360_v0  ;;  %v5818_v2 = vld [vmem:[#allocation13 + $0x30] sm:$0xff]  }
0x23a8   :  { %v4435_v27 = vpop.xlane.xlu0 %4434 }
0x23a9   :  { %v4445_v31 = vmul.f32 0.03125, %v4435_v27  ;;  %v4456_v33 = vmul.f32 %v4450_v49, %v4450_v49 }
0x23aa   :  { %5696 = vmatpush3.bf16.msra.mxu1 %v5817_v28 }
0x23ab   :  { %v4451_v58 = vsub.f32 %v7762_v3, %v4445_v31  ;;  %v4466_v9 = vsel %vm295_vm2, %v4456_v33, 0.0  ;;  %5697 = vmatprep.subr.bf16.mxu1 %v6360_v0 }
0x23ac   :  { %4467 = vadd.xlane.f32.xlu1 %v4466_v9 }
0x23ad   :  { %v4457_v42 = vmul.f32 %v4451_v58, %v4451_v58 }
0x23ae   :  { %5698 = vmatpush3.bf16.msra.mxu1 %v5818_v2 }
0x23af   :  { %v4469_v51 = vsel %vm295_vm2, %v4457_v42, 0.0  ;;  %5699 = vmatprep.subr.bf16.mxu1 %v6360_v0 }
0x23b0   :  { %4437 = vadd.xlane.f32.xlu1 %v4436_v43  ;;  %4470 = vadd.xlane.f32.xlu0 %v4469_v51 }
0x23b2   :  { %5700 = vmatpush3.bf16.msra.mxu1 %v5819_v41 }
0x23b4   :  { %4440 = vadd.xlane.f32.xlu0 %v4439_v57 }
0x2431   :  { %v4462_v61 = vpop.xlane.xlu1 %4461 }
0x2432   :  { %v4478_v53 = vmul.f32 0.03125, %v4462_v61 }
0x2433   :  { %v4465_v16 = vpop.xlane.xlu0 %4464 }
0x2434   :  { %v4484_v6 = vadd.f32 1e-06, %v4478_v53  ;;  %v4479_v19 = vmul.f32 0.03125, %v4465_v16 }
0x2436   :  { %6062 = vrsqrt.f32 %v4484_v6  ;;  %v4485_v20 = vadd.f32 1e-06, %v4479_v19  ;;  %v7805_v6 = vld [vmem:[#allocation14 + $0x18] sm:$0x3] }
0x2437   :  { %v7809_v19 = vrot.slane %v7805_v6, %v6668_v25 }
0x2438   :  { %6064 = vrsqrt.f32 %v4485_v20 }
0x2439   :  { %v4468_v52 = vpop.xlane.xlu1 %4467 }
0x243a   :  { %v4480_v24 = vmul.f32 0.03125, %v4468_v52 }
0x243c   :  { %v4486_v36 = vadd.f32 1e-06, %v4480_v24 }
0x243d   :  { %v4471_v35 = vpop.xlane.xlu0 %4470  ;;  %v4438_v48 = vpop.xlane.xlu1 %4437 }
0x243e   :  { %6066 = vrsqrt.f32 %v4486_v36  ;;  %v4481_v50 = vmul.f32 0.03125, %v4471_v35  ;;  %v4446_v10 = vmul.f32 0.03125, %v4438_v48 }
0x2440   :  { %v6063_v8 = vpop.eup %6062  ;;  %v4487_v37 = vadd.f32 1e-06, %v4481_v50  ;;  %v4452_v4 = vsub.f32 %v4422_v44, %v4446_v10 }
0x2441   :  { %v4496_v60 = vmul.f32 %v6063_v8, %v4448_v18  ;;  %v4441_v56 = vpop.xlane.xlu0 %4440 }
0x2442   :  { %v6065_v1 = vpop.eup %6064  ;;  %6068 = vrsqrt.f32 %v4487_v37  ;;  %v4447_v22 = vmul.f32 0.03125, %v4441_v56  ;;  %v4458_v21 = vmul.f32 %v4452_v4, %v4452_v4 }
0x2443   :  { %v4506_v12 = vmul.f32 %v4505_v32, %v4496_v60  ;;  %v4497_v13 = vmul.f32 %v6065_v1, %v4449_v59 }
0x2444   :  { %v4453_v40 = vsub.f32 %v7771_v55, %v4447_v22  ;;  %v4472_v14 = vsel %vm295_vm2, %v4458_v21, 0.0 }
0x2445   :  { %v4507_v15 = vmul.f32 %v4505_v32, %v4497_v13  ;;  %4473 = vadd.xlane.f32.xlu1 %v4472_v14  ;;  %v4516_v44 = vadd.f32 %v4515_v29, %v4506_v12 }
0x2446   :  { %v4459_v62 = vmul.f32 %v4453_v40, %v4453_v40 }
0x2447   :  { %v4517_v26 = vadd.f32 %v4515_v29, %v4507_v15 }
0x2448   :  { %v6067_v17 = vpop.eup %6066  ;;  %v4475_v30 = vsel %vm295_vm2, %v4459_v62, 0.0 }
0x2449   :  { %v4498_v18 = vmul.f32 %v6067_v17, %v4450_v49  ;;  %4476 = vadd.xlane.f32.xlu0 %v4475_v30  ;;  %v4522_v63 = vpack.c.bf16 %v4517_v26, %v4516_v44 }
0x244b   :  { %5682 = vmatmul.mubr.msk.bf16.vlgmr.msra.gmra.mrb[136].mxu0 %vm295_vm2, %v4522_v63  ;;  %v4508_v23 = vmul.f32 %v4505_v32, %v4498_v18 }
0x244c   :  { %v6069_v7 = vpop.eup %6068  ;;  %5685 = vmatprep.mubr.msk.bf16.mxu0 %vm6361_vm0, %v6360_v0 }
0x244d   :  { %v4499_v45 = vmul.f32 %v6069_v7, %v4451_v58  ;;  %v4518_v59 = vadd.f32 %v4515_v29, %v4508_v23 }
0x244f   :  { %v4509_v55 = vmul.f32 %v4505_v32, %v4499_v45 }
0x2451   :  { %v4519_v54 = vadd.f32 %v4515_v29, %v4509_v55 }
0x2453   :  { %v4523_v11 = vpack.c.bf16 %v4519_v54, %v4518_v59 }
0x2455   :  { %5686 = vmatmul.mubr.msk.bf16.gmra.mrb[140].mxu0 %vm295_vm2, %v4523_v11 }
0x2456   :  { %5689 = vmatprep.mubr.msk.bf16.mxu0 %vm6361_vm0, %v6360_v0 }
0x24d2   :  { %v4474_v49 = vpop.xlane.xlu1 %4473 }
0x24d3   :  { %v4482_v27 = vmul.f32 0.03125, %v4474_v49 }
0x24d5   :  { %v4488_v31 = vadd.f32 1e-06, %v4482_v27 }
0x24d6   :  { %v4477_v33 = vpop.xlane.xlu0 %4476 }
0x24d7   :  { %6070 = vrsqrt.f32 %v4488_v31  ;;  %v4483_v58 = vmul.f32 0.03125, %v4477_v33 }
0x24d9   :  { %v4489_v9 = vadd.f32 1e-06, %v4483_v58 }
0x24db   :  { %6072 = vrsqrt.f32 %v4489_v9 }
0x24e1   :  { %v6071_v42 = vpop.eup %6070 }
0x24e2   :  { %v4500_v43 = vmul.f32 %v6071_v42, %v4452_v4 }
0x24e4   :  { %v4510_v46 = vmul.f32 %v4505_v32, %v4500_v43 }
0x24e5   :  { %v6073_v51 = vpop.eup %6072 }
0x24e6   :  { %v4501_v57 = vmul.f32 %v6073_v51, %v4453_v40  ;;  %v4520_v61 = vadd.f32 %v4515_v29, %v4510_v46 }
0x24e8   :  { %v4511_v38 = vmul.f32 %v4505_v32, %v4501_v57 }
0x24ea   :  { %v4521_v53 = vadd.f32 %v4515_v29, %v4511_v38 }
0x24ec   :  { %v4524_v16 = vpack.c.bf16 %v4521_v53, %v4520_v61 }
0x24ee   :  { %5690 = vmatmul.mubr.msk.bf16.gmra.mrb[144].mxu0 %vm295_vm2, %v4524_v16 }
0x24ef   :  { %5717 = vmatprep.mubr.msk.bf16.mxu0 %vm6361_vm0, %v6360_v0 }
0x251e   :  { %v4589_v20 = vpop.f32.mrb[136].mxu0 }
0x251f   :  { %v4590_v52 = vadd.f32 %v4589_v20, %v7809_v19  ;;  %v5683_v24 = vpop.f32.mrb[137].mxu0 }
0x2520   :  { %v4592_v36 = vpop.f32.mrb[138].mxu0 }
0x2521   :  { %v4612_v35 = vmul.f32 %v4590_v52, %v4590_v52  ;;  %v4593_v48 = vadd.f32 %v4592_v36, %v7809_v19  ;;  %v5684_v50 = vpop.f32.mrb[139].mxu0 }
0x2523   :  { %v4618_v10 = vmul.f32 %v4612_v35, %v4590_v52  ;;  %v4613_v32 = vmul.f32 %v4593_v48, %v4593_v48 }
0x2525   :  { %v4624_v8 = vmul.f32 0.044715, %v4618_v10  ;;  %v4619_v37 = vmul.f32 %v4613_v32, %v4593_v48 }
0x2527   :  { %v4630_v4 = vadd.f32 %v4624_v8, %v4590_v52  ;;  %v4625_v60 = vmul.f32 0.044715, %v4619_v37 }
0x2528   :  { %v4597_v56 = vpop.f32.mrb[140].mxu0 }
0x2529   :  { %v4636_v1 = vmul.f32 0.7978846, %v4630_v4  ;;  %v4631_v22 = vadd.f32 %v4625_v60, %v4593_v48  ;;  %v4598_v21 = vadd.f32 %v4597_v56, %v7809_v19  ;;  %v5687_v12 = vpop.f32.mrb[141].mxu0 }
0x252a   :  { %v4600_v13 = vpop.f32.mrb[142].mxu0 }
0x252b   :  { %6074 = vtanh.f32 %v4636_v1  ;;  %v4637_v29 = vmul.f32 0.7978846, %v4631_v22  ;;  %v4614_v40 = vmul.f32 %v4598_v21, %v4598_v21  ;;  %v4601_v14 = vadd.f32 %v4600_v13, %v7809_v19  ;;  %v5688_v15 = vpop.f32.mrb[143].mxu0 }
0x252c   :  { %v4681_v15 = vrot.slane %v7805_v6, %v6674_v34 }
0x252d   :  { %6076 = vtanh.f32 %v4637_v29  ;;  %v4620_v62 = vmul.f32 %v4614_v40, %v4598_v21  ;;  %v4615_v44 = vmul.f32 %v4601_v14, %v4601_v14 }
0x252f   :  { %v4626_v26 = vmul.f32 0.044715, %v4620_v62  ;;  %v4621_v17 = vmul.f32 %v4615_v44, %v4601_v14 }
0x2531   :  { %v4632_v30 = vadd.f32 %v4626_v26, %v4598_v21  ;;  %v4627_v18 = vmul.f32 0.044715, %v4621_v17 }
0x2533   :  { %v4638_v63 = vmul.f32 0.7978846, %v4632_v30  ;;  %v4633_v7 = vadd.f32 %v4627_v18, %v4601_v14 }
0x2535   :  { %v6075_v45 = vpop.eup %6074  ;;  %6078 = vtanh.f32 %v4638_v63  ;;  %v4639_v23 = vmul.f32 0.7978846, %v4633_v7 }
0x2536   :  { %v4648_v55 = vadd.f32 1.0, %v6075_v45 }
0x2537   :  { %v6077_v59 = vpop.eup %6076  ;;  %6080 = vtanh.f32 %v4639_v23 }
0x2538   :  { %v4654_v54 = vmul.f32 0.5, %v4648_v55  ;;  %v4649_v11 = vadd.f32 1.0, %v6077_v59 }
0x253a   :  { %v4655_v47 = vmul.f32 0.5, %v4649_v11  ;;  %v4660_v28 = vmul.f32 %v4654_v54, %v4590_v52 }
0x253c   :  { %v4661_v2 = vmul.f32 %v4655_v47, %v4593_v48 }
0x253e   :  { %v4666_v41 = vpack.c.bf16 %v4661_v2, %v4660_v28 }
0x253f   :  { %v6079_v49 = vpop.eup %6078 }
0x2540   :  { %v4650_v27 = vadd.f32 1.0, %v6079_v49  ;;  %5702 = vmatmul.mubr.msk.bf16.vlgmr.msra.gmra.mrb[148].mxu1 %vm2463_vm7, %v4666_v41 }
0x2541   :  { %v6081_v31 = vpop.eup %6080  ;;  %5705 = vmatprep.mubr.msk.bf16.mxu1 %vm6361_vm0, %v6360_v0 }
0x2542   :  { %v4656_v33 = vmul.f32 0.5, %v4650_v27  ;;  %v4651_v58 = vadd.f32 1.0, %v6081_v31  ;;  %v5820_v27 = vld [vmem:[#allocation16] sm:$0xff]  }
0x2543   :  { %5714 = vmatpush3.bf16.msra.mxu0 %v5820_v27 }
0x2544   :  { %v4657_v9 = vmul.f32 0.5, %v4651_v58  ;;  %v4662_v42 = vmul.f32 %v4656_v33, %v4598_v21  ;;  %5715 = vmatprep.subr.bf16.mxu0 %v6360_v0  ;;  %v4775_v58 = vld [vmem:[#allocation17] sm:$0x7] }
0x2546   :  { %v4663_v43 = vmul.f32 %v4657_v9, %v4601_v14  ;;  %v4793_v9 = vrot.slane %v4775_v58, %v6668_v25 }
0x2548   :  { %v4667_v51 = vpack.c.bf16 %v4663_v43, %v4662_v42  ;;  %v4798_v43 = vrot.slane %v4775_v58, %v6674_v34 }
0x254a   :  { %5706 = vmatmul.mubr.msk.bf16.gmra.mrb[152].mxu1 %vm2463_vm7, %v4667_v51 }
0x254b   :  { %5709 = vmatprep.mubr.msk.bf16.mxu1 %vm6361_vm0, %v6360_v0  ;;  %v4808_v0 = vrot.slane %v4775_v58, %v6691_v5 }
0x25c1   :  { %v4605_v57 = vpop.f32.mrb[144].mxu0 }
0x25c2   :  { %v4606_v46 = vadd.f32 %v4605_v57, %v7809_v19  ;;  %v5691_v38 = vpop.f32.mrb[145].mxu0 }
0x25c3   :  { %v4608_v61 = vpop.f32.mrb[146].mxu0 }
0x25c4   :  { %v4616_v53 = vmul.f32 %v4606_v46, %v4606_v46  ;;  %v4609_v16 = vadd.f32 %v4608_v61, %v7809_v19  ;;  %v5692_v20 = vpop.f32.mrb[147].mxu0 }
0x25c6   :  { %v4622_v52 = vmul.f32 %v4616_v53, %v4606_v46  ;;  %v4617_v24 = vmul.f32 %v4609_v16, %v4609_v16 }
0x25c8   :  { %v4628_v36 = vmul.f32 0.044715, %v4622_v52  ;;  %v4623_v35 = vmul.f32 %v4617_v24, %v4609_v16 }
0x25ca   :  { %v4634_v48 = vadd.f32 %v4628_v36, %v4606_v46  ;;  %v4629_v50 = vmul.f32 0.044715, %v4623_v35 }
0x25cc   :  { %v4640_v10 = vmul.f32 0.7978846, %v4634_v48  ;;  %v4635_v32 = vadd.f32 %v4629_v50, %v4609_v16 }
0x25ce   :  { %6082 = vtanh.f32 %v4640_v10  ;;  %v4641_v8 = vmul.f32 0.7978846, %v4635_v32 }
0x25d0   :  { %6084 = vtanh.f32 %v4641_v8 }
0x25d8   :  { %v6083_v37 = vpop.eup %6082 }
0x25d9   :  { %v4652_v4 = vadd.f32 1.0, %v6083_v37 }
0x25da   :  { %v6085_v60 = vpop.eup %6084 }
0x25db   :  { %v4658_v56 = vmul.f32 0.5, %v4652_v4  ;;  %v4653_v1 = vadd.f32 1.0, %v6085_v60 }
0x25dd   :  { %v4659_v22 = vmul.f32 0.5, %v4653_v1  ;;  %v4664_v21 = vmul.f32 %v4658_v56, %v4606_v46 }
0x25df   :  { %v4665_v19 = vmul.f32 %v4659_v22, %v4609_v16 }
0x25e1   :  { %v4668_v12 = vpack.c.bf16 %v4665_v19, %v4664_v21 }
0x25e3   :  { %5710 = vmatmul.mubr.msk.bf16.gmra.mrb[156].mxu1 %vm2463_vm7, %v4668_v12 }
0x2613   :  { %v4749_v13 = vpop.f32.mrb[148].mxu1 }
0x2614   :  { %v5703_v29 = vpop.f32.mrb[149].mxu1  ;;  %v4750_v17 = vadd.f32 %v4749_v13, %v4681_v15 }
0x2615   :  { %v4752_v40 = vpop.f32.mrb[150].mxu1 }
0x2616   :  { %v5704_v14 = vpop.f32.mrb[151].mxu1  ;;  %v4768_v7 = vadd.f32 %v4750_v17, %v7752_v39  ;;  %v5821_v39 = vld [vmem:[#allocation16 + $0x8] sm:$0xff]  }
0x2617   :  { %5716 = vmatpush3.bf16.msra.mxu0 %v5821_v39 }
0x261d   :  { %v4756_v62 = vpop.f32.mrb[152].mxu1 }
0x261e   :  { %v5707_v44 = vpop.f32.mrb[153].mxu1 }
0x261f   :  { %v4758_v26 = vpop.f32.mrb[154].mxu1 }
0x2620   :  { %v4759_v30 = vadd.f32 %v4758_v26, %v4681_v15  ;;  %v5708_v18 = vpop.f32.mrb[155].mxu1 }
0x2622   :  { %v4769_v63 = vadd.f32 %v4759_v30, %v7762_v3 }
0x2624   :  { %v4771_v45 = vrot.slane %v4769_v63, 7 }
0x2626   :  { %v4774_v23 = vsel %vm4773_vm8, %v4768_v7, %v4771_v45 }
0x2627   :  { %v4777_v55 = vsel %vm4776_vm9, %v4774_v23, 0.0 }
0x2628   :  { %4778 = vadd.xlane.f32.xlu1 %v4777_v55 }
0x26b5   :  { %v4779_v59 = vpop.xlane.xlu1 %4778 }
0x26b6   :  { %v4780_v54 = vmul.f32 0.03125, %v4779_v59  ;;  %v4763_v11 = vpop.f32.mrb[156].mxu1 }
0x26b7   :  { %v5711_v6 = vpop.f32.mrb[157].mxu1 }
0x26b8   :  { %v4781_v47 = vsub.f32 %v4774_v23, %v4780_v54  ;;  %v4765_v28 = vpop.f32.mrb[158].mxu1 }
0x26b9   :  { %v5712_v2 = vpop.f32.mrb[159].mxu1 }
0x26ba   :  { %v4782_v41 = vmul.f32 %v4781_v47, %v4781_v47 }
0x26bc   :  { %v4783_v49 = vsel %vm4776_vm9, %v4782_v41, 0.0 }
0x26bd   :  { %4784 = vadd.xlane.f32.xlu0 %v4783_v49 }
0x274a   :  { %v4785_v3 = vpop.xlane.xlu0 %4784 }
0x274b   :  { %v4786_v31 = vmul.f32 0.03125, %v4785_v3 }
0x274d   :  { %v4787_v33 = vadd.f32 1e-06, %v4786_v31 }
0x274f   :  { %6086 = vrsqrt.f32 %v4787_v33 }
0x2759   :  { %v6087_v42 = vpop.eup %6086 }
0x275a   :  { %v4789_v51 = vmul.f32 %v6087_v42, %v4781_v47 }
0x275c   :  { %v4794_v57 = vmul.f32 %v4793_v9, %v4789_v51 }
0x275e   :  { %v4799_v46 = vadd.f32 %v4798_v43, %v4794_v57 }
0x2760   :  { %v4800_v38 = vpack.c.bf16 %v4799_v46, %v4799_v46 }
0x2762   :  { %5718 = vmatmul.mubr.msk.bf16.vlgmr.msra.gmra.mrb[148].mxu0 %vm295_vm2, %v4800_v38 }
0x2835   :  { %v4858_v61 = vpop.f32.mrb[148].mxu0 }
0x2836   :  { %v4859_v53 = vadd.f32 %v4858_v61, %v4808_v0  ;;  %v5719_v16 = vpop.f32.mrb[149].mxu0 }
0x2837   :  { %v4861_v20 = vpop.f32.mrb[150].mxu0 }
0x2838   :  { %v5720_v25 = vpop.f32.mrb[151].mxu0  ;;  %4865 = vst.msk [vmem:[#allocation19] sm:$0x3] %vm4864_vm10, %v4859_v53 }
0x2839   :  { %6321 = shalt.err (!%p6318_p0)
}
0x283a   :  { %s6322_s6 = scalar_lea.hbm %s7855_s10, 32 }
0x283b   :  { %p6323_p1 = scmp.ne.s32.totalorder %s7855_s10, %s6322_s6  ;;  %p6326_p2 = scmp.lt.u32.totalorder %s6322_s6, %s7855_s10 }
0x283d   :  { %p6328_p3 = pnand %p6326_p2, %p6323_p1 }
0x283f   :  { %6331 = shalt.err (!%p6328_p3)
}
0x2840   :  { %4875 = dma.vmem_to_hbm [thread:$0]  %s4873_s13, 32, %s7855_s10, [#allocation4]  }
0x2841   :  { %6344 = dma.done.wait [#allocation4], 32  }
0x2842   :  { %6345 = vsyncadd [#allocation4], 4294967264 }
0x2843   :  { %4879 = vsyncpa [#allocation3], 1 }
0x2844   :  { %4880 = vsyncpa [#allocation6], 1 }
0x2845   :  { %4881 = vsyncpa [#allocation9], 1 }
0x2846   :  { %4882 = vsyncpa [#allocation12], 1 }
0x2847   :  { %4883 = vsyncpa [#allocation15], 1 }
0x2848   :  { %4884 = vsyncpa [#allocation18], 1 }
0x2849   :  { %4885 = vsyncpa [#allocation4], 1 }

</bundles_post_ra>
